<compile_context>
chip_gen: v7x
topology: tpu7x:2x2x1
jax: 0.10.0
libtpu: 0.0.40
codegen_flags: <defaults>
</compile_context>

<pallas_src>
import functools

import jax
import jax.numpy as jnp
from jax import lax
from jax.experimental import pallas as pl
from jax.experimental.pallas import tpu as pltpu


def _pick_th(H, W, C):
    """Row-chunk size: multiple-of-8 divisor of H with an f32 (TH,W,C)
    accumulator <= 128 KiB (bounds vreg/VMEM live ranges while keeping
    M = TH*W per MXU dot large)."""
    cands = [th for th in range(8, H + 1, 8) if H % th == 0]
    if not cands:
        return H
    good = [th for th in cands if th * W * C * 4 <= 128 * 1024]
    return max(good) if good else min(cands)


def _residual_block_kernel(x_ref, w1_ref, w2_ref, b1_ref, b2_ref, out_ref,
                           xp_ref, hp_ref, *slab_refs,
                           H, W, C, TH, use_slab):
    """One batch element per grid step.

    x_ref    : (H, W, C)       unpadded input, f32 (batch dim squeezed)
    w1_ref   : (9*C, C) [slab path] or (9, C, C) [direct path], BN scale folded, bf16
    w2_ref   : same layout as w1_ref
    b1/b2    : (1, C)          folded BatchNorm biases, f32
    out_ref  : (H, W, C)       output, f32
    xp_ref   : (H+2, W+2, C)   VMEM scratch: zero-padded input, bf16 (cast once)
    hp_ref   : (H+2, W+2, C)   VMEM scratch: zero-padded intermediate, bf16
    slab_refs: up to 2 x (TH, W, 9*C) bf16 im2col slabs (small-C path only)
    """
    f32 = jnp.float32
    bf16 = jnp.bfloat16
    n_chunks = H // TH

    # ---- zero only the 1-pixel border strips of the padded scratches; the
    # interior is fully overwritten every step.  Done every grid step on
    # purpose: on v7x with a megacore-parallel batch axis, core 1 never
    # executes program_id == 0, so first-step-only zeroing would be unsafe.
    zrow = jnp.zeros((1, W + 2, C), bf16)
    zcol = jnp.zeros((H + 2, 1, C), bf16)
    for ref in (xp_ref, hp_ref):
        ref[0:1, :, :] = zrow
        ref[H + 1:H + 2, :, :] = zrow
        ref[:, 0:1, :] = zcol
        ref[:, W + 1:W + 2, :] = zcol

    # ---- stage the unpadded input into the padded scratch interior, casting
    # to bf16 exactly once; the MXU consumes bf16 windows directly afterwards.
    xp_ref[1:H + 1, 1:W + 1, :] = x_ref[...].astype(bf16)

    # Folded BatchNorm biases (scales are already folded into the weights).
    bias1 = b1_ref[0]    # (C,) f32
    bias2 = b2_ref[0]    # (C,) f32

    def emit1(row0, y):
        # conv1 + bias + ReLU -> bf16 padded intermediate (single cast).
        hp_ref[pl.ds(row0 + 1, TH), 1:W + 1, :] = (
            jnp.maximum(y + bias1, 0.0).astype(bf16))

    def emit2(row0, y):
        # conv2 + bias + residual (exact f32 x) + ReLU -> output.
        ident = x_ref[pl.ds(row0, TH), :, :]
        out_ref[pl.ds(row0, TH), :, :] = jnp.maximum(
            y + bias2 + ident, 0.0).astype(out_ref.dtype)

    if use_slab:
        # ---- small-C path (K = 9*C < 128): one im2col MXU dot per row chunk.
        # Two slabs alternated by static chunk parity remove the WAR hazard
        # between chunk r+1's window copies and chunk r's dot.
        # TODO(synk): the t*C lane-offset stores are rotated/masked whenever
        #             C % 128 != 0; a lane-aligned (9, TH, W, C) slab needs a
        #             2-dim contraction (or space-to-depth repack), left as is.
        def conv_pass(src_ref, w_ref, emit):
            for r in range(n_chunks):
                slab = slab_refs[r % len(slab_refs)]
                row0 = r * TH
                for dy in range(3):
                    for dx in range(3):
                        t = dy * 3 + dx
                        slab[:, :, t * C:(t + 1) * C] = (
                            src_ref[row0 + dy:row0 + dy + TH, dx:dx + W, :])
                y = lax.dot_general(slab[...], w_ref[...],
                                    (((2,), (0,)), ((), ())),
                                    preferred_element_type=f32)    # (TH, W, C)
                emit(row0, y)
    else:
        # ---- production-C path (K = C, 9*C >= 128): no slab.  Accumulate 9
        # shifted bf16 dots straight from the padded-scratch windows inside a
        # fori_loop over row chunks (bounds code size / live ranges).
        def conv_pass(src_ref, w_ref, emit):
            def body(r, carry):
                row0 = pl.multiple_of(r * TH, TH)
                y = jnp.zeros((TH, W, C), f32)
                for dy in range(3):
                    for dx in range(3):
                        win = src_ref[pl.ds(row0 + dy, TH), dx:dx + W, :]
                        y = y + lax.dot_general(
                            win, w_ref[dy * 3 + dx],
                            (((2,), (0,)), ((), ())),
                            preferred_element_type=f32)            # (TH, W, C)
                emit(row0, y)
                return carry
            lax.fori_loop(0, n_chunks, body, 0, unroll=True)

    conv_pass(xp_ref, w1_ref, emit1)   # pass 1: conv1 -> BN1 -> ReLU
    conv_pass(hp_ref, w2_ref, emit2)   # pass 2: conv2 -> BN2 -> +x -> ReLU


def residual_block_pallas(x_nchw, w1, w2, bn1, bn2, *, eps=1e-5):
    """x_nchw: (B, C, H, W).  w1/w2: (3,3,Cin,Cout) HWIO.  bn*: (gamma, beta, mean, var)."""
    B, Cin, H, W = x_nchw.shape
    Cout = w1.shape[-1]
    assert Cin == Cout, "downsample=None requires in_channel == out_channel"
    C = Cout

    # NCHW -> NHWC (channels on the lane axis). Padding is done inside the kernel.
    x_nhwc = jnp.transpose(x_nchw, (0, 2, 3, 1)).astype(jnp.float32)

    # Fold inference-mode BatchNorm into per-channel scale/bias; fold the scale
    # into the conv weights so the kernel only adds a bias.
    def fold(bn):
        gamma, beta, mean, var = bn
        scale = (gamma / jnp.sqrt(var + eps)).astype(jnp.float32)
        bias = (beta - mean * scale).astype(jnp.float32)
        return scale, bias

    s1, b1 = fold(bn1)
    s2, b2 = fold(bn2)

    w1_f = w1.astype(jnp.float32) * s1[None, None, None, :]
    w2_f = w2.astype(jnp.float32) * s2[None, None, None, :]

    # Path selection: the single im2col dot only pays off while K = 9*C is
    # below the 128-lane contraction width; for production channel counts we
    # accumulate 9 shifted K=C dots directly (no slab).
    use_slab = (9 * C) < 128

    if use_slab:
        w1_k = w1_f.reshape(9 * C, C).astype(jnp.bfloat16)
        w2_k = w2_f.reshape(9 * C, C).astype(jnp.bfloat16)
        w_spec = pl.BlockSpec((9 * C, C), lambda b: (0, 0))
    else:
        w1_k = w1_f.reshape(9, C, C).astype(jnp.bfloat16)
        w2_k = w2_f.reshape(9, C, C).astype(jnp.bfloat16)
        w_spec = pl.BlockSpec((9, C, C), lambda b: (0, 0, 0))

    b1 = b1.reshape(1, C)
    b2 = b2.reshape(1, C)

    TH = _pick_th(H, W, C)
    assert H % TH == 0

    scratch = [pltpu.VMEM((H + 2, W + 2, C), jnp.bfloat16),   # padded input (bf16)
               pltpu.VMEM((H + 2, W + 2, C), jnp.bfloat16)]   # padded intermediate
    if use_slab:
        n_slabs = min(2, H // TH)
        scratch += [pltpu.VMEM((TH, W, 9 * C), jnp.bfloat16)
                    for _ in range(n_slabs)]

    # Explicit VMEM budget: bf16 padded scratches + slabs + double-buffered
    # f32 in/out blocks + weights/biases, with 2x headroom, capped to stay
    # portable on v7x (64 MiB physical VMEM per TensorCore).
    footprint = (2 * (H + 2) * (W + 2) * C * 2
                 + (2 * TH * W * 9 * C * 2 if use_slab else 0)
                 + 2 * 2 * H * W * C * 4
                 + 2 * 9 * C * C * 2 + 2 * C * 4)
    vmem_limit = int(min(64 * 1024 * 1024, max(2 * footprint, 32 * 1024 * 1024)))

    kernel = functools.partial(_residual_block_kernel, H=H, W=W, C=C, TH=TH,
                               use_slab=use_slab)

    out_nhwc = pl.pallas_call(
        kernel,
        out_shape=jax.ShapeDtypeStruct((B, H, W, C), jnp.float32),
        grid_spec=pltpu.PrefetchScalarGridSpec(
            num_scalar_prefetch=0,
            grid=(B,),
            in_specs=[
                pl.BlockSpec((None, H, W, C), lambda b: (b, 0, 0, 0)),   # x (unpadded)
                w_spec,                                                  # w1 (folded)
                w_spec,                                                  # w2 (folded)
                pl.BlockSpec((1, C), lambda b: (0, 0)),                  # bias1
                pl.BlockSpec((1, C), lambda b: (0, 0)),                  # bias2
            ],
            out_specs=pl.BlockSpec((None, H, W, C), lambda b: (b, 0, 0, 0)),
            scratch_shapes=scratch,
        ),
        compiler_params=pltpu.CompilerParams(
            dimension_semantics=("parallel",),
            vmem_limit_bytes=vmem_limit),
    )(x_nhwc, w1_k, w2_k, b1, b2)

    # Back to NCHW to match the PyTorch output convention.
    return jnp.transpose(out_nhwc, (0, 3, 1, 2))


def residual_block_forward(x_nchw, params, domain=-1):
    """Mirrors ResidualBlock.forward: returns (out, domain)."""
    out = residual_block_pallas(x_nchw, params["w1"], params["w2"],
                                params["bn1"], params["bn2"])
    return out, domain


def _reference(x_nchw, params, eps=1e-5):
    """Pure-JAX f32 reference (lax conv) for validation."""
    x = jnp.transpose(x_nchw, (0, 2, 3, 1)).astype(jnp.float32)
    dn = ("NHWC", "HWIO", "NHWC")

    def bn(h, p):
        gamma, beta, mean, var = p
        return (h - mean) / jnp.sqrt(var + eps) * gamma + beta

    h = lax.conv_general_dilated(x, params["w1"], (1, 1), "SAME",
                                 dimension_numbers=dn)
    h = jnp.maximum(bn(h, params["bn1"]), 0.0)
    h = lax.conv_general_dilated(h, params["w2"], (1, 1), "SAME",
                                 dimension_numbers=dn)
    h = bn(h, params["bn2"]) + x
    h = jnp.maximum(h, 0.0)
    return jnp.transpose(h, (0, 3, 1, 2))


def _make_params(key, C):
    ks = jax.random.split(key, 10)

    def bn(kg, kb, km, kv):
        return (1.0 + 0.1 * jax.random.normal(kg, (C,), jnp.float32),
                0.1 * jax.random.normal(kb, (C,), jnp.float32),
                0.1 * jax.random.normal(km, (C,), jnp.float32),
                1.0 + 0.1 * jax.random.uniform(kv, (C,), jnp.float32))

    return {
        "w1": 0.1 * jax.random.normal(ks[0], (3, 3, C, C), jnp.float32),
        "w2": 0.1 * jax.random.normal(ks[1], (3, 3, C, C), jnp.float32),
        "bn1": bn(ks[2], ks[3], ks[4], ks[5]),
        "bn2": bn(ks[6], ks[7], ks[8], ks[9]),
    }


if __name__ == "__main__":
    key = jax.random.PRNGKey(0)

    # ---- small-C (im2col slab) path: the module's toy configuration.
    B, C, H, W = 2, 4, 16, 16
    k_x, k_p, key = jax.random.split(key, 3)
    x = jax.random.normal(k_x, (B, C, H, W), jnp.float32)
    params = _make_params(k_p, C)

    out, domain = residual_block_forward(x, params, domain=-1)
    out = jax.block_until_ready(out)
    ref = _reference(x, params)
    assert out.shape == (B, C, H, W) and domain == -1
    max_err = jnp.max(jnp.abs(out - ref))
    # bf16 MXU inputs (f32 accumulation) -> bf16-appropriate tolerance vs f32 ref.
    assert jnp.allclose(out, ref, atol=5e-2, rtol=5e-2), f"slab path max abs err {max_err}"

    # ---- production-C (direct 9-dot, no-slab) path: exercised at a small shape.
    B2, C2, H2, W2 = 1, 64, 8, 8
    k_x2, k_p2, key = jax.random.split(key, 3)
    x2 = jax.random.normal(k_x2, (B2, C2, H2, W2), jnp.float32)
    params2 = _make_params(k_p2, C2)

    out2, _ = residual_block_forward(x2, params2, domain=-1)
    out2 = jax.block_until_ready(out2)
    ref2 = _reference(x2, params2)
    max_err2 = jnp.max(jnp.abs(out2 - ref2))
    # K = 9*64 bf16 accumulation through two convs -> looser absolute tolerance.
    assert jnp.allclose(out2, ref2, atol=1e-1, rtol=5e-2), f"direct path max abs err {max_err2}"

    print("KERNEL_OK")
</pallas_src>

<mosaic_0001>
module attributes {stable_mosaic.version = 11 : i64} {
  func.func @_residual_block_kernel(%arg0: i32, %arg1: memref<1x16x16x4xf32, #tpu.memory_space<vmem>>, %arg2: memref<36x4xbf16, #tpu.memory_space<vmem>>, %arg3: memref<36x4xbf16, #tpu.memory_space<vmem>>, %arg4: memref<1x4xf32, #tpu.memory_space<vmem>>, %arg5: memref<1x4xf32, #tpu.memory_space<vmem>>, %arg6: memref<1x16x16x4xf32, #tpu.memory_space<vmem>>, %arg7: memref<18x18x4xbf16, #tpu.memory_space<vmem>>, %arg8: memref<18x18x4xbf16, #tpu.memory_space<vmem>>, %arg9: memref<16x16x36xbf16, #tpu.memory_space<vmem>>) attributes {dimension_semantics = [#tpu.dimension_semantics<parallel>], iteration_bounds = array<i64: 2>, scalar_prefetch = 0 : i64, scratch_operands = 3 : i64, tpu.core_type = #tpu.core_type<tc>, window_params = [{transform_indices = @transform_0, window_bounds = array<i64: 1, 16, 16, 4>}, {pipeline_mode = #tpu.pipeline_mode<synchronous>, transform_indices = @transform_1, window_bounds = array<i64: 36, 4>}, {pipeline_mode = #tpu.pipeline_mode<synchronous>, transform_indices = @transform_2, window_bounds = array<i64: 36, 4>}, {pipeline_mode = #tpu.pipeline_mode<synchronous>, transform_indices = @transform_3, window_bounds = array<i64: 1, 4>}, {pipeline_mode = #tpu.pipeline_mode<synchronous>, transform_indices = @transform_4, window_bounds = array<i64: 1, 4>}, {transform_indices = @transform_5, window_bounds = array<i64: 1, 16, 16, 4>}]} {
    %cst = arith.constant 0.000000e+00 : bf16
    %0 = vector.broadcast %cst : bf16 to vector<1x18x4xbf16>
    %cst_0 = arith.constant 0.000000e+00 : bf16
    %1 = vector.broadcast %cst_0 : bf16 to vector<18x1x4xbf16>
    %c0 = arith.constant 0 : index
    %c0_1 = arith.constant 0 : index
    %c0_2 = arith.constant 0 : index
    %2 = vector.load %arg7[%c0, %c0_1, %c0_2] : memref<18x18x4xbf16, #tpu.memory_space<vmem>>, vector<1x18x4xbf16>
    tpu.vector_store %arg7[%c0, %c0_1, %c0_2], %0 {strides = array<i32>} : memref<18x18x4xbf16, #tpu.memory_space<vmem>>, vector<1x18x4xbf16>,
    %c17 = arith.constant 17 : index
    %c0_3 = arith.constant 0 : index
    %c0_4 = arith.constant 0 : index
    %3 = vector.load %arg7[%c17, %c0_3, %c0_4] : memref<18x18x4xbf16, #tpu.memory_space<vmem>>, vector<1x18x4xbf16>
    tpu.vector_store %arg7[%c17, %c0_3, %c0_4], %0 {strides = array<i32>} : memref<18x18x4xbf16, #tpu.memory_space<vmem>>, vector<1x18x4xbf16>,
    %c0_5 = arith.constant 0 : index
    %c0_6 = arith.constant 0 : index
    %c0_7 = arith.constant 0 : index
    %4 = vector.load %arg7[%c0_5, %c0_6, %c0_7] : memref<18x18x4xbf16, #tpu.memory_space<vmem>>, vector<18x1x4xbf16>
    tpu.vector_store %arg7[%c0_5, %c0_6, %c0_7], %1 {strides = array<i32>} : memref<18x18x4xbf16, #tpu.memory_space<vmem>>, vector<18x1x4xbf16>,
    %c0_8 = arith.constant 0 : index
    %c17_9 = arith.constant 17 : index
    %c0_10 = arith.constant 0 : index
    %5 = vector.load %arg7[%c0_8, %c17_9, %c0_10] : memref<18x18x4xbf16, #tpu.memory_space<vmem>>, vector<18x1x4xbf16>
    tpu.vector_store %arg7[%c0_8, %c17_9, %c0_10], %1 {strides = array<i32>} : memref<18x18x4xbf16, #tpu.memory_space<vmem>>, vector<18x1x4xbf16>,
    %c0_11 = arith.constant 0 : index
    %c0_12 = arith.constant 0 : index
    %c0_13 = arith.constant 0 : index
    %6 = vector.load %arg8[%c0_11, %c0_12, %c0_13] : memref<18x18x4xbf16, #tpu.memory_space<vmem>>, vector<1x18x4xbf16>
    tpu.vector_store %arg8[%c0_11, %c0_12, %c0_13], %0 {strides = array<i32>} : memref<18x18x4xbf16, #tpu.memory_space<vmem>>, vector<1x18x4xbf16>,
    %c17_14 = arith.constant 17 : index
    %c0_15 = arith.constant 0 : index
    %c0_16 = arith.constant 0 : index
    %7 = vector.load %arg8[%c17_14, %c0_15, %c0_16] : memref<18x18x4xbf16, #tpu.memory_space<vmem>>, vector<1x18x4xbf16>
    tpu.vector_store %arg8[%c17_14, %c0_15, %c0_16], %0 {strides = array<i32>} : memref<18x18x4xbf16, #tpu.memory_space<vmem>>, vector<1x18x4xbf16>,
    %c0_17 = arith.constant 0 : index
    %c0_18 = arith.constant 0 : index
    %c0_19 = arith.constant 0 : index
    %8 = vector.load %arg8[%c0_17, %c0_18, %c0_19] : memref<18x18x4xbf16, #tpu.memory_space<vmem>>, vector<18x1x4xbf16>
    tpu.vector_store %arg8[%c0_17, %c0_18, %c0_19], %1 {strides = array<i32>} : memref<18x18x4xbf16, #tpu.memory_space<vmem>>, vector<18x1x4xbf16>,
    %c0_20 = arith.constant 0 : index
    %c17_21 = arith.constant 17 : index
    %c0_22 = arith.constant 0 : index
    %9 = vector.load %arg8[%c0_20, %c17_21, %c0_22] : memref<18x18x4xbf16, #tpu.memory_space<vmem>>, vector<18x1x4xbf16>
    tpu.vector_store %arg8[%c0_20, %c17_21, %c0_22], %1 {strides = array<i32>} : memref<18x18x4xbf16, #tpu.memory_space<vmem>>, vector<18x1x4xbf16>,
    %c0_23 = arith.constant 0 : index
    %c0_24 = arith.constant 0 : index
    %c0_25 = arith.constant 0 : index
    %c0_26 = arith.constant 0 : index
    %10 = vector.load %arg1[%c0_23, %c0_24, %c0_25, %c0_26] : memref<1x16x16x4xf32, #tpu.memory_space<vmem>>, vector<1x16x16x4xf32>
    %11 = vector.shape_cast %10 : vector<1x16x16x4xf32> to vector<16x16x4xf32>
    %12 = arith.truncf %11 : vector<16x16x4xf32> to vector<16x16x4xbf16>
    %c1 = arith.constant 1 : index
    %c1_27 = arith.constant 1 : index
    %c0_28 = arith.constant 0 : index
    %13 = vector.load %arg7[%c1, %c1_27, %c0_28] : memref<18x18x4xbf16, #tpu.memory_space<vmem>>, vector<16x16x4xbf16>
    tpu.vector_store %arg7[%c1, %c1_27, %c0_28], %12 {strides = array<i32>} : memref<18x18x4xbf16, #tpu.memory_space<vmem>>, vector<16x16x4xbf16>,
    %c0_29 = arith.constant 0 : index
    %c0_30 = arith.constant 0 : index
    %14 = vector.load %arg4[%c0_29, %c0_30] : memref<1x4xf32, #tpu.memory_space<vmem>>, vector<1x4xf32>
    %15 = vector.shape_cast %14 : vector<1x4xf32> to vector<4xf32>
    %c0_31 = arith.constant 0 : index
    %c0_32 = arith.constant 0 : index
    %16 = vector.load %arg5[%c0_31, %c0_32] : memref<1x4xf32, #tpu.memory_space<vmem>>, vector<1x4xf32>
    %17 = vector.shape_cast %16 : vector<1x4xf32> to vector<4xf32>
    %c0_33 = arith.constant 0 : index
    %c0_34 = arith.constant 0 : index
    %c0_35 = arith.constant 0 : index
    %18 = vector.load %arg7[%c0_33, %c0_34, %c0_35] : memref<18x18x4xbf16, #tpu.memory_space<vmem>>, vector<16x16x4xbf16>
    %c0_36 = arith.constant 0 : index
    %c0_37 = arith.constant 0 : index
    %c0_38 = arith.constant 0 : index
    %19 = vector.load %arg9[%c0_36, %c0_37, %c0_38] : memref<16x16x36xbf16, #tpu.memory_space<vmem>>, vector<16x16x4xbf16>
    tpu.vector_store %arg9[%c0_36, %c0_37, %c0_38], %18 {strides = array<i32>} : memref<16x16x36xbf16, #tpu.memory_space<vmem>>, vector<16x16x4xbf16>,
    %c0_39 = arith.constant 0 : index
    %c1_40 = arith.constant 1 : index
    %c0_41 = arith.constant 0 : index
    %20 = vector.load %arg7[%c0_39, %c1_40, %c0_41] : memref<18x18x4xbf16, #tpu.memory_space<vmem>>, vector<16x16x4xbf16>
    %c0_42 = arith.constant 0 : index
    %c0_43 = arith.constant 0 : index
    %c4 = arith.constant 4 : index
    %21 = vector.load %arg9[%c0_42, %c0_43, %c4] : memref<16x16x36xbf16, #tpu.memory_space<vmem>>, vector<16x16x4xbf16>
    tpu.vector_store %arg9[%c0_42, %c0_43, %c4], %20 {strides = array<i32>} : memref<16x16x36xbf16, #tpu.memory_space<vmem>>, vector<16x16x4xbf16>,
    %c0_44 = arith.constant 0 : index
    %c2 = arith.constant 2 : index
    %c0_45 = arith.constant 0 : index
    %22 = vector.load %arg7[%c0_44, %c2, %c0_45] : memref<18x18x4xbf16, #tpu.memory_space<vmem>>, vector<16x16x4xbf16>
    %c0_46 = arith.constant 0 : index
    %c0_47 = arith.constant 0 : index
    %c8 = arith.constant 8 : index
    %23 = vector.load %arg9[%c0_46, %c0_47, %c8] : memref<16x16x36xbf16, #tpu.memory_space<vmem>>, vector<16x16x4xbf16>
    tpu.vector_store %arg9[%c0_46, %c0_47, %c8], %22 {strides = array<i32>} : memref<16x16x36xbf16, #tpu.memory_space<vmem>>, vector<16x16x4xbf16>,
    %c1_48 = arith.constant 1 : index
    %c0_49 = arith.constant 0 : index
    %c0_50 = arith.constant 0 : index
    %24 = vector.load %arg7[%c1_48, %c0_49, %c0_50] : memref<18x18x4xbf16, #tpu.memory_space<vmem>>, vector<16x16x4xbf16>
    %c0_51 = arith.constant 0 : index
    %c0_52 = arith.constant 0 : index
    %c12 = arith.constant 12 : index
    %25 = vector.load %arg9[%c0_51, %c0_52, %c12] : memref<16x16x36xbf16, #tpu.memory_space<vmem>>, vector<16x16x4xbf16>
    tpu.vector_store %arg9[%c0_51, %c0_52, %c12], %24 {strides = array<i32>} : memref<16x16x36xbf16, #tpu.memory_space<vmem>>, vector<16x16x4xbf16>,
    %c1_53 = arith.constant 1 : index
    %c1_54 = arith.constant 1 : index
    %c0_55 = arith.constant 0 : index
    %26 = vector.load %arg7[%c1_53, %c1_54, %c0_55] : memref<18x18x4xbf16, #tpu.memory_space<vmem>>, vector<16x16x4xbf16>
    %c0_56 = arith.constant 0 : index
    %c0_57 = arith.constant 0 : index
    %c16 = arith.constant 16 : index
    %27 = vector.load %arg9[%c0_56, %c0_57, %c16] : memref<16x16x36xbf16, #tpu.memory_space<vmem>>, vector<16x16x4xbf16>
    tpu.vector_store %arg9[%c0_56, %c0_57, %c16], %26 {strides = array<i32>} : memref<16x16x36xbf16, #tpu.memory_space<vmem>>, vector<16x16x4xbf16>,
    %c1_58 = arith.constant 1 : index
    %c2_59 = arith.constant 2 : index
    %c0_60 = arith.constant 0 : index
    %28 = vector.load %arg7[%c1_58, %c2_59, %c0_60] : memref<18x18x4xbf16, #tpu.memory_space<vmem>>, vector<16x16x4xbf16>
    %c0_61 = arith.constant 0 : index
    %c0_62 = arith.constant 0 : index
    %c20 = arith.constant 20 : index
    %29 = vector.load %arg9[%c0_61, %c0_62, %c20] : memref<16x16x36xbf16, #tpu.memory_space<vmem>>, vector<16x16x4xbf16>
    tpu.vector_store %arg9[%c0_61, %c0_62, %c20], %28 {strides = array<i32>} : memref<16x16x36xbf16, #tpu.memory_space<vmem>>, vector<16x16x4xbf16>,
    %c2_63 = arith.constant 2 : index
    %c0_64 = arith.constant 0 : index
    %c0_65 = arith.constant 0 : index
    %30 = vector.load %arg7[%c2_63, %c0_64, %c0_65] : memref<18x18x4xbf16, #tpu.memory_space<vmem>>, vector<16x16x4xbf16>
    %c0_66 = arith.constant 0 : index
    %c0_67 = arith.constant 0 : index
    %c24 = arith.constant 24 : index
    %31 = vector.load %arg9[%c0_66, %c0_67, %c24] : memref<16x16x36xbf16, #tpu.memory_space<vmem>>, vector<16x16x4xbf16>
    tpu.vector_store %arg9[%c0_66, %c0_67, %c24], %30 {strides = array<i32>} : memref<16x16x36xbf16, #tpu.memory_space<vmem>>, vector<16x16x4xbf16>,
    %c2_68 = arith.constant 2 : index
    %c1_69 = arith.constant 1 : index
    %c0_70 = arith.constant 0 : index
    %32 = vector.load %arg7[%c2_68, %c1_69, %c0_70] : memref<18x18x4xbf16, #tpu.memory_space<vmem>>, vector<16x16x4xbf16>
    %c0_71 = arith.constant 0 : index
    %c0_72 = arith.constant 0 : index
    %c28 = arith.constant 28 : index
    %33 = vector.load %arg9[%c0_71, %c0_72, %c28] : memref<16x16x36xbf16, #tpu.memory_space<vmem>>, vector<16x16x4xbf16>
    tpu.vector_store %arg9[%c0_71, %c0_72, %c28], %32 {strides = array<i32>} : memref<16x16x36xbf16, #tpu.memory_space<vmem>>, vector<16x16x4xbf16>,
    %c2_73 = arith.constant 2 : index
    %c2_74 = arith.constant 2 : index
    %c0_75 = arith.constant 0 : index
    %34 = vector.load %arg7[%c2_73, %c2_74, %c0_75] : memref<18x18x4xbf16, #tpu.memory_space<vmem>>, vector<16x16x4xbf16>
    %c0_76 = arith.constant 0 : index
    %c0_77 = arith.constant 0 : index
    %c32 = arith.constant 32 : index
    %35 = vector.load %arg9[%c0_76, %c0_77, %c32] : memref<16x16x36xbf16, #tpu.memory_space<vmem>>, vector<16x16x4xbf16>
    tpu.vector_store %arg9[%c0_76, %c0_77, %c32], %34 {strides = array<i32>} : memref<16x16x36xbf16, #tpu.memory_space<vmem>>, vector<16x16x4xbf16>,
    %c0_78 = arith.constant 0 : index
    %c0_79 = arith.constant 0 : index
    %c0_80 = arith.constant 0 : index
    %36 = vector.load %arg9[%c0_78, %c0_79, %c0_80] : memref<16x16x36xbf16, #tpu.memory_space<vmem>>, vector<16x16x36xbf16>
    %c0_81 = arith.constant 0 : index
    %c0_82 = arith.constant 0 : index
    %37 = vector.load %arg2[%c0_81, %c0_82] : memref<36x4xbf16, #tpu.memory_space<vmem>>, vector<36x4xbf16>
    %cst_83 = arith.constant dense<0.000000e+00> : vector<16x16x4xf32>
    %38 = tpu.matmul %36, %37, %cst_83 {dimension_numbers = #tpu.dot_dimension_numbers<[2], [0], [0, 1], [1], [0, 0, 0, 1, 1, 1], [], []>} : vector<16x16x36xbf16>, vector<36x4xbf16>, vector<16x16x4xf32> -> vector<16x16x4xf32>
    %39 = vector.shape_cast %15 : vector<4xf32> to vector<1x1x4xf32>
    %40 = vector.broadcast %39 : vector<1x1x4xf32> to vector<16x16x4xf32>
    %41 = arith.addf %38, %40 : vector<16x16x4xf32>
    %cst_84 = arith.constant 0.000000e+00 : f32
    %42 = vector.broadcast %cst_84 : f32 to vector<16x16x4xf32>
    %43 = arith.maximumf %41, %42 : vector<16x16x4xf32>
    %44 = arith.truncf %43 : vector<16x16x4xf32> to vector<16x16x4xbf16>
    %c1_85 = arith.constant 1 : index
    %c1_86 = arith.constant 1 : index
    %c0_87 = arith.constant 0 : index
    %45 = vector.load %arg8[%c1_85, %c1_86, %c0_87] : memref<18x18x4xbf16, #tpu.memory_space<vmem>>, vector<16x16x4xbf16>
    tpu.vector_store %arg8[%c1_85, %c1_86, %c0_87], %44 {strides = array<i32>} : memref<18x18x4xbf16, #tpu.memory_space<vmem>>, vector<16x16x4xbf16>,
    %c0_88 = arith.constant 0 : index
    %c0_89 = arith.constant 0 : index
    %c0_90 = arith.constant 0 : index
    %46 = vector.load %arg8[%c0_88, %c0_89, %c0_90] : memref<18x18x4xbf16, #tpu.memory_space<vmem>>, vector<16x16x4xbf16>
    %c0_91 = arith.constant 0 : index
    %c0_92 = arith.constant 0 : index
    %c0_93 = arith.constant 0 : index
    %47 = vector.load %arg9[%c0_91, %c0_92, %c0_93] : memref<16x16x36xbf16, #tpu.memory_space<vmem>>, vector<16x16x4xbf16>
    tpu.vector_store %arg9[%c0_91, %c0_92, %c0_93], %46 {strides = array<i32>} : memref<16x16x36xbf16, #tpu.memory_space<vmem>>, vector<16x16x4xbf16>,
    %c0_94 = arith.constant 0 : index
    %c1_95 = arith.constant 1 : index
    %c0_96 = arith.constant 0 : index
    %48 = vector.load %arg8[%c0_94, %c1_95, %c0_96] : memref<18x18x4xbf16, #tpu.memory_space<vmem>>, vector<16x16x4xbf16>
    %c0_97 = arith.constant 0 : index
    %c0_98 = arith.constant 0 : index
    %c4_99 = arith.constant 4 : index
    %49 = vector.load %arg9[%c0_97, %c0_98, %c4_99] : memref<16x16x36xbf16, #tpu.memory_space<vmem>>, vector<16x16x4xbf16>
    tpu.vector_store %arg9[%c0_97, %c0_98, %c4_99], %48 {strides = array<i32>} : memref<16x16x36xbf16, #tpu.memory_space<vmem>>, vector<16x16x4xbf16>,
    %c0_100 = arith.constant 0 : index
    %c2_101 = arith.constant 2 : index
    %c0_102 = arith.constant 0 : index
    %50 = vector.load %arg8[%c0_100, %c2_101, %c0_102] : memref<18x18x4xbf16, #tpu.memory_space<vmem>>, vector<16x16x4xbf16>
    %c0_103 = arith.constant 0 : index
    %c0_104 = arith.constant 0 : index
    %c8_105 = arith.constant 8 : index
    %51 = vector.load %arg9[%c0_103, %c0_104, %c8_105] : memref<16x16x36xbf16, #tpu.memory_space<vmem>>, vector<16x16x4xbf16>
    tpu.vector_store %arg9[%c0_103, %c0_104, %c8_105], %50 {strides = array<i32>} : memref<16x16x36xbf16, #tpu.memory_space<vmem>>, vector<16x16x4xbf16>,
    %c1_106 = arith.constant 1 : index
    %c0_107 = arith.constant 0 : index
    %c0_108 = arith.constant 0 : index
    %52 = vector.load %arg8[%c1_106, %c0_107, %c0_108] : memref<18x18x4xbf16, #tpu.memory_space<vmem>>, vector<16x16x4xbf16>
    %c0_109 = arith.constant 0 : index
    %c0_110 = arith.constant 0 : index
    %c12_111 = arith.constant 12 : index
    %53 = vector.load %arg9[%c0_109, %c0_110, %c12_111] : memref<16x16x36xbf16, #tpu.memory_space<vmem>>, vector<16x16x4xbf16>
    tpu.vector_store %arg9[%c0_109, %c0_110, %c12_111], %52 {strides = array<i32>} : memref<16x16x36xbf16, #tpu.memory_space<vmem>>, vector<16x16x4xbf16>,
    %c1_112 = arith.constant 1 : index
    %c1_113 = arith.constant 1 : index
    %c0_114 = arith.constant 0 : index
    %54 = vector.load %arg8[%c1_112, %c1_113, %c0_114] : memref<18x18x4xbf16, #tpu.memory_space<vmem>>, vector<16x16x4xbf16>
    %c0_115 = arith.constant 0 : index
    %c0_116 = arith.constant 0 : index
    %c16_117 = arith.constant 16 : index
    %55 = vector.load %arg9[%c0_115, %c0_116, %c16_117] : memref<16x16x36xbf16, #tpu.memory_space<vmem>>, vector<16x16x4xbf16>
    tpu.vector_store %arg9[%c0_115, %c0_116, %c16_117], %54 {strides = array<i32>} : memref<16x16x36xbf16, #tpu.memory_space<vmem>>, vector<16x16x4xbf16>,
    %c1_118 = arith.constant 1 : index
    %c2_119 = arith.constant 2 : index
    %c0_120 = arith.constant 0 : index
    %56 = vector.load %arg8[%c1_118, %c2_119, %c0_120] : memref<18x18x4xbf16, #tpu.memory_space<vmem>>, vector<16x16x4xbf16>
    %c0_121 = arith.constant 0 : index
    %c0_122 = arith.constant 0 : index
    %c20_123 = arith.constant 20 : index
    %57 = vector.load %arg9[%c0_121, %c0_122, %c20_123] : memref<16x16x36xbf16, #tpu.memory_space<vmem>>, vector<16x16x4xbf16>
    tpu.vector_store %arg9[%c0_121, %c0_122, %c20_123], %56 {strides = array<i32>} : memref<16x16x36xbf16, #tpu.memory_space<vmem>>, vector<16x16x4xbf16>,
    %c2_124 = arith.constant 2 : index
    %c0_125 = arith.constant 0 : index
    %c0_126 = arith.constant 0 : index
    %58 = vector.load %arg8[%c2_124, %c0_125, %c0_126] : memref<18x18x4xbf16, #tpu.memory_space<vmem>>, vector<16x16x4xbf16>
    %c0_127 = arith.constant 0 : index
    %c0_128 = arith.constant 0 : index
    %c24_129 = arith.constant 24 : index
    %59 = vector.load %arg9[%c0_127, %c0_128, %c24_129] : memref<16x16x36xbf16, #tpu.memory_space<vmem>>, vector<16x16x4xbf16>
    tpu.vector_store %arg9[%c0_127, %c0_128, %c24_129], %58 {strides = array<i32>} : memref<16x16x36xbf16, #tpu.memory_space<vmem>>, vector<16x16x4xbf16>,
    %c2_130 = arith.constant 2 : index
    %c1_131 = arith.constant 1 : index
    %c0_132 = arith.constant 0 : index
    %60 = vector.load %arg8[%c2_130, %c1_131, %c0_132] : memref<18x18x4xbf16, #tpu.memory_space<vmem>>, vector<16x16x4xbf16>
    %c0_133 = arith.constant 0 : index
    %c0_134 = arith.constant 0 : index
    %c28_135 = arith.constant 28 : index
    %61 = vector.load %arg9[%c0_133, %c0_134, %c28_135] : memref<16x16x36xbf16, #tpu.memory_space<vmem>>, vector<16x16x4xbf16>
    tpu.vector_store %arg9[%c0_133, %c0_134, %c28_135], %60 {strides = array<i32>} : memref<16x16x36xbf16, #tpu.memory_space<vmem>>, vector<16x16x4xbf16>,
    %c2_136 = arith.constant 2 : index
    %c2_137 = arith.constant 2 : index
    %c0_138 = arith.constant 0 : index
    %62 = vector.load %arg8[%c2_136, %c2_137, %c0_138] : memref<18x18x4xbf16, #tpu.memory_space<vmem>>, vector<16x16x4xbf16>
    %c0_139 = arith.constant 0 : index
    %c0_140 = arith.constant 0 : index
    %c32_141 = arith.constant 32 : index
    %63 = vector.load %arg9[%c0_139, %c0_140, %c32_141] : memref<16x16x36xbf16, #tpu.memory_space<vmem>>, vector<16x16x4xbf16>
    tpu.vector_store %arg9[%c0_139, %c0_140, %c32_141], %62 {strides = array<i32>} : memref<16x16x36xbf16, #tpu.memory_space<vmem>>, vector<16x16x4xbf16>,
    %c0_142 = arith.constant 0 : index
    %c0_143 = arith.constant 0 : index
    %c0_144 = arith.constant 0 : index
    %64 = vector.load %arg9[%c0_142, %c0_143, %c0_144] : memref<16x16x36xbf16, #tpu.memory_space<vmem>>, vector<16x16x36xbf16>
    %c0_145 = arith.constant 0 : index
    %c0_146 = arith.constant 0 : index
    %65 = vector.load %arg3[%c0_145, %c0_146] : memref<36x4xbf16, #tpu.memory_space<vmem>>, vector<36x4xbf16>
    %cst_147 = arith.constant dense<0.000000e+00> : vector<16x16x4xf32>
    %66 = tpu.matmul %64, %65, %cst_147 {dimension_numbers = #tpu.dot_dimension_numbers<[2], [0], [0, 1], [1], [0, 0, 0, 1, 1, 1], [], []>} : vector<16x16x36xbf16>, vector<36x4xbf16>, vector<16x16x4xf32> -> vector<16x16x4xf32>
    %c0_148 = arith.constant 0 : index
    %c0_149 = arith.constant 0 : index
    %c0_150 = arith.constant 0 : index
    %c0_151 = arith.constant 0 : index
    %67 = vector.load %arg1[%c0_148, %c0_149, %c0_150, %c0_151] : memref<1x16x16x4xf32, #tpu.memory_space<vmem>>, vector<1x16x16x4xf32>
    %68 = vector.shape_cast %67 : vector<1x16x16x4xf32> to vector<16x16x4xf32>
    %69 = vector.shape_cast %17 : vector<4xf32> to vector<1x1x4xf32>
    %70 = vector.broadcast %69 : vector<1x1x4xf32> to vector<16x16x4xf32>
    %71 = arith.addf %66, %70 : vector<16x16x4xf32>
    %72 = arith.addf %71, %68 : vector<16x16x4xf32>
    %cst_152 = arith.constant 0.000000e+00 : f32
    %73 = vector.broadcast %cst_152 : f32 to vector<16x16x4xf32>
    %74 = arith.maximumf %72, %73 : vector<16x16x4xf32>
    %c0_153 = arith.constant 0 : index
    %c0_154 = arith.constant 0 : index
    %c0_155 = arith.constant 0 : index
    %c0_156 = arith.constant 0 : index
    %75 = vector.load %arg6[%c0_153, %c0_154, %c0_155, %c0_156] : memref<1x16x16x4xf32, #tpu.memory_space<vmem>>, vector<1x16x16x4xf32>
    %76 = vector.shape_cast %75 : vector<1x16x16x4xf32> to vector<16x16x4xf32>
    %77 = vector.shape_cast %74 : vector<16x16x4xf32> to vector<1x16x16x4xf32>
    tpu.vector_store %arg6[%c0_153, %c0_154, %c0_155, %c0_156], %77 {strides = array<i32>} : memref<1x16x16x4xf32, #tpu.memory_space<vmem>>, vector<1x16x16x4xf32>,
    return
  }
  func.func @transform_0(%arg0: i32) -> (i32, i32, i32, i32) {
    %c0_i32 = arith.constant 0 : i32
    %c0_i32_0 = arith.constant 0 : i32
    %c0_i32_1 = arith.constant 0 : i32
    %c0_i32_2 = arith.constant 0 : i32
    return %arg0, %c0_i32, %c0_i32_0, %c0_i32_1 : i32, i32, i32, i32
  }
  func.func @transform_1(%arg0: i32) -> (i32, i32) {
    %c0_i32 = arith.constant 0 : i32
    %c0_i32_0 = arith.constant 0 : i32
    %c0_i32_1 = arith.constant 0 : i32
    return %c0_i32, %c0_i32_0 : i32, i32
  }
  func.func @transform_2(%arg0: i32) -> (i32, i32) {
    %c0_i32 = arith.constant 0 : i32
    %c0_i32_0 = arith.constant 0 : i32
    %c0_i32_1 = arith.constant 0 : i32
    return %c0_i32, %c0_i32_0 : i32, i32
  }
  func.func @transform_3(%arg0: i32) -> (i32, i32) {
    %c0_i32 = arith.constant 0 : i32
    %c0_i32_0 = arith.constant 0 : i32
    %c0_i32_1 = arith.constant 0 : i32
    return %c0_i32, %c0_i32_0 : i32, i32
  }
  func.func @transform_4(%arg0: i32) -> (i32, i32) {
    %c0_i32 = arith.constant 0 : i32
    %c0_i32_0 = arith.constant 0 : i32
    %c0_i32_1 = arith.constant 0 : i32
    return %c0_i32, %c0_i32_0 : i32, i32
  }
  func.func @transform_5(%arg0: i32) -> (i32, i32, i32, i32) {
    %c0_i32 = arith.constant 0 : i32
    %c0_i32_0 = arith.constant 0 : i32
    %c0_i32_1 = arith.constant 0 : i32
    %c0_i32_2 = arith.constant 0 : i32
    return %arg0, %c0_i32, %c0_i32_0, %c0_i32_1 : i32, i32, i32, i32
  }
}

</mosaic_0001>

<bundles_post_ra>
// kernel: tpu_custom_call.1
= control target key start
LH: loop header
LB: loop body
LE: loop exit
PB: predicated region body
PF: predicated region fallthrough
CT: control target
= control target key end

     0   :  { %s8938_s18 = smov 0   ;;  %s10685_s0 = inlined_call_operand.vmem [shape: f32[2,16,16,4], index: 0, kind: input, shape index: {}]   ;;  %s10686_s1 = inlined_call_operand.vmem [shape: bf16[36,4], index: 1, kind: input, shape index: {}]   ;;  %s10687_s2 = inlined_call_operand.vmem [shape: bf16[36,4], index: 2, kind: input, shape index: {}]   ;;  %s10688_s3 = inlined_call_operand.vmem [shape: f32[1,4], index: 3, kind: input, shape index: {}]   ;;  %s10689_s4 = inlined_call_operand.vmem [shape: f32[1,4], index: 4, kind: input, shape index: {}]   ;;  %s10690_s5 = inlined_call_operand.vmem [shape: f32[2,16,16,4], index: 5, kind: output, shape index: {}]  }
   0x1 LB: > { %s7609_s19 = sadd.s32 4294967295, %s8897_s18   ;;  %p7613_p0 = scmp.ge.s32.totalorder %s8897_s18, 1  ;;  %s8897_s18 = sphi %s8938_s18, %s15_s18  }
   0x2   : > { %p187_p1 = scmp.lt.s32.totalorder %s8897_s18, 3 }
   0x4   : > { %p188_p2 = pnand %p7613_p0, %p187_p1 }
   0x5   : > { %p215_p3 = scmp.lt.s32.totalorder (!%p188_p2), %s7609_s19, 1  ;;  %vm226_vm0 = vcmask (!%p188_p2), 27648   ;;  %vm229_vm1 = vcmask (!%p188_p2), 24576   ;;  %vm236_vm2 = vsmask.f32 (!%p188_p2), 256  ;;  %v8899_v4 = vmov (!%p188_p2), 0  }
   0x6   : > { %191 = sbr.rel (%p188_p2) target bundleno = 1083 (0x43b), region = 40  ;;  %vm8948_vm3 = vmand (!%p188_p2), %vm229_vm1, %vm236_vm2  ;;  %v241_v1 = vld [vmem:[#allocation2 + $0xc] sm:$0x1] (!%p188_p2)  ;;  %vm292_vm4 = vsmask.f32 (!%p188_p2), 7938  ;;  %vm1785_vm9 = vcmask (!%p188_p2), 1046528  }
   0x7   : > { %v242_v2 = vsel (!%p188_p2), %vm8948_vm3, 0, %v241_v1  ;;  %v244_v3 = vld [vmem:[#allocation2 + $0x18] sm:$0x1] (!%p188_p2)  ;;  %227 = vst.msk [vmem:[#allocation2] sm:$0xf] (!%p188_p2), %vm226_vm0, %v8899_v4  ;;  %vm8973_vm5 = vmand (!%p188_p2), %vm229_vm1, %vm292_vm4  ;;  %s8900_s24 = smov (!%p188_p2), 8  }
   0x8   : > { %243 = vst [vmem:[#allocation2 + $0xc] sm:$0x1] (!%p188_p2), %v242_v2  ;;  %228 = vst.msk [vmem:[#allocation2 + $0x4] sm:$0xf] (!%p188_p2), %vm226_vm0, %v8899_v4  ;;  %v245_v5 = vsel (!%p188_p2), %vm8948_vm3, 0, %v244_v3  ;;  %s8901_s25 = smov (!%p188_p2), 12  }
   0x9   : > { %230 = vst.msk [vmem:[#allocation2 + $0x8] sm:$0x1] (!%p188_p2), %vm229_vm1, %v8899_v4  ;;  %234 = vst.msk [vmem:[#allocation2 + $0xd4] sm:$0x1] (!%p188_p2), %vm229_vm1, %v8899_v4  ;;  %v247_v7 = vld [vmem:[#allocation2 + $0x24] sm:$0x1] (!%p188_p2) }
   0xa   : > { %232 = vst.msk [vmem:[#allocation2 + $0xcc] sm:$0xf] (!%p188_p2), %vm226_vm0, %v8899_v4  ;;  %233 = vst.msk [vmem:[#allocation2 + $0xd0] sm:$0xf] (!%p188_p2), %vm226_vm0, %v8899_v4  ;;  %v297_v8 = vld [vmem:[#allocation2 + $0x14] sm:$0x1] (!%p188_p2) }
   0xb   : > { %348 = vst.msk [vmem:[#allocation3] sm:$0xf] (!%p188_p2), %vm226_vm0, %v8899_v4  ;;  %349 = vst.msk [vmem:[#allocation3 + $0x4] sm:$0xf] (!%p188_p2), %vm226_vm0, %v8899_v4  ;;  %v248_v9 = vsel (!%p188_p2), %vm8948_vm3, 0, %v247_v7  ;;  %v298_v10 = vsel (!%p188_p2), %vm8973_vm5, 0, %v297_v8 }
   0xc   : > { %350 = vst.msk [vmem:[#allocation3 + $0x8] sm:$0x1] (!%p188_p2), %vm229_vm1, %v8899_v4  ;;  %354 = vst.msk [vmem:[#allocation3 + $0xd4] sm:$0x1] (!%p188_p2), %vm229_vm1, %v8899_v4  ;;  %v300_v11 = vld [vmem:[#allocation2 + $0x20] sm:$0x1] (!%p188_p2) }
   0xd   : > { %s10860_s19 = smov (!%p215_p3, %s7609_s19), 1  ;;  %352 = vst.msk [vmem:[#allocation3 + $0xcc] sm:$0xf] %vm226_vm0, %v8899_v4  ;;  %353 = vst.msk [vmem:[#allocation3 + $0xd0] sm:$0xf] %vm226_vm0, %v8899_v4  ;;  %v301_v15 = vsel %vm8973_vm5, 0, %v300_v11 }
   0xe   : > { %s8204_s20 = sshll.u32 %s10860_s19, 8  ;;  %246 = vst [vmem:[#allocation2 + $0x18] sm:$0x1] %v245_v5  ;;  %249 = vst [vmem:[#allocation2 + $0x24] sm:$0x1] %v248_v9  ;;  %s8902_s26 = smov 24  }
   0xf   : > { %s8982_s23 = scalar_lea.vmem %s10685_s0, %s8204_s20  ;;  %299 = vst [vmem:[#allocation2 + $0x14] sm:$0x1] %v298_v10  ;;  %302 = vst [vmem:[#allocation2 + $0x20] sm:$0x1] %v301_v15  ;;  %vm591_vm6 = vsmask.f32 4368 }
  0x10   : > { %v463_v12 = vld [vmem:[%s8982_s23] sm:$0xff]  ;;  %v464_v13 = vld [vmem:[%s8982_s23 + $0x8] sm:$0xff]  ;;  %v465_v14 = vld [vmem:[%s8982_s23 + $0x10] sm:$0xff]  ;;  %vm10695_vm10 = vsmask.f32 7424  ;;  %s8903_s27 = smov 4  }
  0x11   : > { %v8206_v16 = vpack.c.bf16 %v463_v12, %v463_v12  ;;  %v8207_v17 = vpack.c.bf16 %v464_v13, %v464_v13  ;;  %v466_v18 = vld [vmem:[%s8982_s23 + $0x18] sm:$0xff]  ;;  %v8208_v19 = vpack.c.bf16 %v465_v14, %v465_v14  ;;  %v467_v20 = vld [vmem:[%s8982_s23 + $0x20] sm:$0xff]  ;;  %v468_v21 = vld [vmem:[%s8982_s23 + $0x28] sm:$0xff]  ;;  %s8904_s28 = smov 20   ;;  %s8905_s29 = smov 32   ;;  %vm10696_vm11 = vcmask 31744  }
  0x12   : > { %v8209_v22 = vpack.c.bf16 %v466_v18, %v466_v18  ;;  %v8210_v23 = vpack.c.bf16 %v467_v20, %v467_v20  ;;  %v916_v28 = vld [vmem:[#allocation2 + $0xc] sm:$0xf]  ;;  %v294_v29 = vld [vmem:[#allocation2 + $0x8] sm:$0x1]  ;;  %v8996_v30 = vpack.c.bf16 %v468_v21, %v468_v21  ;;  %vm8999_vm7 = vmor %vm236_vm2, %vm591_vm6  ;;  %s8906_s30 = smov 16   ;;  %s8907_s6 = smov 28  }
  0x13   : > { %v594_v24 = vshrl.u32 %v8206_v16, 16  ;;  %v597_v25 = vshll.u32 %v8206_v16, 16  ;;  %v602_v26 = vshrl.u32 %v8207_v17, 16  ;;  %v605_v27 = vshll.u32 %v8207_v17, 16  ;;  %vm9007_vm8 = vmand %vm226_vm0, %vm292_vm4  ;;  %v9011_v37 = vld [vmem:[#allocation2] sm:$0xfe]  }
  0x14   : > { %v295_v34 = vsel %vm8973_vm5, 0, %v294_v29  ;;  %v611_v35 = vshrl.u32 %v8208_v19, 16  ;;  %v614_v38 = vshll.u32 %v8208_v19, 16  ;;  %v619_v39 = vshrl.u32 %v8209_v22, 16  ;;  %v238_v46 = vld [vmem:[#allocation2] sm:$0x1] }
  0x15   : > { %v596_v32 = vrot.slane %v594_v24, 7  ;;  %v604_v33 = vrot.slane %v602_v26, 7  ;;  %296 = vst [vmem:[#allocation2 + $0x8] sm:$0x1] %v295_v34  ;;  %v622_v40 = vshll.u32 %v8209_v22, 16  ;;  %v628_v41 = vshrl.u32 %v8210_v23, 16 }
  0x16   : > { %v1786_v47 = vrot.slane %v9011_v37, 1  ;;  %v613_v48 = vrot.slane %v611_v35, 7  ;;  %v621_v49 = vrot.slane %v619_v39, 7  ;;  %v239_v50 = vsel %vm8948_vm3, 0, %v238_v46  ;;  %v469_v51 = vld [vmem:[%s8982_s23 + $0x30] sm:$0xff] }
  0x17   : > { %v599_v42 = vor.u32 %v597_v25, %v596_v32  ;;  %v600_v43 = vrot.slane %v596_v32, 4  ;;  %v607_v44 = vor.u32 %v605_v27, %v604_v33  ;;  %v609_v45 = vrot.slane %v604_v33, 4  ;;  %v923_v54 = vld [vmem:[#allocation2 + $0x18] sm:$0xf]  ;;  %240 = vst [vmem:[#allocation2] sm:$0x1] %v239_v50 }
  0x18   : > { %v630_v55 = vrot.slane %v628_v41, 7  ;;  %v631_v56 = vshll.u32 %v8210_v23, 16  ;;  %v920_v57 = vld [vmem:[#allocation2 + $0x14] sm:$0x1]  ;;  %v616_v58 = vor.u32 %v614_v38, %v613_v48  ;;  %v617_v59 = vrot.slane %v613_v48, 4 }
  0x19   : > { %v608_v52 = vsel %vm8999_vm7, %v600_v43, %v607_v44  ;;  %v917_v53 = vsel %vm9007_vm8, %v599_v42, %v916_v28  ;;  %v624_v60 = vor.u32 %v622_v40, %v621_v49  ;;  %v626_v61 = vrot.slane %v621_v49, 4  ;;  %v930_v62 = vld [vmem:[#allocation2 + $0x24] sm:$0xf]  ;;  %v927_v63 = vld [vmem:[#allocation2 + $0x20] sm:$0x1] }
  0x1a   : > { %918 = vst [vmem:[#allocation2 + $0xc] sm:$0xf] %v917_v53  ;;  %919 = vst.msk [vmem:[#allocation2 + $0x10] sm:$0xf] %vm226_vm0, %v608_v52  ;;  %v633_v1 = vor.u32 %v631_v56, %v630_v55  ;;  %v634_v2 = vrot.slane %v630_v55, 4  ;;  %v636_v3 = vshrl.u32 %v8996_v30, 16  ;;  %v924_v8 = vsel %vm9007_vm8, %v616_v58, %v923_v54 }
  0x1b   : > { %v639_v4 = vshll.u32 %v8996_v30, 16  ;;  %v303_v5 = vld [vmem:[#allocation2 + $0x2c] sm:$0x1]  ;;  %v625_v7 = vsel %vm8999_vm7, %v617_v59, %v624_v60  ;;  %v921_v9 = vsel %vm8948_vm3, %v609_v45, %v920_v57  ;;  %v928_v10 = vsel %vm8948_vm3, %v626_v61, %v927_v63  ;;  %v250_v11 = vld [vmem:[#allocation2 + $0x30] sm:$0x1] }
  0x1c   : > { %v8405_v12 = vld [vmem:[#allocation2 + $0x8] ss:$0 sps:$4 sm:$0x11]   ;;  %925 = vst [vmem:[#allocation2 + $0x18] sm:$0xf] %v924_v8  ;;  %v9033_v13 = vrot.slane %v636_v3, 7  ;;  %v931_v14 = vsel %vm9007_vm8, %v633_v1, %v930_v62  ;;  %v9037_v15 = vpack.c.bf16 %v469_v51, %v469_v51 }
  0x1d   : > { %926 = vst.msk [vmem:[#allocation2 + $0x1c] sm:$0xf] %vm226_vm0, %v625_v7  ;;  %922 = vst [vmem:[#allocation2 + $0x14] sm:$0x1] %v921_v9  ;;  %v304_v17 = vsel %vm8973_vm5, 0, %v303_v5  ;;  %v1787_v18 = vrot.slane %v8405_v12, 1 }
  0x1e   : > { %929 = vst [vmem:[#allocation2 + $0x20] sm:$0x1] %v928_v10  ;;  %v8409_v16 = vld [vmem:[#allocation2 + $0x8] ss:$0 sps:$4 sm:$0x11]   ;;  %v641_v19 = vor.u32 %v639_v4, %v9033_v13  ;;  %v251_v20 = vsel %vm8948_vm3, 0, %v250_v11 }
  0x1f   : > { %932 = vst [vmem:[#allocation2 + $0x24] sm:$0xf] %v931_v14  ;;  %305 = vst [vmem:[#allocation2 + $0x2c] sm:$0x1] %v304_v17  ;;  %v8408_v21 = vld [vmem:[#allocation2] sm:$0xff]   ;;  %v1360_v22 = vshll.u32 %v8409_v16, 16  ;;  %v1788_v25 = vsel %vm1785_vm9, %v1786_v47, %v1787_v18 }
  0x20   : > { %v643_v23 = vrot.slane %v9033_v13, 4  ;;  %252 = vst [vmem:[#allocation2 + $0x30] sm:$0x1] %v251_v20  ;;  %v642_v26 = vsel %vm8999_vm7, %v634_v2, %v641_v19  ;;  %v645_v27 = vshrl.u32 %v9037_v15, 16  ;;  %1834 = vrot.lane.b32.xlu1 %v1788_v25, %s8900_s24  ;;  %v1353_v28 = vshrl.u32 %v8408_v21, 16  ;;  %v470_v16 = vld [vmem:[%s8982_s23 + $0x38] sm:$0xff] }
  0x21   : > { %v8403_v24 = vld [vmem:[#allocation2 + $0xc] sm:$0xff]   ;;  %v1355_v29 = vshll.u32 %v8408_v21, 16  ;;  %v1362_v30 = vrot.slane %v1360_v22, 1  ;;  %933 = vst.msk [vmem:[#allocation2 + $0x28] sm:$0xf] %vm226_vm0, %v642_v26  ;;  %v648_v32 = vshll.u32 %v9037_v15, 16 }
  0x22   : > { %2011 = vrot.lane.b32.xlu0 %v8403_v24, %s8901_s25  ;;  %v8411_v33 = vld [vmem:[#allocation2 + $0xc] sm:$0xfe]   ;;  %vm10692_vm12 = vcmask 64544   ;;  %vm10691_vm13 = vcmask 97344   ;;  %vm2059_vm14 = vcmask 130144   ;;  %vm2492_vm15 = vcmask 162944  }
  0x23   : > { %v1357_v35 = vrot.slane %v1355_v29, 1  ;;  %v8423_v37 = vld [vmem:[#allocation2 + $0xc] sm:$0xff]   ;;  %v2685_v39 = vrot.slane %v8411_v33, 1  ;;  %vm2781_vm1 = vcmask 195744   ;;  %vm2959_vm2 = vcmask 228544  }
  0x24   : > { %v8406_v34 = vld [vmem:[#allocation2 + $0x18] sm:$0xff]   ;;  %v8412_v41 = vld [vmem:[#allocation2 + $0x14] ss:$0 sps:$4 sm:$0x11]   ;;  %v8413_v44 = vld [vmem:[#allocation2 + $0xc] sm:$0xfe]  }
  0x25   : > { %v8407_v38 = vld [vmem:[#allocation2 + $0x18] sm:$0xff]   ;;  %v1358_v40 = vor.u32 %v1357_v35, %v1353_v28  ;;  %v8414_v45 = vld [vmem:[#allocation2 + $0x14] ss:$0 sps:$4 sm:$0x11]   ;;  %v1365_v46 = vshrl.u32 %v8423_v37, 16  ;;  %v2686_v48 = vrot.slane %v8412_v41, 1 }
  0x26   : > { %2911 = vrot.lane.b32.xlu0 %v8406_v34, %s8902_s26  ;;  %2013 = vrot.lane.b32.xlu1 %v8407_v38, %s8901_s25  ;;  %v8421_v42 = vld [vmem:[#allocation2 + $0x18] sm:$0xff]   ;;  %v1789_v49 = vrot.slane %v8413_v44, 1  ;;  %v1790_v50 = vrot.slane %v8414_v45, 1  ;;  %v8416_v52 = vld [vmem:[#allocation2 + $0x20] ss:$0 sps:$4 sm:$0x11]  }
  0x27   : > { %v1363_v43 = vsel %vm10695_vm10, %v1358_v40, %v1362_v30  ;;  %v8415_v51 = vld [vmem:[#allocation2 + $0x18] sm:$0xfe]   ;;  %v2265_v53 = vshrl.u32 %v8421_v42, 16  ;;  %v2687_v54 = vsel %vm1785_vm9, %v2685_v39, %v2686_v48  ;;  %v3586_v57 = vrot.slane %v8416_v52, 1  ;;  %v934_v59 = vld [vmem:[#allocation2 + $0x2c] sm:$0x1] }
  0x28   : > { %v8410_v47 = vld [vmem:[#allocation2 + $0x24] sm:$0xff]   ;;  %v1791_v55 = vsel %vm1785_vm9, %v1789_v49, %v1790_v50  ;;  %v3585_v56 = vrot.slane %v8415_v51, 1  ;;  %v8417_v58 = vld [vmem:[#allocation2 + $0x18] sm:$0xfe]   ;;  %v935_v61 = vsel %vm8948_vm3, %v643_v23, %v934_v59  ;;  %v2267_v62 = vshll.u32 %v8421_v42, 16  ;;  %v8427_v20 = vld [vmem:[#allocation2 + $0xc] sm:$0xff]  }
  0x29   : > { %v8418_v60 = vld [vmem:[#allocation2 + $0x20] ss:$0 sps:$4 sm:$0x11]   ;;  %v2688_v63 = vrot.slane %v8417_v58, 1  ;;  %936 = vst [vmem:[#allocation2 + $0x2c] sm:$0x1] %v935_v61 }
  0x2a   : > { %1544 = vrot.lane.b32.xlu0 %v1363_v43, %s8903_s27  ;;  %2913 = vrot.lane.b32.xlu1 %v8410_v47, %s8902_s26  ;;  %v8419_v1 = vld [vmem:[#allocation2 + $0x24] sm:$0xfe]   ;;  %v1367_v2 = vshll.u32 %v8423_v37, 16  ;;  %v3587_v3 = vsel %vm1785_vm9, %v3585_v56, %v3586_v57  ;;  %v2689_v4 = vrot.slane %v8418_v60, 1  ;;  %v2269_v5 = vrot.slane %v2267_v62, 1  ;;  %v8429_v41 = vld [vmem:[#allocation2 + $0x18] sm:$0xff]  }
  0x2b   : > { %v3588_v7 = vrot.slane %v8419_v1, 1  ;;  %v8422_v8 = vld [vmem:[#allocation2 + $0x20] ss:$0 sps:$4 sm:$0x11]   ;;  %v8425_v14 = vld [vmem:[#allocation2 + $0x24] sm:$0xff]   ;;  %v2253_v30 = vshrl.u32 %v8427_v20, 16  ;;  %v9071_v37 = vpack.c.bf16 %v470_v16, %v470_v16 }
  0x2c   : > { %v2690_v9 = vsel %vm1785_vm9, %v2688_v63, %v2689_v4  ;;  %v2270_v10 = vor.u32 %v2269_v5, %v2265_v53  ;;  %v2272_v11 = vshll.u32 %v8422_v8, 16  ;;  %v8424_v12 = vld [vmem:[#allocation2 + $0x14] ss:$0 sps:$4 sm:$0x11]   ;;  %v1369_v13 = vrot.slane %v1367_v2, 1  ;;  %v8431_v45 = vld [vmem:[#allocation2 + $0x18] sm:$0xff]  }
  0x2d   : > { %v1372_v18 = vshll.u32 %v8424_v12, 16  ;;  %v3165_v19 = vshrl.u32 %v8425_v14, 16  ;;  %v3167_v22 = vshll.u32 %v8425_v14, 16  ;;  %v2255_v33 = vshll.u32 %v8427_v20, 16  ;;  %v8433_v53 = vld [vmem:[#allocation2 + $0x24] sm:$0xff]  }
  0x2e   : > { %2733 = vrot.lane.b32.xlu0 %v2687_v54, %s8904_s28  ;;  %1836 = vrot.lane.b32.xlu1 %v1791_v55, %s8900_s24  ;;  %v2274_v17 = vrot.slane %v2272_v11, 1  ;;  %v1370_v24 = vor.u32 %v1369_v13, %v1365_v46  ;;  %v8428_v35 = vld [vmem:[#allocation2 + $0x14] ss:$0 sps:$4 sm:$0x11]   ;;  %v1377_v48 = vshrl.u32 %v8429_v41, 16  ;;  %v1379_v49 = vshll.u32 %v8429_v41, 16 }
  0x2f   : > { %v1374_v25 = vrot.slane %v1372_v18, 1  ;;  %v3169_v29 = vrot.slane %v3167_v22, 1  ;;  %v2257_v40 = vrot.slane %v2255_v33, 1  ;;  %v2260_v43 = vshll.u32 %v8428_v35, 16  ;;  %v8435_v11 = vld [vmem:[#allocation2 + $0x18] sm:$0xfe]  }
  0x30   : > { %v8420_v21 = vld [vmem:[#allocation2 + $0x2c] ss:$0 sps:$4 sm:$0x11]   ;;  %v2275_v23 = vsel %vm10695_vm10, %v2270_v10, %v2274_v17  ;;  %v8430_v44 = vld [vmem:[#allocation2 + $0x20] ss:$0 sps:$4 sm:$0x11]  }
  0x31   : > { %v8426_v26 = vld [vmem:[#allocation2 + $0x2c] ss:$0 sps:$4 sm:$0x11]   ;;  %v3589_v28 = vrot.slane %v8420_v21, 1  ;;  %v3170_v39 = vor.u32 %v3169_v29, %v3165_v19  ;;  %v1375_v46 = vsel %vm10695_vm10, %v1370_v24, %v1374_v25  ;;  %v2258_v47 = vor.u32 %v2257_v40, %v2253_v30  ;;  %v471_v13 = vld [vmem:[%s8982_s23 + $0x40] sm:$0xff] }
  0x32   : > { %3633 = vrot.lane.b32.xlu0 %v3587_v3, %s8905_s29  ;;  %2735 = vrot.lane.b32.xlu1 %v2690_v9, %s8904_s28  ;;  %v3172_v34 = vshll.u32 %v8426_v26, 16  ;;  %v2262_v51 = vrot.slane %v2260_v43, 1  ;;  %v1384_v52 = vshll.u32 %v8430_v44, 16  ;;  %v653_v54 = vshrl.u32 %v9071_v37, 16  ;;  %v472_v18 = vld [vmem:[%s8982_s23 + $0x48] sm:$0xff] }
  0x33   : > { %v3590_v38 = vsel %vm1785_vm9, %v3588_v7, %v3589_v28  ;;  %v1381_v55 = vrot.slane %v1379_v49, 1  ;;  %v8432_v56 = vld [vmem:[#allocation2 + $0x20] ss:$0 sps:$4 sm:$0x11]   ;;  %v3153_v57 = vshrl.u32 %v8431_v45, 16  ;;  %v3155_v58 = vshll.u32 %v8431_v45, 16 }
  0x34   : > { %v3174_v42 = vrot.slane %v3172_v34, 1  ;;  %v2263_v59 = vsel %vm10695_vm10, %v2258_v47, %v2262_v51  ;;  %v1386_v60 = vrot.slane %v1384_v52, 1  ;;  %v1389_v61 = vshrl.u32 %v8433_v53, 16  ;;  %v8434_v3 = vld [vmem:[#allocation2 + $0x2c] ss:$0 sps:$4 sm:$0x11]  }
  0x35   : > { %v1382_v62 = vor.u32 %v1381_v55, %v1377_v48  ;;  %v3157_v63 = vrot.slane %v3155_v58, 1  ;;  %v3160_v1 = vshll.u32 %v8432_v56, 16  ;;  %v1391_v2 = vshll.u32 %v8433_v53, 16  ;;  %v8436_v12 = vld [vmem:[#allocation2 + $0x20] ss:$0 sps:$4 sm:$0x11]  }
  0x36   : > { %2446 = vrot.lane.b32.xlu1 %v2275_v23, %s8906_s30  ;;  %3635 = vrot.lane.b32.xlu0 %v3590_v38, %s8905_s29  ;;  %v3175_v50 = vsel %vm10695_vm10, %v3170_v39, %v3174_v42  ;;  %v647_v4 = vrot.slane %v645_v27, 7  ;;  %v1396_v10 = vshll.u32 %v8434_v3, 16  ;;  %v8441_v27 = vld [vmem:[#allocation2 + $0x24] sm:$0xff]   ;;  %v1792_v20 = vrot.slane %v8435_v11, 1  ;;  %v306_v24 = vld [vmem:[#allocation2 + $0x38] sm:$0x1] }
  0x37   : > { %v1387_v5 = vsel %vm10695_vm10, %v1382_v62, %v1386_v60  ;;  %v3158_v7 = vor.u32 %v3157_v63, %v3153_v57  ;;  %v3162_v8 = vrot.slane %v3160_v1, 1  ;;  %v1393_v9 = vrot.slane %v1391_v2, 1  ;;  %v8437_v22 = vld [vmem:[#allocation2 + $0x24] sm:$0xfe]   ;;  %v253_v28 = vld [vmem:[#allocation2 + $0x3c] sm:$0x1] }
  0x38   : > { %v650_v17 = vor.u32 %v648_v32, %v647_v4  ;;  %v1398_v19 = vrot.slane %v1396_v10, 1  ;;  %v1793_v21 = vrot.slane %v8436_v12, 1  ;;  %v651_v23 = vrot.slane %v647_v4, 4  ;;  %v8438_v25 = vld [vmem:[#allocation2 + $0x2c] ss:$0 sps:$4 sm:$0x11]  }
  0x39   : > { %v3163_v14 = vsel %vm10695_vm10, %v3158_v7, %v3162_v8  ;;  %v1394_v16 = vor.u32 %v1393_v9, %v1389_v61  ;;  %v9091_v26 = vrot.slane %v653_v54, 7  ;;  %v1795_v30 = vrot.slane %v8437_v22, 1  ;;  %v937_v32 = vld [vmem:[#allocation2 + $0x30] sm:$0xf]  ;;  %v8439_v40 = vld [vmem:[#allocation2 + $0x24] sm:$0xff]   ;;  %v474_v3 = vld [vmem:[%s8982_s23 + $0x58] sm:$0xff] }
  0x3a   : > { %3346 = vrot.lane.b32.xlu1 %v3175_v50, %s8907_s6  ;;  %1546 = vrot.lane.b32.xlu0 %v1375_v46, %s8903_s27  ;;  %v656_v15 = vshll.u32 %v9071_v37, 16  ;;  %v1794_v33 = vsel %vm1785_vm9, %v1792_v20, %v1793_v21  ;;  %v1796_v34 = vrot.slane %v8438_v25, 1  ;;  %v938_v35 = vsel %vm9007_vm8, %v650_v17, %v937_v32  ;;  %v473_v39 = vld [vmem:[%s8982_s23 + $0x50] sm:$0xff]  ;;  %v8442_v42 = vld [vmem:[#allocation2 + $0x2c] ss:$0 sps:$4 sm:$0x11]  }
  0x3b   : > { %v1399_v29 = vsel %vm10695_vm10, %v1394_v16, %v1398_v19  ;;  %v8214_v38 = vpack.c.bf16 %v471_v13, %v471_v13  ;;  %939 = vst [vmem:[#allocation2 + $0x30] sm:$0xf] %v938_v35  ;;  %v2277_v43 = vshrl.u32 %v8441_v27, 16  ;;  %v8215_v44 = vpack.c.bf16 %v472_v18, %v472_v18  ;;  %v309_v45 = vld [vmem:[#allocation2 + $0x44] sm:$0x1] }
  0x3c   : > { %v658_v41 = vor.u32 %v656_v15, %v9091_v26  ;;  %v1797_v37 = vsel %vm1785_vm9, %v1795_v30, %v1796_v34  ;;  %v2279_v46 = vshll.u32 %v8441_v27, 16  ;;  %v307_v47 = vsel %vm8973_vm5, 0, %v306_v24  ;;  %v256_v48 = vld [vmem:[#allocation2 + $0x48] sm:$0x1] }
  0x3d   : > { %v2284_v50 = vshll.u32 %v8442_v42, 16  ;;  %308 = vst [vmem:[#allocation2 + $0x38] sm:$0x1] %v307_v47  ;;  %v8445_v51 = vld [vmem:[#allocation2 + $0x24] sm:$0xfe]   ;;  %v254_v52 = vsel %vm8948_vm3, 0, %v253_v28  ;;  %v9110_v53 = vpack.c.bf16 %v473_v39, %v473_v39  ;;  %v8217_v12 = vpack.c.bf16 %v474_v3, %v474_v3 }
  0x3e   : > { %2444 = vrot.lane.b32.xlu0 %v2263_v59, %s8906_s30  ;;  %1548 = vrot.lane.b32.xlu1 %v1387_v5, %s8903_s27  ;;  %v659_v49 = vsel %vm8999_vm7, %v651_v23, %v658_v41  ;;  %v660_v54 = vrot.slane %v9091_v26, 4  ;;  %v2281_v55 = vrot.slane %v2279_v46, 1  ;;  %v8446_v56 = vld [vmem:[#allocation2 + $0x2c] ss:$0 sps:$4 sm:$0x11]   ;;  %v662_v57 = vshrl.u32 %v8214_v38, 16 }
  0x3f   : > { %940 = vst.msk [vmem:[#allocation2 + $0x34] sm:$0xf] %vm226_vm0, %v659_v49  ;;  %255 = vst [vmem:[#allocation2 + $0x3c] sm:$0x1] %v254_v52  ;;  %v2286_v58 = vrot.slane %v2284_v50, 1  ;;  %v665_v59 = vshll.u32 %v8214_v38, 16 }
  0x40   : > { %v670_v60 = vshrl.u32 %v8215_v44, 16  ;;  %v673_v61 = vshll.u32 %v8215_v44, 16  ;;  %v2282_v62 = vor.u32 %v2281_v55, %v2277_v43  ;;  %v2691_v63 = vrot.slane %v8445_v51, 1 }
  0x41   : > { %v664_v1 = vrot.slane %v662_v57, 7  ;;  %v310_v2 = vsel %vm8973_vm5, 0, %v309_v45  ;;  %v2692_v4 = vrot.slane %v8446_v56, 1  ;;  %v257_v7 = vsel %vm8948_vm3, 0, %v256_v48 }
  0x42   : > { %3344 = vrot.lane.b32.xlu0 %v3163_v14, %s8907_s6  ;;  %1550 = vrot.lane.b32.xlu1 %v1399_v29, %s8903_s27  ;;  %v672_v5 = vrot.slane %v670_v60, 7  ;;  %311 = vst [vmem:[#allocation2 + $0x44] sm:$0x1] %v310_v2  ;;  %v679_v8 = vshrl.u32 %v9110_v53, 16  ;;  %v2287_v9 = vsel %vm10695_vm10, %v2282_v62, %v2286_v58  ;;  %258 = vst [vmem:[#allocation2 + $0x48] sm:$0x1] %v257_v7 }
  0x43   : > { %v668_v10 = vrot.slane %v664_v1, 4  ;;  %v667_v14 = vor.u32 %v665_v59, %v664_v1  ;;  %v2693_v20 = vsel %vm1785_vm9, %v2691_v63, %v2692_v4  ;;  %v687_v24 = vshrl.u32 %v8217_v12, 16 }
  0x44   : > { %v675_v11 = vor.u32 %v673_v61, %v672_v5  ;;  %v941_v13 = vld [vmem:[#allocation2 + $0x38] sm:$0x1]  ;;  %v677_v18 = vrot.slane %v672_v5, 4  ;;  %v9130_v22 = vrot.slane %v679_v8, 7  ;;  %v682_v30 = vshll.u32 %v9110_v53, 16 }
  0x45   : > { %v942_v17 = vsel %vm8948_vm3, %v660_v54, %v941_v13  ;;  %v9142_v41 = vrot.slane %v687_v24, 7  ;;  %v690_v46 = vshll.u32 %v8217_v12, 16  ;;  %vm3392_vm4 = vcmask 261344  }
  0x46   : > { %1838 = vrot.lane.b32.xlu0 %v1794_v33, %s8900_s24  ;;  %1840 = vrot.lane.b32.xlu1 %v1797_v37, %s8900_s24  ;;  %v8440_v16 = vld [vmem:[#allocation2 + $0x30] sm:$0xff]   ;;  %v676_v27 = vsel %vm8999_vm7, %v668_v10, %v675_v11  ;;  %943 = vst [vmem:[#allocation2 + $0x38] sm:$0x1] %v942_v17  ;;  %v944_v23 = vld [vmem:[#allocation2 + $0x3c] sm:$0xf]  ;;  %v685_v39 = vrot.slane %v9130_v22, 4 }
  0x47   : > { %v8443_v19 = vld [vmem:[#allocation2 + $0x30] sm:$0xff]   ;;  %947 = vst.msk [vmem:[#allocation2 + $0x40] sm:$0xf] %vm226_vm0, %v676_v27  ;;  %v945_v28 = vsel %vm9007_vm8, %v667_v14, %v944_v23  ;;  %v692_v54 = vor.u32 %v690_v46, %v9142_v41  ;;  %v475_v17 = vld [vmem:[%s8982_s23 + $0x60] sm:$0xff]  ;;  %vm10694_vm6 = vcmask 294144  }
  0x48   : > { %v8447_v21 = vld [vmem:[#allocation2 + $0x30] sm:$0xfe]   ;;  %v2291_v25 = vshll.u32 %v8443_v19, 16  ;;  %946 = vst [vmem:[#allocation2 + $0x3c] sm:$0xf] %v945_v28  ;;  %v2289_v33 = vshrl.u32 %v8443_v19, 16 }
  0x49   : > { %v8449_v26 = vld [vmem:[#allocation2 + $0x30] sm:$0xff]   ;;  %v948_v15 = vld [vmem:[#allocation2 + $0x44] sm:$0x1]  ;;  %v2694_v42 = vrot.slane %v8447_v21, 1  ;;  %v693_v59 = vsel %vm8999_vm7, %v685_v39, %v692_v54 }
  0x4a   : > { %2015 = vrot.lane.b32.xlu0 %v8439_v40, %s8901_s25  ;;  %2017 = vrot.lane.b32.xlu1 %v8440_v16, %s8901_s25  ;;  %v8451_v29 = vld [vmem:[#allocation2 + $0x30] sm:$0xff]   ;;  %v949_v35 = vsel %vm8948_vm3, %v677_v18, %v948_v15  ;;  %v2293_v40 = vrot.slane %v2291_v25, 1  ;;  %954 = vst.msk [vmem:[#allocation2 + $0x4c] sm:$0xf] %vm226_vm0, %v693_v59 }
  0x4b   : > { %v8455_v32 = vld [vmem:[#allocation2 + $0x30] sm:$0xfe]   ;;  %v3179_v34 = vshll.u32 %v8451_v29, 16  ;;  %950 = vst [vmem:[#allocation2 + $0x44] sm:$0x1] %v949_v35  ;;  %v3177_v43 = vshrl.u32 %v8451_v29, 16 }
  0x4c   : > { %v9139_v38 = vld [vmem:[#allocation2 + $0x30] sm:$0xff]   ;;  %v3591_v44 = vrot.slane %v8455_v32, 1  ;;  %v2294_v50 = vor.u32 %v2293_v40, %v2289_v33  ;;  %v476_v35 = vld [vmem:[%s8982_s23 + $0x68] sm:$0xff] }
  0x4d   : > { %v1403_v45 = vshll.u32 %v9139_v38, 16  ;;  %v8444_v37 = vld [vmem:[#allocation2 + $0x38] ss:$0 sps:$4 sm:$0x11]   ;;  %v3181_v48 = vrot.slane %v3179_v34, 1  ;;  %v1401_v52 = vshrl.u32 %v9139_v38, 16 }
  0x4e   : > { %2448 = vrot.lane.b32.xlu0 %v2287_v9, %s8906_s30  ;;  %v8448_v47 = vld [vmem:[#allocation2 + $0x38] ss:$0 sps:$4 sm:$0x11]   ;;  %v9146_v49 = vld [vmem:[#allocation2 + $0x30] sm:$0xfe]   ;;  %v2296_v51 = vshll.u32 %v8444_v37, 16 }
  0x4f   : > { %v2695_v55 = vrot.slane %v8448_v47, 1  ;;  %v1405_v56 = vrot.slane %v1403_v45, 1  ;;  %v8452_v58 = vld [vmem:[#allocation2 + $0x38] ss:$0 sps:$4 sm:$0x11]   ;;  %v8453_v60 = vld [vmem:[#allocation2 + $0x3c] sm:$0xff]   ;;  %v3182_v63 = vor.u32 %v3181_v48, %v3177_v43 }
  0x50   : > { %v2298_v57 = vrot.slane %v2296_v51, 1  ;;  %v3184_v1 = vshll.u32 %v8452_v58, 16  ;;  %v8456_v2 = vld [vmem:[#allocation2 + $0x38] ss:$0 sps:$4 sm:$0x11]   ;;  %v3191_v3 = vshll.u32 %v8453_v60, 16 }
  0x51   : > { %v8461_v5 = vld [vmem:[#allocation2 + $0x3c] sm:$0xff]   ;;  %v1798_v7 = vrot.slane %v9146_v49, 1  ;;  %v2696_v8 = vsel %vm1785_vm9, %v2694_v42, %v2695_v55  ;;  %v3189_v10 = vshrl.u32 %v8453_v60, 16  ;;  %v3592_v11 = vrot.slane %v8456_v2, 1  ;;  %v312_v21 = vld [vmem:[#allocation2 + $0x50] sm:$0x1] }
  0x52   : > { %2737 = vrot.lane.b32.xlu0 %v2693_v20, %s8904_s28  ;;  %v8454_v61 = vld [vmem:[#allocation2 + $0x44] ss:$0 sps:$4 sm:$0x11]   ;;  %v2299_v62 = vsel %vm10695_vm10, %v2294_v50, %v2298_v57  ;;  %v3186_v9 = vrot.slane %v3184_v1, 1  ;;  %v8450_v13 = vld [vmem:[#allocation2 + $0x3c] sm:$0xff]   ;;  %v3193_v14 = vrot.slane %v3191_v3, 1  ;;  %v8218_v42 = vpack.c.bf16 %v475_v17, %v475_v17 }
  0x53   : > { %2450 = vrot.lane.b32.xlu1 %v2299_v62, %s8906_s30  ;;  %v3196_v4 = vshll.u32 %v8454_v61, 16  ;;  %v8458_v12 = vld [vmem:[#allocation2 + $0x38] ss:$0 sps:$4 sm:$0x11]   ;;  %v8459_v19 = vld [vmem:[#allocation2 + $0x3c] sm:$0xfe]   ;;  %v1406_v43 = vor.u32 %v1405_v56, %v1401_v52  ;;  %v8219_v56 = vpack.c.bf16 %v476_v35, %v476_v35 }
  0x54   : > { %v3187_v27 = vsel %vm10695_vm10, %v3182_v63, %v3186_v9  ;;  %v1408_v18 = vshll.u32 %v8458_v12, 16  ;;  %v1413_v20 = vshrl.u32 %v8461_v5, 16  ;;  %v8460_v23 = vld [vmem:[#allocation2 + $0x44] ss:$0 sps:$4 sm:$0x11]   ;;  %v1415_v24 = vshll.u32 %v8461_v5, 16 }
  0x55   : > { %v3198_v16 = vrot.slane %v3196_v4, 1  ;;  %v3194_v25 = vor.u32 %v3193_v14, %v3189_v10  ;;  %v3594_v29 = vrot.slane %v8459_v19, 1  ;;  %v3595_v15 = vrot.slane %v8460_v23, 1  ;;  %v8462_v32 = vld [vmem:[#allocation2 + $0x44] ss:$0 sps:$4 sm:$0x11]  }
  0x56   : > { %2915 = vrot.lane.b32.xlu0 %v8449_v26, %s8902_s26  ;;  %v3593_v26 = vsel %vm1785_vm9, %v3591_v44, %v3592_v11  ;;  %v1410_v28 = vrot.slane %v1408_v18, 1  ;;  %v1417_v33 = vrot.slane %v1415_v24, 1  ;;  %v694_v34 = vrot.slane %v9142_v41, 4  ;;  %v8464_v38 = vld [vmem:[#allocation2 + $0x38] ss:$0 sps:$4 sm:$0x11]  }
  0x57   : > { %2739 = vrot.lane.b32.xlu1 %v2696_v8, %s8904_s28  ;;  %v8469_v39 = vld [vmem:[#allocation2 + $0x3c] sm:$0xff]   ;;  %v259_v40 = vld [vmem:[#allocation2 + $0x54] sm:$0x1]  ;;  %v1420_v45 = vshll.u32 %v8462_v32, 16  ;;  %v684_v44 = vor.u32 %v682_v30, %v9130_v22  ;;  %v313_v37 = vsel %vm8973_vm5, 0, %v312_v21  ;;  %v3199_v41 = vsel %vm10695_vm10, %v3194_v25, %v3198_v16 }
  0x58   : > { %v3596_v46 = vsel %vm1785_vm9, %v3594_v29, %v3595_v15  ;;  %v1799_v47 = vrot.slane %v8464_v38, 1  ;;  %v8465_v48 = vld [vmem:[#allocation2 + $0x3c] sm:$0xfe]   ;;  %v2301_v49 = vshrl.u32 %v8469_v39, 16  ;;  %314 = vst [vmem:[#allocation2 + $0x50] sm:$0x1] %v313_v37  ;;  %v1411_v53 = vsel %vm10695_vm10, %v1406_v43, %v1410_v28 }
  0x59   : > { %v1422_v50 = vrot.slane %v1420_v45, 1  ;;  %v8466_v51 = vld [vmem:[#allocation2 + $0x44] ss:$0 sps:$4 sm:$0x11]   ;;  %v1801_v54 = vrot.slane %v8465_v48, 1  ;;  %v2303_v55 = vshll.u32 %v8469_v39, 16  ;;  %v1418_v58 = vor.u32 %v1417_v33, %v1413_v20 }
  0x5a   : > { %3348 = vrot.lane.b32.xlu0 %v3187_v27, %s8907_s6  ;;  %v951_v52 = vld [vmem:[#allocation2 + $0x48] sm:$0xf]  ;;  %v1802_v22 = vrot.slane %v8466_v51, 1  ;;  %v260_v57 = vsel %vm8948_vm3, 0, %v259_v40  ;;  %v1800_v59 = vsel %vm1785_vm9, %v1798_v7, %v1799_v47  ;;  %v696_v61 = vshrl.u32 %v8218_v42, 16  ;;  %v477_v62 = vld [vmem:[%s8982_s23 + $0x70] sm:$0xff] }
  0x5b   : > { %2917 = vrot.lane.b32.xlu1 %v8450_v13, %s8902_s26  ;;  %v952_v30 = vsel %vm9007_vm8, %v684_v44, %v951_v52  ;;  %v2305_v60 = vrot.slane %v2303_v55, 1  ;;  %261 = vst [vmem:[#allocation2 + $0x54] sm:$0x1] %v260_v57  ;;  %v8467_v63 = vld [vmem:[#allocation2 + $0x3c] sm:$0xff]   ;;  %v699_v2 = vshll.u32 %v8218_v42, 16  ;;  %v1423_v10 = vsel %vm10695_vm10, %v1418_v58, %v1422_v50 }
  0x5c   : > { %953 = vst [vmem:[#allocation2 + $0x48] sm:$0xf] %v952_v30  ;;  %v8470_v1 = vld [vmem:[#allocation2 + $0x44] ss:$0 sps:$4 sm:$0x11]   ;;  %v698_v9 = vrot.slane %v696_v61, 7  ;;  %v9187_v16 = vpack.c.bf16 %v477_v62, %v477_v62  ;;  %v1803_v20 = vsel %vm1785_vm9, %v1801_v54, %v1802_v22 }
  0x5d   : > { %v315_v3 = vld [vmem:[#allocation2 + $0x5c] sm:$0x1]  ;;  %v2308_v4 = vshll.u32 %v8470_v1, 16  ;;  %v8473_v8 = vld [vmem:[#allocation2 + $0x3c] sm:$0xfe]   ;;  %v2306_v7 = vor.u32 %v2305_v60, %v2301_v49  ;;  %v704_v13 = vshrl.u32 %v8219_v56, 16 }
  0x5e   : > { %3637 = vrot.lane.b32.xlu0 %v3593_v26, %s8905_s29  ;;  %v8474_v12 = vld [vmem:[#allocation2 + $0x44] ss:$0 sps:$4 sm:$0x11]   ;;  %v702_v17 = vrot.slane %v698_v9, 4  ;;  %v707_v18 = vshll.u32 %v8219_v56, 16  ;;  %v316_v19 = vsel %vm8973_vm5, 0, %v315_v3  ;;  %v701_v21 = vor.u32 %v699_v2, %v698_v9 }
  0x5f   : > { %3350 = vrot.lane.b32.xlu1 %v3199_v41, %s8907_s6  ;;  %v955_v5 = vld [vmem:[#allocation2 + $0x50] sm:$0x1]  ;;  %v2310_v14 = vrot.slane %v2308_v4, 1  ;;  %v706_v27 = vrot.slane %v704_v13, 7  ;;  %317 = vst [vmem:[#allocation2 + $0x5c] sm:$0x1] %v316_v19 }
  0x60   : > { %v956_v11 = vsel %vm8948_vm3, %v694_v34, %v955_v5  ;;  %v2697_v25 = vrot.slane %v8473_v8, 1  ;;  %v2698_v26 = vrot.slane %v8474_v12, 1  ;;  %v713_v38 = vshrl.u32 %v9187_v16, 16 }
  0x61   : > { %957 = vst [vmem:[#allocation2 + $0x50] sm:$0x1] %v956_v11  ;;  %v2311_v23 = vsel %vm10695_vm10, %v2306_v7, %v2310_v14  ;;  %v709_v28 = vor.u32 %v707_v18, %v706_v27  ;;  %v711_v39 = vrot.slane %v706_v27, 4 }
  0x62   : > { %3639 = vrot.lane.b32.xlu0 %v3596_v46, %s8905_s29  ;;  %v958_v15 = vld [vmem:[#allocation2 + $0x54] sm:$0xf]  ;;  %v2699_v44 = vsel %vm1785_vm9, %v2697_v25, %v2698_v26  ;;  %v9209_v61 = vrot.slane %v713_v38, 7 }
  0x63   : > { %1552 = vrot.lane.b32.xlu1 %v1411_v53, %s8903_s27  ;;  %v8471_v24 = vld [vmem:[#allocation2 + $0x48] sm:$0xff]   ;;  %v710_v35 = vsel %vm8999_vm7, %v702_v17, %v709_v28  ;;  %v959_v40 = vsel %vm9007_vm8, %v701_v21, %v958_v15 }
  0x64   : > { %v8475_v29 = vld [vmem:[#allocation2 + $0x48] sm:$0xfe]   ;;  %v2313_v33 = vshrl.u32 %v8471_v24, 16  ;;  %v2315_v34 = vshll.u32 %v8471_v24, 16  ;;  %961 = vst.msk [vmem:[#allocation2 + $0x58] sm:$0xf] %vm226_vm0, %v710_v35 }
  0x65   : > { %v8468_v32 = vld [vmem:[#allocation2 + $0x48] sm:$0xff]   ;;  %960 = vst [vmem:[#allocation2 + $0x54] sm:$0xf] %v959_v40  ;;  %v2700_v41 = vrot.slane %v8475_v29, 1  ;;  %v478_v29 = vld [vmem:[%s8982_s23 + $0x78] sm:$0xff] }
  0x66   : > { %1842 = vrot.lane.b32.xlu0 %v1800_v59, %s8900_s24  ;;  %v8479_v42 = vld [vmem:[#allocation2 + $0x48] sm:$0xff]   ;;  %v2317_v45 = vrot.slane %v2315_v34, 1  ;;  %v962_v52 = vld [vmem:[#allocation2 + $0x5c] sm:$0x1] }
  0x67   : > { %1554 = vrot.lane.b32.xlu1 %v1423_v10, %s8903_s27  ;;  %v8477_v46 = vld [vmem:[#allocation2 + $0x48] sm:$0xff]   ;;  %v3201_v51 = vshrl.u32 %v8479_v42, 16  ;;  %v3203_v54 = vshll.u32 %v8479_v42, 16  ;;  %v963_v22 = vsel %vm8948_vm3, %v711_v39, %v962_v52  ;;  %v719_v52 = vrot.slane %v9209_v61, 4 }
  0x68   : > { %v8472_v43 = vld [vmem:[#allocation2 + $0x50] ss:$0 sps:$4 sm:$0x11]   ;;  %v8483_v47 = vld [vmem:[#allocation2 + $0x48] sm:$0xfe]   ;;  %v2318_v48 = vor.u32 %v2317_v45, %v2313_v33 }
  0x69   : > { %v8476_v37 = vld [vmem:[#allocation2 + $0x50] ss:$0 sps:$4 sm:$0x11]   ;;  %v2320_v49 = vshll.u32 %v8472_v43, 16  ;;  %v3205_v57 = vrot.slane %v3203_v54, 1  ;;  %v8485_v58 = vld [vmem:[#allocation2 + $0x48] sm:$0xff]  }
  0x6a   : > { %2019 = vrot.lane.b32.xlu0 %v8467_v63, %s8901_s25  ;;  %v8480_v50 = vld [vmem:[#allocation2 + $0x50] ss:$0 sps:$4 sm:$0x11]   ;;  %v2701_v56 = vrot.slane %v8476_v37, 1  ;;  %964 = vst [vmem:[#allocation2 + $0x5c] sm:$0x1] %v963_v22 }
  0x6b   : > { %1844 = vrot.lane.b32.xlu1 %v1803_v20, %s8900_s24  ;;  %v2322_v55 = vrot.slane %v2320_v49, 1  ;;  %v3208_v53 = vshll.u32 %v8480_v50, 16  ;;  %v8484_v30 = vld [vmem:[#allocation2 + $0x50] ss:$0 sps:$4 sm:$0x11]   ;;  %v3206_v62 = vor.u32 %v3205_v57, %v3201_v51  ;;  %v3597_v63 = vrot.slane %v8483_v47, 1 }
  0x6c   : > { %v3598_v1 = vrot.slane %v8484_v30, 1  ;;  %v2702_v2 = vsel %vm1785_vm9, %v2700_v41, %v2701_v56  ;;  %v8481_v3 = vld [vmem:[#allocation2 + $0x54] sm:$0xff]   ;;  %v8486_v4 = vld [vmem:[#allocation2 + $0x50] ss:$0 sps:$4 sm:$0x11]   ;;  %v1427_v9 = vshll.u32 %v8485_v58, 16 }
  0x6d   : > { %v2323_v59 = vsel %vm10695_vm10, %v2318_v48, %v2322_v55  ;;  %v3210_v60 = vrot.slane %v3208_v53, 1  ;;  %v8478_v5 = vld [vmem:[#allocation2 + $0x54] sm:$0xff]   ;;  %v3213_v7 = vshrl.u32 %v8481_v3, 16  ;;  %v3215_v11 = vshll.u32 %v8481_v3, 16  ;;  %v8491_v40 = vld [vmem:[#allocation2 + $0x48] sm:$0xfe]  }
  0x6e   : > { %2452 = vrot.lane.b32.xlu0 %v2311_v23, %s8906_s30  ;;  %v8489_v10 = vld [vmem:[#allocation2 + $0x54] sm:$0xff]   ;;  %v1425_v12 = vshrl.u32 %v8485_v58, 16  ;;  %v1432_v13 = vshll.u32 %v8486_v4, 16  ;;  %v1429_v17 = vrot.slane %v1427_v9, 1  ;;  %v3599_v20 = vsel %vm1785_vm9, %v3597_v63, %v3598_v1  ;;  %v479_v37 = vld [vmem:[%s8982_s23 + $0x80] sm:$0xff]  ;;  %v480_v30 = vld [vmem:[%s8982_s23 + $0x88] sm:$0xff] }
  0x6f   : > { %2021 = vrot.lane.b32.xlu1 %v8468_v32, %s8901_s25  ;;  %v3211_v8 = vsel %vm10695_vm10, %v3206_v62, %v3210_v60  ;;  %v8487_v14 = vld [vmem:[#allocation2 + $0x54] sm:$0xfe]   ;;  %v1437_v27 = vshrl.u32 %v8489_v10, 16  ;;  %v3217_v19 = vrot.slane %v3215_v11, 1  ;;  %v1439_v28 = vshll.u32 %v8489_v10, 16 }
  0x70   : > { %v1434_v21 = vrot.slane %v1432_v13, 1  ;;  %v3600_v26 = vrot.slane %v8487_v14, 1  ;;  %v1430_v34 = vor.u32 %v1429_v17, %v1425_v12  ;;  %v8492_v42 = vld [vmem:[#allocation2 + $0x50] ss:$0 sps:$4 sm:$0x11]   ;;  %v8497_v43 = vld [vmem:[#allocation2 + $0x54] sm:$0xff]   ;;  %v8222_v63 = vpack.c.bf16 %v479_v37, %v479_v37 }
  0x71   : > { %v8482_v18 = vld [vmem:[#allocation2 + $0x5c] ss:$0 sps:$4 sm:$0x11]   ;;  %v3218_v24 = vor.u32 %v3217_v19, %v3213_v7  ;;  %v1441_v35 = vrot.slane %v1439_v28, 1  ;;  %v1805_v47 = vrot.slane %v8492_v42, 1  ;;  %v716_v49 = vshll.u32 %v9187_v16, 16 }
  0x72   : > { %2741 = vrot.lane.b32.xlu0 %v2699_v44, %s8904_s28  ;;  %v8488_v23 = vld [vmem:[#allocation2 + $0x5c] ss:$0 sps:$4 sm:$0x11]   ;;  %v3220_v25 = vshll.u32 %v8482_v18, 16  ;;  %v8221_v44 = vpack.c.bf16 %v478_v29, %v478_v29  ;;  %v8493_v48 = vld [vmem:[#allocation2 + $0x54] sm:$0xfe]   ;;  %v1435_v50 = vsel %vm10695_vm10, %v1430_v34, %v1434_v21  ;;  %v8223_v10 = vpack.c.bf16 %v480_v30, %v480_v30 }
  0x73   : > { %2454 = vrot.lane.b32.xlu1 %v2323_v59, %s8906_s30  ;;  %v3601_v15 = vrot.slane %v8488_v23, 1  ;;  %v8490_v32 = vld [vmem:[#allocation2 + $0x5c] ss:$0 sps:$4 sm:$0x11]   ;;  %v1442_v51 = vor.u32 %v1441_v35, %v1437_v27  ;;  %v1807_v56 = vrot.slane %v8493_v48, 1  ;;  %v8495_v53 = vld [vmem:[#allocation2 + $0x54] sm:$0xff]   ;;  %v718_v27 = vor.u32 %v716_v49, %v9209_v61 }
  0x74   : > { %v3222_v33 = vrot.slane %v3220_v25, 1  ;;  %v1444_v39 = vshll.u32 %v8490_v32, 16  ;;  %v8494_v54 = vld [vmem:[#allocation2 + $0x5c] ss:$0 sps:$4 sm:$0x11]   ;;  %v721_v59 = vshrl.u32 %v8221_v44, 16 }
  0x75   : > { %v3602_v38 = vsel %vm1785_vm9, %v3600_v26, %v3601_v15  ;;  %v262_v22 = vld [vmem:[#allocation2 + $0x60] sm:$0x1]  ;;  %v1808_v57 = vrot.slane %v8494_v54, 1  ;;  %v724_v60 = vshll.u32 %v8221_v44, 16  ;;  %v2325_v16 = vshrl.u32 %v8497_v43, 16  ;;  %v481_v37 = vld [vmem:[%s8982_s23 + $0x90] sm:$0xff] }
  0x76   : > { %2919 = vrot.lane.b32.xlu0 %v8477_v46, %s8902_s26  ;;  %v3223_v45 = vsel %vm10695_vm10, %v3218_v24, %v3222_v33  ;;  %v1446_v41 = vrot.slane %v1444_v39, 1  ;;  %v1804_v46 = vrot.slane %v8491_v40, 1  ;;  %v263_v58 = vsel %vm8948_vm3, 0, %v262_v22  ;;  %v8498_v3 = vld [vmem:[#allocation2 + $0x5c] ss:$0 sps:$4 sm:$0x11]  }
  0x77   : > { %2743 = vrot.lane.b32.xlu1 %v2702_v2, %s8904_s28  ;;  %264 = vst [vmem:[#allocation2 + $0x60] sm:$0x1] %v263_v58  ;;  %v2327_v62 = vshll.u32 %v8497_v43, 16  ;;  %v723_v2 = vrot.slane %v721_v59, 7  ;;  %v318_v4 = vld [vmem:[#allocation2 + $0x68] sm:$0x1]  ;;  %v1809_v17 = vsel %vm1785_vm9, %v1807_v56, %v1808_v57 }
  0x78   : > { %v1806_v55 = vsel %vm1785_vm9, %v1804_v46, %v1805_v47  ;;  %v1447_v1 = vsel %vm10695_vm10, %v1442_v51, %v1446_v41  ;;  %v2332_v12 = vshll.u32 %v8498_v3, 16  ;;  %v8501_v13 = vld [vmem:[#allocation2 + $0x54] sm:$0xfe]   ;;  %v8502_v19 = vld [vmem:[#allocation2 + $0x5c] ss:$0 sps:$4 sm:$0x11]  }
  0x79   : > { %v726_v7 = vor.u32 %v724_v60, %v723_v2  ;;  %v728_v11 = vrot.slane %v723_v2, 4  ;;  %v730_v21 = vshrl.u32 %v8222_v63, 16  ;;  %v2703_v25 = vrot.slane %v8501_v13, 1  ;;  %v321_v28 = vld [vmem:[#allocation2 + $0x74] sm:$0x1]  ;;  %v8511_v29 = vld [vmem:[#allocation2] sm:$0xff]  }
  0x7a   : > { %3352 = vrot.lane.b32.xlu0 %v3211_v8, %s8907_s6  ;;  %v319_v8 = vsel %vm8973_vm5, 0, %v318_v4  ;;  %v2334_v24 = vrot.slane %v2332_v12, 1  ;;  %v2704_v15 = vrot.slane %v8502_v19, 1  ;;  %v733_v32 = vshll.u32 %v8222_v63, 16  ;;  %v268_v44 = vld [vmem:[#allocation2 + $0x78] sm:$0x1] }
  0x7b   : > { %2921 = vrot.lane.b32.xlu1 %v8478_v5, %s8902_s26  ;;  %v2329_v5 = vrot.slane %v2327_v62, 1  ;;  %320 = vst [vmem:[#allocation2 + $0x68] sm:$0x1] %v319_v8  ;;  %v727_v23 = vsel %vm8999_vm7, %v719_v52, %v726_v7  ;;  %v732_v61 = vrot.slane %v730_v21, 7  ;;  %v738_v33 = vshrl.u32 %v8223_v10, 16  ;;  %v482_v41 = vld [vmem:[%s8982_s23 + $0x98] sm:$0xff] }
  0x7c   : > { %968 = vst.msk [vmem:[#allocation2 + $0x64] sm:$0xf] %vm226_vm0, %v727_v23  ;;  %v322_v42 = vsel %vm8973_vm5, 0, %v321_v28  ;;  %v269_v49 = vsel %vm8948_vm3, 0, %v268_v44  ;;  %v8225_v51 = vpack.c.bf16 %v482_v41, %v482_v41  ;;  %v8526_v22 = vld [vmem:[#allocation2 + $0xc] sm:$0xff]   ;;  %v8531_v30 = vld [vmem:[#allocation2 + $0x18] sm:$0xff]  }
  0x7d   : > { %v2330_v18 = vor.u32 %v2329_v5, %v2325_v16  ;;  %323 = vst [vmem:[#allocation2 + $0x74] sm:$0x1] %v322_v42  ;;  %v736_v46 = vrot.slane %v732_v61, 4  ;;  %v740_v47 = vrot.slane %v738_v33, 7  ;;  %1159 = vst.msk [vmem:[#allocation4] sm:$0xff] %vm10696_vm11, %v8511_v29  ;;  %v735_v52 = vor.u32 %v733_v32, %v732_v61 }
  0x7e   : > { %3641 = vrot.lane.b32.xlu0 %v3599_v20, %s8905_s29  ;;  %v265_v20 = vld [vmem:[#allocation2 + $0x6c] sm:$0x1]  ;;  %v965_v34 = vld [vmem:[#allocation2 + $0x60] sm:$0xf]  ;;  %270 = vst [vmem:[#allocation2 + $0x78] sm:$0x1] %v269_v49 }
  0x7f   : > { %3354 = vrot.lane.b32.xlu1 %v3223_v45, %s8907_s6  ;;  %v266_v26 = vsel %vm8948_vm3, 0, %v265_v20  ;;  %v2335_v35 = vsel %vm10695_vm10, %v2330_v18, %v2334_v24  ;;  %v966_v43 = vsel %vm9007_vm8, %v718_v27, %v965_v34  ;;  %v2705_v45 = vsel %vm1785_vm9, %v2703_v25, %v2704_v15  ;;  %1160 = vst.msk [vmem:[#allocation4 + $0x8] sm:$0xff] %vm10696_vm11, %v8526_v22 }
  0x80   : > { %267 = vst [vmem:[#allocation2 + $0x6c] sm:$0x1] %v266_v26  ;;  %967 = vst [vmem:[#allocation2 + $0x60] sm:$0xf] %v966_v43  ;;  %v745_v57 = vrot.slane %v740_v47, 4  ;;  %v755_v59 = vshrl.u32 %v8225_v51, 16 }
  0x81   : > { %v758_v60 = vshll.u32 %v8225_v51, 16  ;;  %1161 = vst.msk [vmem:[#allocation4 + $0x10] sm:$0xff] %vm10696_vm11, %v8531_v30 }
  0x82   : > { %3643 = vrot.lane.b32.xlu0 %v3602_v38, %s8905_s29  ;;  %v741_v38 = vshll.u32 %v8223_v10, 16  ;;  %v969_v48 = vld [vmem:[#allocation2 + $0x68] sm:$0x1]  ;;  %v9296_v7 = vrot.slane %v755_v59, 7 }
  0x83   : > { %1556 = vrot.lane.b32.xlu1 %v1435_v50, %s8903_s27  ;;  %v9268_v50 = vpack.c.bf16 %v481_v37, %v481_v37  ;;  %v970_v54 = vsel %vm8948_vm3, %v728_v11, %v969_v48 }
  0x84   : > { %971 = vst [vmem:[#allocation2 + $0x68] sm:$0x1] %v970_v54  ;;  %v760_v27 = vor.u32 %v758_v60, %v9296_v7 }
  0x85   : > { %v747_v58 = vshrl.u32 %v9268_v50, 16 }
  0x86   : > { %1846 = vrot.lane.b32.xlu0 %v1806_v55, %s8900_s24  ;;  %v743_v55 = vor.u32 %v741_v38, %v740_v47 }
  0x87   : > { %1558 = vrot.lane.b32.xlu1 %v1447_v1, %s8903_s27  ;;  %v972_v62 = vld [vmem:[#allocation2 + $0x6c] sm:$0xf]  ;;  %v976_v1 = vld [vmem:[#allocation2 + $0x74] sm:$0x1]  ;;  %v8496_v4 = vld [vmem:[#allocation2 + $0x60] sm:$0xff]   ;;  %v9294_v8 = vrot.slane %v747_v58, 7 }
  0x88   : > { %v744_v16 = vsel %vm8999_vm7, %v736_v46, %v743_v55  ;;  %v973_v63 = vsel %vm9007_vm8, %v735_v52, %v972_v62  ;;  %v977_v5 = vsel %vm8948_vm3, %v745_v57, %v976_v1  ;;  %v8503_v10 = vld [vmem:[#allocation2 + $0x60] sm:$0xfe]   ;;  %v750_v55 = vshll.u32 %v9268_v50, 16 }
  0x89   : > { %975 = vst.msk [vmem:[#allocation2 + $0x70] sm:$0xf] %vm226_vm0, %v744_v16  ;;  %974 = vst [vmem:[#allocation2 + $0x6c] sm:$0xf] %v973_v63  ;;  %v8505_v11 = vld [vmem:[#allocation2 + $0x60] sm:$0xff]   ;;  %v753_v12 = vrot.slane %v9294_v8, 4 }
  0x8a   : > { %2023 = vrot.lane.b32.xlu0 %v8495_v53, %s8901_s25  ;;  %978 = vst [vmem:[#allocation2 + $0x74] sm:$0x1] %v977_v5  ;;  %v2706_v25 = vrot.slane %v8503_v10, 1  ;;  %v8507_v26 = vld [vmem:[#allocation2 + $0x60] sm:$0xff]  }
  0x8b   : > { %1848 = vrot.lane.b32.xlu1 %v1809_v17, %s8900_s24  ;;  %v8500_v13 = vld [vmem:[#allocation2 + $0x68] ss:$0 sps:$4 sm:$0x11]   ;;  %v761_v23 = vsel %vm8999_vm7, %v753_v12, %v760_v27  ;;  %v3225_v32 = vshrl.u32 %v8507_v26, 16  ;;  %v3227_v33 = vshll.u32 %v8507_v26, 16  ;;  %v8514_v43 = vld [vmem:[#allocation2 + $0x60] sm:$0xff]  }
  0x8c   : > { %v8504_v19 = vld [vmem:[#allocation2 + $0x68] ss:$0 sps:$4 sm:$0x11]   ;;  %v2344_v20 = vshll.u32 %v8500_v13, 16  ;;  %982 = vst.msk [vmem:[#allocation2 + $0x7c] sm:$0xf] %vm226_vm0, %v761_v23 }
  0x8d   : > { %v8508_v28 = vld [vmem:[#allocation2 + $0x68] ss:$0 sps:$4 sm:$0x11]   ;;  %v2707_v15 = vrot.slane %v8504_v19, 1  ;;  %v3229_v44 = vrot.slane %v3227_v33, 1  ;;  %v1449_v57 = vshrl.u32 %v8514_v43, 16 }
  0x8e   : > { %2456 = vrot.lane.b32.xlu0 %v2335_v35, %s8906_s30  ;;  %v2346_v29 = vrot.slane %v2344_v20, 1  ;;  %v3232_v35 = vshll.u32 %v8508_v28, 16  ;;  %v8512_v48 = vld [vmem:[#allocation2 + $0x60] sm:$0xfe]   ;;  %v1451_v58 = vshll.u32 %v8514_v43, 16 }
  0x8f   : > { %2025 = vrot.lane.b32.xlu1 %v8496_v4, %s8901_s25  ;;  %v2708_v51 = vsel %vm1785_vm9, %v2706_v25, %v2707_v15  ;;  %v3230_v54 = vor.u32 %v3229_v44, %v3225_v32  ;;  %v8513_v52 = vld [vmem:[#allocation2 + $0x68] ss:$0 sps:$4 sm:$0x11]   ;;  %v3603_v30 = vrot.slane %v8512_v48, 1  ;;  %v762_v15 = vrot.slane %v9296_v7, 4 }
  0x90   : > { %v8509_v38 = vld [vmem:[#allocation2 + $0x6c] sm:$0xff]   ;;  %v3234_v37 = vrot.slane %v3232_v35, 1  ;;  %v3604_v16 = vrot.slane %v8513_v52, 1  ;;  %v8515_v62 = vld [vmem:[#allocation2 + $0x68] ss:$0 sps:$4 sm:$0x11]   ;;  %v752_v35 = vor.u32 %v750_v55, %v9294_v8 }
  0x91   : > { %v8510_v42 = vld [vmem:[#allocation2 + $0x74] ss:$0 sps:$4 sm:$0x11]   ;;  %v3237_v41 = vshrl.u32 %v8509_v38, 16  ;;  %v3239_v46 = vshll.u32 %v8509_v38, 16  ;;  %v8518_v59 = vld [vmem:[#allocation2 + $0x6c] sm:$0xff]  }
  0x92   : > { %v9238_v9 = vpop.permute.xlu1 %1834  ;;  %2745 = vrot.lane.b32.xlu0 %v2705_v45, %s8904_s28  ;;  %v3244_v47 = vshll.u32 %v8510_v42, 16  ;;  %v3235_v60 = vsel %vm10695_vm10, %v3230_v54, %v3234_v37  ;;  %v1453_v5 = vrot.slane %v1451_v58, 1  ;;  %v1456_v10 = vshll.u32 %v8515_v62, 16  ;;  %v8517_v12 = vld [vmem:[#allocation2 + $0x74] ss:$0 sps:$4 sm:$0x11]  }
  0x93   : > { %v3241_v22 = vrot.slane %v3239_v46, 1  ;;  %v8519_v27 = vld [vmem:[#allocation2 + $0x74] ss:$0 sps:$4 sm:$0x11]   ;;  %v1463_v23 = vshll.u32 %v8518_v59, 16  ;;  %v8524_v54 = vld [vmem:[#allocation2 + $0x6c] sm:$0xff]  }
  0x94   : > { %v9240_v14 = vpop.permute.xlu0 %2011  ;;  %v3246_v4 = vrot.slane %v3244_v47, 1  ;;  %v1458_v20 = vrot.slane %v1456_v10, 1  ;;  %v1468_v28 = vshll.u32 %v8519_v27, 16  ;;  %v8522_v38 = vld [vmem:[#allocation2 + $0x6c] sm:$0xfe]  }
  0x95   : > { %v3242_v1 = vor.u32 %v3241_v22, %v3237_v41  ;;  %v8523_v42 = vld [vmem:[#allocation2 + $0x74] ss:$0 sps:$4 sm:$0x11]   ;;  %v324_v43 = vld [vmem:[#allocation2 + $0x80] sm:$0x1]  ;;  %v1813_v48 = vrot.slane %v8522_v38, 1 }
  0x96   : > { %2923 = vrot.lane.b32.xlu0 %v8505_v11, %s8902_s26  ;;  %v8516_v11 = vld [vmem:[#allocation2 + $0x6c] sm:$0xfe]   ;;  %v1470_v32 = vrot.slane %v1468_v28, 1  ;;  %v979_v41 = vld [vmem:[#allocation2 + $0x78] sm:$0xf]  ;;  %v325_v58 = vsel %vm8973_vm5, 0, %v324_v43 }
  0x97   : > { %v3606_v13 = vrot.slane %v8516_v11, 1  ;;  %v3247_v19 = vsel %vm10695_vm10, %v3242_v1, %v3246_v4  ;;  %v980_v8 = vsel %vm9007_vm8, %v752_v35, %v979_v41  ;;  %v8527_v52 = vld [vmem:[#allocation2 + $0x6c] sm:$0xff]   ;;  %v8528_v55 = vld [vmem:[#allocation2 + $0x74] ss:$0 sps:$4 sm:$0x11]  }
  0x98   : > { %v9252_v39 = vpop.permute.xlu0 %2911  ;;  %v9254_v40 = vpop.permute.xlu1 %2013  ;;  %981 = vst [vmem:[#allocation2 + $0x78] sm:$0xf] %v980_v8  ;;  %326 = vst [vmem:[#allocation2 + $0x80] sm:$0x1] %v325_v58  ;;  %v8532_v62 = vld [vmem:[#allocation2 + $0x6c] sm:$0xfe]  }
  0x9a   : > { %3356 = vrot.lane.b32.xlu0 %v3235_v60, %s8907_s6 }
  0x9c   : > { %v1545_v56 = vpop.permute.xlu0 %1544  ;;  %v9272_v53 = vpop.permute.xlu1 %2913 }
  0x9d   : > { %1593 = vst.msk [vmem:[#allocation4] sm:$0xff] %vm10692_vm12, %v1545_v56  ;;  %v8506_v56 = vld [vmem:[#allocation2 + $0x6c] sm:$0xff]  }
  0x9e   : > { %1883 = vst.msk [vmem:[#allocation4] sm:$0xff] %vm10691_vm13, %v9238_v9  ;;  %v8499_v9 = vld [vmem:[#allocation2 + $0x60] sm:$0xff]  }
  0x9f   : > { %2060 = vst.msk [vmem:[#allocation4] sm:$0xff] %vm2059_vm14, %v9240_v14  ;;  %v2337_v14 = vshrl.u32 %v8499_v9, 16  ;;  %v2339_v18 = vshll.u32 %v8499_v9, 16  ;;  %v3605_v9 = vsel %vm1785_vm9, %v3603_v30, %v3604_v16  ;;  %v2349_v30 = vshrl.u32 %v8527_v52, 16  ;;  %v8529_v10 = vld [vmem:[#allocation2 + $0x78] sm:$0xff]  }
  0xa0   : > { %v9288_v2 = vpop.permute.xlu0 %2733  ;;  %v9290_v3 = vpop.permute.xlu1 %1836  ;;  %3645 = vrot.lane.b32.xlu0 %v3605_v9, %s8905_s29  ;;  %v8525_v9 = vld [vmem:[#allocation2 + $0x78] sm:$0xff]  }
  0xa1   : > { %v2341_v24 = vrot.slane %v2339_v18, 1  ;;  %v1461_v18 = vshrl.u32 %v8518_v59, 16  ;;  %v9384_v27 = vld [vmem:[#allocation2 + $0x78] sm:$0xfe]  }
  0xa3   : > { %v2342_v61 = vor.u32 %v2341_v24, %v2337_v14  ;;  %v3607_v14 = vrot.slane %v8517_v12, 1  ;;  %v983_v12 = vld [vmem:[#allocation2 + $0x80] sm:$0x1] }
  0xa4   : > { %v9300_v17 = vpop.permute.xlu1 %2735  ;;  %v9304_v21 = vpop.permute.xlu0 %3633 }
  0xa5   : > { %v2347_v45 = vsel %vm10695_vm10, %v2342_v61, %v2346_v29  ;;  %v3608_v26 = vsel %vm1785_vm9, %v3606_v13, %v3607_v14  ;;  %v8520_v29 = vld [vmem:[#allocation2 + $0x60] sm:$0xfe]   ;;  %v8521_v61 = vld [vmem:[#allocation2 + $0x68] ss:$0 sps:$4 sm:$0x11]   ;;  %v984_v14 = vsel %vm8948_vm3, %v762_v15, %v983_v12 }
  0xa6   : > { %2458 = vrot.lane.b32.xlu1 %v2347_v45, %s8906_s30  ;;  %v1810_v33 = vrot.slane %v8520_v29, 1  ;;  %3647 = vrot.lane.b32.xlu0 %v3608_v26, %s8905_s29  ;;  %985 = vst [vmem:[#allocation2 + $0x80] sm:$0x1] %v984_v14  ;;  %v8541_v26 = vld [vmem:[#allocation2 + $0x78] sm:$0xff]   ;;  %v327_v15 = vld [vmem:[#allocation2 + $0x8c] sm:$0x1] }
  0xa7   : > { %v3251_v38 = vshll.u32 %v8541_v26, 16 }
  0xa8   : > { %v2447_v34 = vpop.permute.xlu1 %2446  ;;  %v9311_v49 = vpop.permute.xlu0 %3635 }
  0xaa   : > { %2747 = vrot.lane.b32.xlu1 %v2708_v51, %s8904_s28  ;;  %v1814_v51 = vrot.slane %v8523_v42, 1  ;;  %v328_v42 = vsel %vm8973_vm5, 0, %v327_v15  ;;  %v8564_v15 = vld [vmem:[#allocation2 + $0x30] sm:$0xff]  }
  0xab   : > { %329 = vst [vmem:[#allocation2 + $0x8c] sm:$0x1] %v328_v42  ;;  %1163 = vst.msk [vmem:[#allocation4 + $0x20] sm:$0xff] %vm10696_vm11, %v8564_v15  ;;  %v486_v42 = vld [vmem:[%s8982_s23 + $0xb8] sm:$0xff] }
  0xac   : > { %v9316_v63 = vpop.permute.xlu1 %3346  ;;  %v1547_v50 = vpop.permute.xlu0 %1546  ;;  %v1815_v1 = vsel %vm1785_vm9, %v1813_v48, %v1814_v51  ;;  %v3253_v48 = vrot.slane %v3251_v38, 1 }
  0xad   : > { %1594 = vst.msk [vmem:[#allocation4 + $0x8] sm:$0xff] %vm10692_vm12, %v1547_v50 }
  0xae   : > { %1884 = vst.msk [vmem:[#allocation4 + $0x8] sm:$0xff] %vm10691_vm13, %v9290_v3  ;;  %2925 = vrot.lane.b32.xlu1 %v8506_v56, %s8902_s26  ;;  %v1454_v3 = vor.u32 %v1453_v5, %v1449_v57  ;;  %v2351_v57 = vshll.u32 %v8527_v52, 16 }
  0xaf   : > { %2061 = vst.msk [vmem:[#allocation4 + $0x8] sm:$0xff] %vm2059_vm14, %v9254_v40  ;;  %v1465_v40 = vrot.slane %v1463_v23, 1  ;;  %v483_v23 = vld [vmem:[%s8982_s23 + $0xa0] sm:$0xff] }
  0xb0   : > { %2494 = vst.msk [vmem:[#allocation4 + $0x8] sm:$0xff] %vm2492_vm15, %v2447_v34  ;;  %v2445_v24 = vpop.permute.xlu0 %2444  ;;  %v1549_v25 = vpop.permute.xlu1 %1548  ;;  %v1811_v34 = vrot.slane %v8521_v61, 1  ;;  %v1459_v44 = vsel %vm10695_vm10, %v1454_v3, %v1458_v20  ;;  %v2353_v59 = vrot.slane %v2351_v57, 1  ;;  %v271_v20 = vld [vmem:[#allocation2 + $0x84] sm:$0x1]  ;;  %v8226_v3 = vpack.c.bf16 %v483_v23, %v483_v23 }
  0xb1   : > { %2493 = vst.msk [vmem:[#allocation4] sm:$0xff] %vm2492_vm15, %v2445_v24  ;;  %v1466_v37 = vor.u32 %v1465_v40, %v1461_v18  ;;  %v8538_v18 = vld [vmem:[#allocation2 + $0x78] sm:$0xff]   ;;  %v2363_v24 = vshll.u32 %v8529_v10, 16  ;;  %v272_v7 = vsel %vm8948_vm3, 0, %v271_v20  ;;  %v2361_v40 = vshrl.u32 %v8529_v10, 16 }
  0xb2   : > { %1595 = vst.msk [vmem:[#allocation4 + $0x10] sm:$0xff] %vm10692_vm12, %v1549_v25  ;;  %3358 = vrot.lane.b32.xlu1 %v3247_v19, %s8907_s6  ;;  %v1812_v47 = vsel %vm1785_vm9, %v1810_v33, %v1811_v34  ;;  %v2354_v4 = vor.u32 %v2353_v59, %v2349_v30  ;;  %v484_v25 = vld [vmem:[%s8982_s23 + $0xa8] sm:$0xff]  ;;  %273 = vst [vmem:[#allocation2 + $0x84] sm:$0x1] %v272_v7  ;;  %v764_v61 = vshrl.u32 %v8226_v3, 16  ;;  %v9405_v30 = vld [vmem:[#allocation2 + $0x78] sm:$0xff]  }
  0xb3   : > { %1850 = vrot.lane.b32.xlu0 %v1812_v47, %s8900_s24  ;;  %2783 = vst.msk [vmem:[#allocation4 + $0x8] sm:$0xff] %vm2781_vm1, %v9300_v17  ;;  %2782 = vst.msk [vmem:[#allocation4] sm:$0xff] %vm2781_vm1, %v9288_v2  ;;  %v1471_v22 = vsel %vm10695_vm10, %v1466_v37, %v1470_v32  ;;  %v8534_v17 = vld [vmem:[%s10686_s1] sm:$0xff]   ;;  %v2356_v2 = vshll.u32 %v8528_v55, 16  ;;  %v8227_v29 = vpack.c.bf16 %v484_v25, %v484_v25  ;;  %v767_v32 = vshll.u32 %v8226_v3, 16 }
  0xb4   : > { %v3345_v45 = vpop.permute.xlu0 %3344  ;;  %v1551_v46 = vpop.permute.xlu1 %1550  ;;  %2961 = vst.msk [vmem:[#allocation4 + $0x8] sm:$0xff] %vm2959_vm2, %v9272_v53  ;;  %2960 = vst.msk [vmem:[#allocation4] sm:$0xff] %vm2959_vm2, %v9252_v39  ;;  %v8537_v53 = vld [vmem:[#allocation2 + $0x24] sm:$0xff]   ;;  %8308 = vmatprep.subr.bf16.mxu0 %v8534_v17  ;;  %v8543_v33 = vld [vmem:[%s10686_s1 + $0x10] ss:$0 sps:$4 sm:$0x33]  }
  0xb5   : > { %3394 = vst.msk [vmem:[#allocation4 + $0x8] sm:$0xff] %vm3392_vm4, %v9316_v63  ;;  %3393 = vst.msk [vmem:[#allocation4] sm:$0xff] %vm3392_vm4, %v3345_v45  ;;  %v8539_v39 = vld [vmem:[%s10686_s1 + $0x8] sm:$0xff]   ;;  %v2358_v16 = vrot.slane %v2356_v2, 1  ;;  %8309 = vmatpush3.bf16.msra.mxu0 %v8534_v17  ;;  %v772_v35 = vshrl.u32 %v8227_v29, 16  ;;  %v775_v34 = vshll.u32 %v8227_v29, 16 }
  0xb6   : > { %1560 = vrot.lane.b32.xlu1 %v1459_v44, %s8903_s27  ;;  %3683 = vst.msk [vmem:[#allocation4 + $0x8] sm:$0xff] %vm10694_vm6, %v9311_v49  ;;  %3682 = vst.msk [vmem:[#allocation4] sm:$0xff] %vm10694_vm6, %v9304_v21  ;;  %v8533_v63 = vld [vmem:[#allocation2 + $0x74] ss:$0 sps:$4 sm:$0x11]   ;;  %v2709_v21 = vrot.slane %v8532_v62, 1  ;;  %8310 = vmatprep.subr.bf16.mxu0 %v8539_v39 }
  0xb7   : > { %2027 = vrot.lane.b32.xlu0 %v8524_v54, %s8901_s25  ;;  %1162 = vst.msk [vmem:[#allocation4 + $0x18] sm:$0xff] %vm10696_vm11, %v8537_v53  ;;  %v2710_v5 = vrot.slane %v8533_v63, 1  ;;  %v2359_v50 = vsel %vm10695_vm10, %v2354_v4, %v2358_v16  ;;  %v2365_v43 = vrot.slane %v2363_v24, 1  ;;  %v2712_v45 = vrot.slane %v9384_v27, 1  ;;  %v8546_v55 = vld [vmem:[#allocation2 + $0x78] sm:$0xfe]  }
  0xb8   : > { %v1839_v56 = vpop.permute.xlu0 %1838  ;;  %v1841_v60 = vpop.permute.xlu1 %1840  ;;  %1596 = vst.msk [vmem:[#allocation4 + $0x18] sm:$0xff] %vm10692_vm12, %v1551_v46  ;;  %vm3740_vm12 = vcmask 293888   ;;  %v766_v44 = vrot.slane %v764_v61, 7  ;;  %v774_v46 = vrot.slane %v772_v35, 7  ;;  %v3249_v47 = vshrl.u32 %v8541_v26, 16  ;;  %v485_v29 = vld [vmem:[%s8982_s23 + $0xb0] sm:$0xff] }
  0xb9   : > { %1885 = vst.msk [vmem:[#allocation4 + $0x10] sm:$0xff] %vm10691_vm13, %v1839_v56  ;;  %1886 = vst.msk [vmem:[#allocation4 + $0x18] sm:$0xff] %vm10691_vm13, %v1841_v60  ;;  %v2711_v13 = vsel %vm1785_vm9, %v2709_v21, %v2710_v5  ;;  %8311 = vmatpush3.bf16.msra.mxu0 %v8539_v39  ;;  %vm10693_vm13 = vcmask 1041408   ;;  %v8530_v54 = vld [vmem:[#allocation2 + $0x80] ss:$0 sps:$4 sm:$0x11]   ;;  %v2366_v57 = vor.u32 %v2365_v43, %v2361_v40  ;;  %v8228_v43 = vpack.c.bf16 %v485_v29, %v485_v29 }
  0xba   : > { %1562 = vrot.lane.b32.xlu1 %v1471_v22, %s8903_s27  ;;  %8384 = vmatprep.subr.msk.bf16.mxu0 %vm10693_vm13, %v8543_v33  ;;  %v3791_v37 = vsel %vm10693_vm13, %v8543_v33, 0  ;;  %v769_v8 = vor.u32 %v767_v32, %v766_v44  ;;  %v770_v52 = vrot.slane %v766_v44, 4  ;;  %v8536_v56 = vld [vmem:[#allocation2 + $0x80] ss:$0 sps:$4 sm:$0x11]   ;;  %v777_v22 = vor.u32 %v775_v34, %v774_v46 }
  0xbb   : > { %2460 = vrot.lane.b32.xlu0 %v2359_v50, %s8906_s30  ;;  %v2368_v58 = vshll.u32 %v8530_v54, 16  ;;  %v779_v17 = vrot.slane %v774_v46, 4  ;;  %v986_v2 = vld [vmem:[#allocation2 + $0x84] sm:$0xf]  ;;  %v2713_v53 = vrot.slane %v8536_v56, 1  ;;  %v3254_v63 = vor.u32 %v3253_v48, %v3249_v47 }
  0xbc   : > { %v2016_v49 = vpop.permute.xlu0 %2015  ;;  %v2018_v19 = vpop.permute.xlu1 %2017  ;;  %v778_v59 = vsel %vm8999_vm7, %v770_v52, %v777_v22  ;;  %v987_v39 = vsel %vm9007_vm8, %v769_v8, %v986_v2  ;;  %v8542_v60 = vld [vmem:[#allocation2 + $0x80] ss:$0 sps:$4 sm:$0x11]   ;;  %v3609_v50 = vrot.slane %v8546_v55, 1  ;;  %v1475_v10 = vshll.u32 %v9405_v30, 16 }
  0xbd   : > { %2062 = vst.msk [vmem:[#allocation4 + $0x10] sm:$0xff] %vm2059_vm14, %v2016_v49  ;;  %2063 = vst.msk [vmem:[#allocation4 + $0x18] sm:$0xff] %vm2059_vm14, %v2018_v19  ;;  %8313 = vmatpush3.bf16.msra.mxu0 %v3791_v37  ;;  %v3698_v51 = vld [vmem:[#allocation4] sm:$0xff]  ;;  %v2370_v16 = vrot.slane %v2368_v58, 1  ;;  %v3256_v49 = vshll.u32 %v8542_v60, 16  ;;  %v2714_v14 = vsel %vm1785_vm9, %v2712_v45, %v2713_v53  ;;  %v1473_v25 = vshrl.u32 %v9405_v30, 16 }
  0xbe   : > { %1852 = vrot.lane.b32.xlu1 %v1815_v1, %s8900_s24  ;;  %8314 = vmatprep.mubr.msk.bf16.mxu0 %vm3740_vm12, %v3698_v51  ;;  %988 = vst [vmem:[#allocation2 + $0x84] sm:$0xf] %v987_v39  ;;  %989 = vst.msk [vmem:[#allocation2 + $0x88] sm:$0xf] %vm226_vm0, %v778_v59  ;;  %v990_v1 = vld [vmem:[#allocation2 + $0x8c] sm:$0x1]  ;;  %v8229_v58 = vpack.c.bf16 %v486_v42, %v486_v42 }
  0xbf   : > { %2749 = vrot.lane.b32.xlu0 %v2711_v13, %s8904_s28  ;;  %v8547_v62 = vld [vmem:[#allocation2 + $0x80] ss:$0 sps:$4 sm:$0x11]   ;;  %v2371_v21 = vsel %vm10695_vm10, %v2366_v57, %v2370_v16  ;;  %v991_v5 = vsel %vm8948_vm3, %v779_v17, %v990_v1  ;;  %v3258_v12 = vrot.slane %v3256_v49, 1  ;;  %v274_v24 = vld [vmem:[#allocation2 + $0x90] sm:$0x1] }
  0xc0   : > { %v2449_v11 = vpop.permute.xlu0 %2448  ;;  %992 = vst [vmem:[#allocation2 + $0x8c] sm:$0x1] %v991_v5  ;;  %v3610_v13 = vrot.slane %v8547_v62, 1  ;;  %v8555_v23 = vld [vmem:[#allocation2 + $0x80] ss:$0 sps:$4 sm:$0x11]  }
  0xc1   : > { %2495 = vst.msk [vmem:[#allocation4 + $0x10] sm:$0xff] %vm2492_vm15, %v2449_v11  ;;  %v3699_v11 = vld [vmem:[#allocation4 + $0x8] sm:$0xff]  ;;  %v3259_v19 = vsel %vm10695_vm10, %v3254_v63, %v3258_v12  ;;  %v1477_v3 = vrot.slane %v1475_v10, 1  ;;  %v1817_v35 = vrot.slane %v8555_v23, 1  ;;  %v781_v55 = vshrl.u32 %v8228_v43, 16  ;;  %v487_v42 = vld [vmem:[%s8982_s23 + $0xc0] sm:$0xff] }
  0xc2   : > { %2029 = vrot.lane.b32.xlu1 %v8525_v9, %s8901_s25  ;;  %v8549_v9 = vld [vmem:[#allocation2 + $0x80] ss:$0 sps:$4 sm:$0x11]   ;;  %8315 = vmatmul.mubr.msk.bf16.vlgmr.msra.gmra.mrb[0].mxu0 %vm3740_vm12, %v3699_v11  ;;  %v3611_v61 = vsel %vm1785_vm9, %v3609_v50, %v3610_v13  ;;  %v330_v39 = vld [vmem:[#allocation2 + $0x98] sm:$0x1]  ;;  %v784_v13 = vshll.u32 %v8228_v43, 16 }
  0xc3   : > { %2927 = vrot.lane.b32.xlu0 %v8538_v18, %s8902_s26  ;;  %v1480_v27 = vshll.u32 %v8549_v9, 16  ;;  %v9420_v18 = vld [vmem:[#allocation2 + $0x78] sm:$0xfe]   ;;  %v1478_v48 = vor.u32 %v1477_v3, %v1473_v25  ;;  %vm10705_vm13 = vcmask 64544  }
  0xc4   : > { %v2738_v28 = vpop.permute.xlu0 %2737  ;;  %v1816_v32 = vrot.slane %v9420_v18, 1  ;;  %v8569_v25 = vld [vmem:[#allocation2 + $0x3c] sm:$0xff]  }
  0xc5   : > { %2784 = vst.msk [vmem:[#allocation4 + $0x10] sm:$0xff] %vm2781_vm1, %v2738_v28  ;;  %v2451_v4 = vpop.permute.xlu1 %2450  ;;  %v1482_v26 = vrot.slane %v1480_v27, 1  ;;  %v275_v28 = vsel %vm8948_vm3, 0, %v274_v24  ;;  %v8540_v40 = vld [vmem:[#allocation2 + $0x84] sm:$0xff]  }
  0xc6   : > { %2496 = vst.msk [vmem:[#allocation4 + $0x18] sm:$0xff] %vm2492_vm15, %v2451_v4  ;;  %2462 = vrot.lane.b32.xlu1 %v2371_v21, %s8906_s30  ;;  %276 = vst [vmem:[#allocation2 + $0x90] sm:$0x1] %v275_v28  ;;  %v8544_v33 = vld [vmem:[#allocation2 + $0x84] sm:$0xff]   ;;  %v1818_v4 = vsel %vm1785_vm9, %v1816_v32, %v1817_v35  ;;  %v783_v21 = vrot.slane %v781_v55, 7 }
  0xc7   : > { %3360 = vrot.lane.b32.xlu0 %v3259_v19, %s8907_s6  ;;  %v8550_v34 = vld [vmem:[#allocation2 + $0x84] sm:$0xfe]   ;;  %v8545_v44 = vld [vmem:[#allocation2 + $0x8c] ss:$0 sps:$4 sm:$0x11]   ;;  %v3261_v37 = vshrl.u32 %v8544_v33, 16  ;;  %v1483_v60 = vsel %vm10695_vm10, %v1478_v48, %v1482_v26 }
  0xc8   : > { %v2916_v41 = vpop.permute.xlu0 %2915  ;;  %v8551_v46 = vld [vmem:[#allocation2 + $0x8c] ss:$0 sps:$4 sm:$0x11]   ;;  %v3268_v47 = vshll.u32 %v8545_v44, 16  ;;  %v3612_v51 = vrot.slane %v8550_v34, 1  ;;  %v8552_v52 = vld [vmem:[#allocation2 + $0x84] sm:$0xff]   ;;  %v786_v24 = vor.u32 %v784_v13, %v783_v21 }
  0xc9   : > { %2962 = vst.msk [vmem:[#allocation4 + $0x10] sm:$0xff] %vm2959_vm2, %v2916_v41  ;;  %v2740_v20 = vpop.permute.xlu1 %2739  ;;  %v3263_v41 = vshll.u32 %v8544_v33, 16  ;;  %v3613_v8 = vrot.slane %v8551_v46, 1  ;;  %v8553_v57 = vld [vmem:[#allocation2 + $0x8c] ss:$0 sps:$4 sm:$0x11]  }
  0xca   : > { %2785 = vst.msk [vmem:[#allocation4 + $0x18] sm:$0xff] %vm2781_vm1, %v2740_v20  ;;  %2751 = vrot.lane.b32.xlu1 %v2714_v14, %s8904_s28  ;;  %v3270_v30 = vrot.slane %v3268_v47, 1  ;;  %v1485_v53 = vshrl.u32 %v8552_v52, 16  ;;  %v1487_v59 = vshll.u32 %v8552_v52, 16  ;;  %v1492_v16 = vshll.u32 %v8553_v57, 16  ;;  %v8558_v12 = vld [vmem:[#allocation2 + $0x84] sm:$0xff]  }
  0xcb   : > { %3649 = vrot.lane.b32.xlu0 %v3611_v61, %s8905_s29  ;;  %v3265_v54 = vrot.slane %v3263_v41, 1  ;;  %v3614_v2 = vsel %vm1785_vm9, %v3612_v51, %v3613_v8  ;;  %v8556_v62 = vld [vmem:[#allocation2 + $0x84] sm:$0xfe]   ;;  %v8557_v63 = vld [vmem:[#allocation2 + $0x8c] ss:$0 sps:$4 sm:$0x11]  }
  0xcc   : > { %v3349_v7 = vpop.permute.xlu0 %3348  ;;  %v1489_v1 = vrot.slane %v1487_v59, 1  ;;  %v1494_v9 = vrot.slane %v1492_v16, 1  ;;  %v1819_v10 = vrot.slane %v8556_v62, 1  ;;  %v1820_v11 = vrot.slane %v8557_v63, 1  ;;  %v8560_v23 = vld [vmem:[#allocation2 + $0x84] sm:$0xff]   ;;  %1164 = vst.msk [vmem:[#allocation4 + $0x28] sm:$0xff] %vm10696_vm11, %v8569_v25 }
  0xcd   : > { %3395 = vst.msk [vmem:[#allocation4 + $0x10] sm:$0xff] %vm3392_vm4, %v3349_v7  ;;  %v2918_v38 = vpop.permute.xlu1 %2917  ;;  %v3266_v17 = vor.u32 %v3265_v54, %v3261_v37  ;;  %v993_v14 = vld [vmem:[#allocation2 + $0x90] sm:$0xf]  ;;  %v787_v18 = vrot.slane %v783_v21, 4  ;;  %v789_v19 = vshrl.u32 %v8229_v58, 16  ;;  %v792_v20 = vshll.u32 %v8229_v58, 16 }
  0xce   : > { %2963 = vst.msk [vmem:[#allocation4 + $0x18] sm:$0xff] %vm2959_vm2, %v2918_v38  ;;  %2929 = vrot.lane.b32.xlu1 %v8540_v40, %s8902_s26  ;;  %v1490_v27 = vor.u32 %v1489_v1, %v1485_v53  ;;  %v331_v7 = vsel %vm8973_vm5, 0, %v330_v39  ;;  %v8561_v26 = vld [vmem:[#allocation2 + $0x8c] ss:$0 sps:$4 sm:$0x11]   ;;  %v2373_v28 = vshrl.u32 %v8560_v23, 16  ;;  %v994_v32 = vsel %vm9007_vm8, %v786_v24, %v993_v14 }
  0xcf   : > { %3651 = vrot.lane.b32.xlu0 %v3614_v2, %s8905_s29  ;;  %v3271_v49 = vsel %vm10695_vm10, %v3266_v17, %v3270_v30  ;;  %v791_v3 = vrot.slane %v789_v19, 7  ;;  %v2375_v29 = vshll.u32 %v8560_v23, 16  ;;  %332 = vst [vmem:[#allocation2 + $0x98] sm:$0x1] %v331_v7  ;;  %995 = vst [vmem:[#allocation2 + $0x90] sm:$0xf] %v994_v32  ;;  %v1821_v51 = vsel %vm1785_vm9, %v1819_v10, %v1820_v11 }
  0xd0   : > { %v3638_v45 = vpop.permute.xlu0 %3637  ;;  %v1495_v61 = vsel %vm10695_vm10, %v1490_v27, %v1494_v9  ;;  %v2380_v38 = vshll.u32 %v8561_v26, 16  ;;  %v8565_v43 = vld [vmem:[#allocation2 + $0x84] sm:$0xfe]   ;;  %v8566_v46 = vld [vmem:[#allocation2 + $0x8c] ss:$0 sps:$4 sm:$0x11]  }
  0xd1   : > { %3684 = vst.msk [vmem:[#allocation4 + $0x10] sm:$0xff] %vm10694_vm6, %v3638_v45  ;;  %v3351_v56 = vpop.permute.xlu1 %3350  ;;  %v794_v33 = vor.u32 %v792_v20, %v791_v3  ;;  %v796_v35 = vrot.slane %v791_v3, 4  ;;  %v2377_v34 = vrot.slane %v2375_v29, 1  ;;  %v8230_v45 = vpack.c.bf16 %v487_v42, %v487_v42  ;;  %v277_v8 = vld [vmem:[#allocation2 + $0x9c] sm:$0x1]  ;;  %v488_v52 = vld [vmem:[%s8982_s23 + $0xc8] sm:$0xff] }
  0xd2   : > { %3396 = vst.msk [vmem:[#allocation4 + $0x18] sm:$0xff] %vm3392_vm4, %v3351_v56  ;;  %3362 = vrot.lane.b32.xlu1 %v3271_v49, %s8907_s6  ;;  %v2382_v41 = vrot.slane %v2380_v38, 1  ;;  %v2715_v54 = vrot.slane %v8565_v43, 1  ;;  %v278_v30 = vsel %vm8948_vm3, 0, %v277_v8  ;;  %v8231_v57 = vpack.c.bf16 %v488_v52, %v488_v52  ;;  %v333_v17 = vld [vmem:[#allocation2 + $0xa4] sm:$0x1] }
  0xd3   : > { %1854 = vrot.lane.b32.xlu0 %v1818_v4, %s8900_s24  ;;  %v795_v44 = vsel %vm8999_vm7, %v787_v18, %v794_v33  ;;  %v2378_v37 = vor.u32 %v2377_v34, %v2373_v28  ;;  %v798_v55 = vshrl.u32 %v8230_v45, 16  ;;  %279 = vst [vmem:[#allocation2 + $0x9c] sm:$0x1] %v278_v30  ;;  %v801_v39 = vshll.u32 %v8230_v45, 16  ;;  %v280_v21 = vld [vmem:[#allocation2 + $0xa8] sm:$0x1] }
  0xd4   : > { %v3640_v22 = vpop.permute.xlu0 %3639  ;;  %996 = vst.msk [vmem:[#allocation2 + $0x94] sm:$0xf] %vm226_vm0, %v795_v44  ;;  %v806_v63 = vshrl.u32 %v8231_v57, 16  ;;  %v809_v49 = vshll.u32 %v8231_v57, 16  ;;  %v281_v18 = vsel %vm8948_vm3, 0, %v280_v21  ;;  %v489_v19 = vld [vmem:[%s8982_s23 + $0xd0] sm:$0xff] }
  0xd5   : > { %3685 = vst.msk [vmem:[#allocation4 + $0x18] sm:$0xff] %vm10694_vm6, %v3640_v22  ;;  %v1553_v5 = vpop.permute.xlu1 %1552  ;;  %vm10706_vm6 = vcmask 97344   ;;  %v2383_v56 = vsel %vm10695_vm10, %v2378_v37, %v2382_v41  ;;  %v2716_v22 = vrot.slane %v8566_v46, 1  ;;  %v800_v59 = vrot.slane %v798_v55, 7  ;;  %282 = vst [vmem:[#allocation2 + $0xa8] sm:$0x1] %v281_v18 }
  0xd6   : > { %1597 = vst.msk [vmem:[#allocation4 + $0x20] sm:$0xff] %vm10705_vm13, %v1553_v5  ;;  %1564 = vrot.lane.b32.xlu1 %v1483_v60, %s8903_s27  ;;  %v997_v53 = vld [vmem:[#allocation2 + $0x98] sm:$0x1]  ;;  %v334_v60 = vsel %vm8973_vm5, 0, %v333_v17  ;;  %v9498_v38 = vpack.c.bf16 %v489_v19, %v489_v19  ;;  %v8594_v46 = vld [vmem:[#allocation2 + $0x48] sm:$0xff]  }
  0xd7   : > { %2031 = vrot.lane.b32.xlu0 %v8558_v12, %s8901_s25  ;;  %v998_v16 = vsel %vm8948_vm3, %v796_v35, %v997_v53  ;;  %v2717_v62 = vsel %vm1785_vm9, %v2715_v54, %v2716_v22  ;;  %335 = vst [vmem:[#allocation2 + $0xa4] sm:$0x1] %v334_v60  ;;  %v804_v5 = vrot.slane %v800_v59, 4  ;;  %v803_v9 = vor.u32 %v801_v39, %v800_v59 }
  0xd8   : > { %v1843_v50 = vpop.permute.xlu0 %1842  ;;  %v3700_v58 = vld [vmem:[#allocation4 + $0x10] sm:$0xff]  ;;  %999 = vst [vmem:[#allocation2 + $0x98] sm:$0x1] %v998_v16  ;;  %1165 = vst.msk [vmem:[#allocation4 + $0x30] sm:$0xff] %vm10696_vm11, %v8594_v46  ;;  %v815_v57 = vshrl.u32 %v9498_v38, 16 }
  0xd9   : > { %1887 = vst.msk [vmem:[#allocation4 + $0x20] sm:$0xff] %vm10706_vm6, %v1843_v50  ;;  %v1555_v15 = vpop.permute.xlu1 %1554  ;;  %8318 = vmatprep.mubr.msk.bf16.mxu0 %vm3740_vm12, %v3700_v58  ;;  %v808_v50 = vrot.slane %v806_v63, 7 }
  0xda   : > { %1598 = vst.msk [vmem:[#allocation4 + $0x28] sm:$0xff] %vm10705_vm13, %v1555_v15  ;;  %1566 = vrot.lane.b32.xlu1 %v1495_v61, %s8903_s27  ;;  %v1000_v24 = vld [vmem:[#allocation2 + $0x9c] sm:$0xf]  ;;  %vm10707_vm13 = vcmask 294144  }
  0xdb   : > { %2464 = vrot.lane.b32.xlu0 %v2383_v56, %s8906_s30  ;;  %v8559_v10 = vld [vmem:[#allocation2 + $0x90] sm:$0xff]   ;;  %v811_v11 = vor.u32 %v809_v49, %v808_v50  ;;  %v813_v3 = vrot.slane %v808_v50, 4  ;;  %v1001_v26 = vsel %vm9007_vm8, %v803_v9, %v1000_v24  ;;  %v490_v50 = vld [vmem:[%s8982_s23 + $0xd8] sm:$0xff] }
  0xdc   : > { %v2020_v40 = vpop.permute.xlu0 %2019  ;;  %v3701_v2 = vld [vmem:[#allocation4 + $0x18] sm:$0xff]  ;;  %v8562_v14 = vld [vmem:[#allocation2 + $0x90] sm:$0xff]   ;;  %1002 = vst [vmem:[#allocation2 + $0x9c] sm:$0xf] %v1001_v26 }
  0xdd   : > { %2064 = vst.msk [vmem:[#allocation4 + $0x20] sm:$0xff] %vm2059_vm14, %v2020_v40  ;;  %v1845_v47 = vpop.permute.xlu1 %1844  ;;  %8319 = vmatmul.mubr.msk.bf16.gmra.mrb[4].mxu0 %vm3740_vm12, %v3701_v2  ;;  %v8567_v27 = vld [vmem:[#allocation2 + $0x90] sm:$0xfe]   ;;  %v812_v23 = vsel %vm8999_vm7, %v804_v5, %v811_v11  ;;  %v2385_v7 = vshrl.u32 %v8562_v14, 16  ;;  %v2387_v25 = vshll.u32 %v8562_v14, 16 }
  0xde   : > { %1888 = vst.msk [vmem:[#allocation4 + $0x28] sm:$0xff] %vm10706_vm6, %v1845_v47  ;;  %1856 = vrot.lane.b32.xlu1 %v1821_v51, %s8900_s24  ;;  %v8570_v20 = vld [vmem:[#allocation2 + $0x90] sm:$0xff]   ;;  %v2718_v15 = vrot.slane %v8567_v27, 1  ;;  %v1004_v37 = vld [vmem:[#allocation2 + $0xa4] sm:$0x1]  ;;  %vm10708_vm6 = vmmov %vm10707_vm13 }
  0xdf   : > { %2753 = vrot.lane.b32.xlu0 %v2717_v62, %s8904_s28  ;;  %1003 = vst.msk [vmem:[#allocation2 + $0xa0] sm:$0xf] %vm226_vm0, %v812_v23  ;;  %v8572_v28 = vld [vmem:[#allocation2 + $0x90] sm:$0xff]   ;;  %v8563_v29 = vld [vmem:[#allocation2 + $0x98] ss:$0 sps:$4 sm:$0x11]   ;;  %v1005_v51 = vsel %vm8948_vm3, %v813_v3, %v1004_v37 }
  0xe0   : > { %v2453_v48 = vpop.permute.xlu0 %2452  ;;  %v2389_v32 = vrot.slane %v2387_v25, 1  ;;  %v8568_v33 = vld [vmem:[#allocation2 + $0x98] ss:$0 sps:$4 sm:$0x11]   ;;  %v2392_v35 = vshll.u32 %v8563_v29, 16  ;;  %v3273_v45 = vshrl.u32 %v8572_v28, 16 }
  0xe1   : > { %2497 = vst.msk [vmem:[#allocation4 + $0x20] sm:$0xff] %vm2492_vm15, %v2453_v48  ;;  %v2022_v1 = vpop.permute.xlu1 %2021  ;;  %v8573_v34 = vld [vmem:[#allocation2 + $0x98] ss:$0 sps:$4 sm:$0x11]   ;;  %v2719_v43 = vrot.slane %v8568_v33, 1  ;;  %v3275_v44 = vshll.u32 %v8572_v28, 16  ;;  %v8233_v28 = vpack.c.bf16 %v490_v50, %v490_v50 }
  0xe2   : > { %2065 = vst.msk [vmem:[#allocation4 + $0x28] sm:$0xff] %vm2059_vm14, %v2022_v1  ;;  %2033 = vrot.lane.b32.xlu1 %v8559_v10, %s8901_s25  ;;  %v2390_v42 = vor.u32 %v2389_v32, %v2385_v7  ;;  %v8578_v41 = vld [vmem:[#allocation2 + $0x90] sm:$0xff]   ;;  %v2394_v47 = vrot.slane %v2392_v35, 1  ;;  %v3280_v48 = vshll.u32 %v8573_v34, 16  ;;  %1006 = vst [vmem:[#allocation2 + $0xa4] sm:$0x1] %v1005_v51 }
  0xe3   : > { %2931 = vrot.lane.b32.xlu0 %v8570_v20, %s8902_s26  ;;  %v3277_v52 = vrot.slane %v3275_v44, 1  ;;  %v8576_v55 = vld [vmem:[#allocation2 + $0x90] sm:$0xfe]   ;;  %v8577_v56 = vld [vmem:[#allocation2 + $0x98] ss:$0 sps:$4 sm:$0x11]   ;;  %v2720_v53 = vsel %vm1785_vm9, %v2718_v15, %v2719_v43 }
  0xe4   : > { %v2742_v4 = vpop.permute.xlu0 %2741  ;;  %v2395_v22 = vsel %vm10695_vm10, %v2390_v42, %v2394_v47  ;;  %v3282_v30 = vrot.slane %v3280_v48, 1  ;;  %v3615_v17 = vrot.slane %v8576_v55, 1  ;;  %v1497_v2 = vshrl.u32 %v8578_v41, 16  ;;  %v8579_v49 = vld [vmem:[#allocation2 + $0x98] ss:$0 sps:$4 sm:$0x11]  }
  0xe5   : > { %2786 = vst.msk [vmem:[#allocation4 + $0x20] sm:$0xff] %vm2781_vm1, %v2742_v4  ;;  %v2455_v12 = vpop.permute.xlu1 %2454  ;;  %v3278_v58 = vor.u32 %v3277_v52, %v3273_v45  ;;  %v3616_v39 = vrot.slane %v8577_v56, 1  ;;  %v1499_v1 = vshll.u32 %v8578_v41, 16  ;;  %v1504_v11 = vshll.u32 %v8579_v49, 16  ;;  %v8584_v34 = vld [vmem:[#allocation2 + $0x90] sm:$0xfe]  }
  0xe6   : > { %2498 = vst.msk [vmem:[#allocation4 + $0x28] sm:$0xff] %vm2492_vm15, %v2455_v12  ;;  %2466 = vrot.lane.b32.xlu1 %v2395_v22, %s8906_s30  ;;  %v8574_v59 = vld [vmem:[#allocation2 + $0x9c] sm:$0xff]   ;;  %v8585_v42 = vld [vmem:[#allocation2 + $0x98] ss:$0 sps:$4 sm:$0x11]   ;;  %v818_v37 = vshll.u32 %v9498_v38, 16 }
  0xe7   : > { %v8571_v62 = vld [vmem:[#allocation2 + $0x9c] sm:$0xff]   ;;  %v3283_v63 = vsel %vm10695_vm10, %v3278_v58, %v3282_v30  ;;  %v3285_v4 = vshrl.u32 %v8574_v59, 16  ;;  %v3287_v21 = vshll.u32 %v8574_v59, 16  ;;  %v3617_v9 = vsel %vm1785_vm9, %v3615_v17, %v3616_v39  ;;  %v336_v30 = vld [vmem:[#allocation2 + $0xb0] sm:$0x1] }
  0xe8   : > { %v2920_v13 = vpop.permute.xlu0 %2919  ;;  %3364 = vrot.lane.b32.xlu0 %v3283_v63, %s8907_s6  ;;  %v8580_v5 = vld [vmem:[#allocation2 + $0x9c] sm:$0xfe]   ;;  %v1501_v10 = vrot.slane %v1499_v1, 1  ;;  %v1506_v23 = vrot.slane %v1504_v11, 1  ;;  %v1822_v46 = vrot.slane %v8584_v34, 1  ;;  %v1823_v47 = vrot.slane %v8585_v42, 1 }
  0xe9   : > { %2964 = vst.msk [vmem:[#allocation4 + $0x20] sm:$0xff] %vm2959_vm2, %v2920_v13  ;;  %v2744_v40 = vpop.permute.xlu1 %2743  ;;  %v8575_v12 = vld [vmem:[#allocation2 + $0xa4] ss:$0 sps:$4 sm:$0x11]   ;;  %v3289_v13 = vrot.slane %v3287_v21, 1  ;;  %v3618_v24 = vrot.slane %v8580_v5, 1 }
  0xea   : > { %2787 = vst.msk [vmem:[#allocation4 + $0x28] sm:$0xff] %vm2781_vm1, %v2744_v40  ;;  %2755 = vrot.lane.b32.xlu1 %v2720_v53, %s8904_s28  ;;  %v8581_v18 = vld [vmem:[#allocation2 + $0xa4] ss:$0 sps:$4 sm:$0x11]   ;;  %v3292_v20 = vshll.u32 %v8575_v12, 16  ;;  %v8582_v7 = vld [vmem:[#allocation2 + $0x9c] sm:$0xff]   ;;  %v1502_v25 = vor.u32 %v1501_v10, %v1497_v2  ;;  %v1824_v58 = vsel %vm1785_vm9, %v1822_v46, %v1823_v47 }
  0xeb   : > { %v3290_v19 = vor.u32 %v3289_v13, %v3285_v4  ;;  %v3619_v3 = vrot.slane %v8581_v18, 1  ;;  %v8583_v26 = vld [vmem:[#allocation2 + $0xa4] ss:$0 sps:$4 sm:$0x11]   ;;  %v1509_v15 = vshrl.u32 %v8582_v7, 16  ;;  %v1511_v40 = vshll.u32 %v8582_v7, 16 }
  0xec   : > { %v3353_v61 = vpop.permute.xlu0 %3352  ;;  %3653 = vrot.lane.b32.xlu0 %v3617_v9, %s8905_s29  ;;  %v3294_v29 = vrot.slane %v3292_v20, 1  ;;  %v1516_v35 = vshll.u32 %v8583_v26, 16  ;;  %v1507_v51 = vsel %vm10695_vm10, %v1502_v25, %v1506_v23  ;;  %v8587_v52 = vld [vmem:[#allocation2 + $0xa4] ss:$0 sps:$4 sm:$0x11]   ;;  %v8588_v55 = vld [vmem:[#allocation2 + $0x9c] sm:$0xff]  }
  0xed   : > { %3397 = vst.msk [vmem:[#allocation4 + $0x20] sm:$0xff] %vm3392_vm4, %v3353_v61  ;;  %v2922_v54 = vpop.permute.xlu1 %2921  ;;  %v817_v61 = vrot.slane %v815_v57, 7  ;;  %v3620_v33 = vsel %vm1785_vm9, %v3618_v24, %v3619_v3  ;;  %v1513_v44 = vrot.slane %v1511_v40, 1  ;;  %v823_v22 = vshrl.u32 %v8233_v28, 16  ;;  %v8590_v38 = vld [vmem:[#allocation2 + $0x9c] sm:$0xff]   ;;  %v492_v25 = vld [vmem:[%s8982_s23 + $0xe8] sm:$0xff] }
  0xee   : > { %2965 = vst.msk [vmem:[#allocation4 + $0x28] sm:$0xff] %vm2959_vm2, %v2922_v54  ;;  %2933 = vrot.lane.b32.xlu1 %v8571_v62, %s8902_s26  ;;  %v3295_v45 = vsel %vm10695_vm10, %v3290_v19, %v3294_v29  ;;  %v1518_v41 = vrot.slane %v1516_v35, 1  ;;  %v826_v17 = vshll.u32 %v8233_v28, 16  ;;  %v1826_v53 = vrot.slane %v8587_v52, 1  ;;  %v1007_v39 = vld [vmem:[#allocation2 + $0xa8] sm:$0xf] }
  0xef   : > { %v821_v48 = vrot.slane %v817_v61, 4  ;;  %v1514_v54 = vor.u32 %v1513_v44, %v1509_v15  ;;  %v820_v56 = vor.u32 %v818_v37, %v817_v61  ;;  %v9530_v59 = vrot.slane %v823_v22, 7  ;;  %v8591_v1 = vld [vmem:[#allocation2 + $0xa4] ss:$0 sps:$4 sm:$0x11]   ;;  %v493_v44 = vld [vmem:[%s8982_s23 + $0xf0] sm:$0xff] }
  0xf0   : > { %v3642_v8 = vpop.permute.xlu0 %3641  ;;  %3655 = vrot.lane.b32.xlu0 %v3620_v33, %s8905_s29  ;;  %v2397_v4 = vshrl.u32 %v8590_v38, 16  ;;  %v2399_v21 = vshll.u32 %v8590_v38, 16  ;;  %v491_v5 = vld [vmem:[%s8982_s23 + $0xe0] sm:$0xff]  ;;  %v337_v9 = vsel %vm8973_vm5, 0, %v336_v30  ;;  %v283_v7 = vld [vmem:[#allocation2 + $0xb4] sm:$0x1]  ;;  %v8235_v40 = vpack.c.bf16 %v492_v25, %v492_v25 }
  0xf1   : > { %3686 = vst.msk [vmem:[#allocation4 + $0x20] sm:$0xff] %vm10707_vm13, %v3642_v8  ;;  %v3355_v60 = vpop.permute.xlu1 %3354  ;;  %vm10709_vm13 = vcmask 64544   ;;  %v8586_v8 = vld [vmem:[#allocation2 + $0x9c] sm:$0xfe]   ;;  %v1519_v63 = vsel %vm10695_vm10, %v1514_v54, %v1518_v41  ;;  %v828_v49 = vor.u32 %v826_v17, %v9530_v59  ;;  %v830_v10 = vrot.slane %v9530_v59, 4 }
  0xf2   : > { %3398 = vst.msk [vmem:[#allocation4 + $0x28] sm:$0xff] %vm3392_vm4, %v3355_v60  ;;  %3366 = vrot.lane.b32.xlu1 %v3295_v45, %s8907_s6  ;;  %v1825_v2 = vrot.slane %v8586_v8, 1  ;;  %v8599_v60 = vld [vmem:[#allocation2 + $0x54] sm:$0xff]   ;;  %v8234_v11 = vpack.c.bf16 %v491_v5, %v491_v5  ;;  %v2401_v13 = vrot.slane %v2399_v21, 1  ;;  %338 = vst [vmem:[#allocation2 + $0xb0] sm:$0x1] %v337_v9  ;;  %v9565_v47 = vpack.c.bf16 %v493_v44, %v493_v44 }
  0xf3   : > { %1166 = vst.msk [vmem:[#allocation4 + $0x38] sm:$0xff] %vm10696_vm11, %v8599_v60  ;;  %v829_v12 = vsel %vm8999_vm7, %v821_v48, %v828_v49  ;;  %v8596_v23 = vld [vmem:[#allocation2 + $0xa4] ss:$0 sps:$4 sm:$0x11]   ;;  %v284_v15 = vsel %vm8948_vm3, 0, %v283_v7  ;;  %v843_v41 = vshll.u32 %v8235_v40, 16 }
  0xf4   : > { %v3644_v16 = vpop.permute.xlu0 %3643  ;;  %1858 = vrot.lane.b32.xlu0 %v1824_v58, %s8900_s24  ;;  %1010 = vst.msk [vmem:[#allocation2 + $0xac] sm:$0xf] %vm226_vm0, %v829_v12  ;;  %v1827_v18 = vsel %vm1785_vm9, %v1825_v2, %v1826_v53  ;;  %v2402_v19 = vor.u32 %v2401_v13, %v2397_v4  ;;  %v832_v3 = vshrl.u32 %v8234_v11, 16  ;;  %v835_v26 = vshll.u32 %v8234_v11, 16  ;;  %285 = vst [vmem:[#allocation2 + $0xb4] sm:$0x1] %v284_v15 }
  0xf5   : > { %3687 = vst.msk [vmem:[#allocation4 + $0x28] sm:$0xff] %vm10708_vm6, %v3644_v16  ;;  %v1557_v14 = vpop.permute.xlu1 %1556  ;;  %vm10710_vm6 = vcmask 97344   ;;  %v1008_v16 = vsel %vm9007_vm8, %v820_v56, %v1007_v39  ;;  %v2722_v29 = vrot.slane %v8596_v23, 1  ;;  %v849_v38 = vshrl.u32 %v9565_v47, 16 }
  0xf6   : > { %1599 = vst.msk [vmem:[#allocation4 + $0x30] sm:$0xff] %vm10709_vm13, %v1557_v14  ;;  %1568 = vrot.lane.b32.xlu1 %v1507_v51, %s8903_s27  ;;  %1009 = vst [vmem:[#allocation2 + $0xa8] sm:$0xf] %v1008_v16  ;;  %v2404_v14 = vshll.u32 %v8591_v1, 16  ;;  %v834_v42 = vrot.slane %v832_v3, 7 }
  0xf8   : > { %v1847_v27 = vpop.permute.xlu0 %1846  ;;  %2035 = vrot.lane.b32.xlu0 %v8588_v55, %s8901_s25  ;;  %v2406_v20 = vrot.slane %v2404_v14, 1  ;;  %v3702_v61 = vld [vmem:[#allocation4 + $0x20] sm:$0xff]  ;;  %v838_v54 = vrot.slane %v834_v42, 4  ;;  %v837_v55 = vor.u32 %v835_v26, %v834_v42 }
  0xf9   : > { %1889 = vst.msk [vmem:[#allocation4 + $0x30] sm:$0xff] %vm10710_vm6, %v1847_v27  ;;  %v1559_v43 = vpop.permute.xlu1 %1558  ;;  %v8595_v27 = vld [vmem:[#allocation2 + $0x9c] sm:$0xfe]   ;;  %8322 = vmatprep.mubr.msk.bf16.mxu0 %vm3740_vm12, %v3702_v61  ;;  %v1011_v37 = vld [vmem:[#allocation2 + $0xb0] sm:$0x1] }
  0xfa   : > { %1600 = vst.msk [vmem:[#allocation4 + $0x38] sm:$0xff] %vm10709_vm13, %v1559_v43  ;;  %1570 = vrot.lane.b32.xlu1 %v1519_v63, %s8903_s27  ;;  %v2721_v24 = vrot.slane %v8595_v27, 1  ;;  %v2407_v28 = vsel %vm10695_vm10, %v2402_v19, %v2406_v20  ;;  %v840_v43 = vshrl.u32 %v8235_v40, 16  ;;  %v1012_v51 = vsel %vm8948_vm3, %v830_v10, %v1011_v37 }
  0xfb   : > { %1013 = vst [vmem:[#allocation2 + $0xb0] sm:$0x1] %v1012_v51  ;;  %v1014_v2 = vld [vmem:[#allocation2 + $0xb4] sm:$0xf]  ;;  %v9583_v10 = vrot.slane %v849_v38, 7  ;;  %vm10711_vm13 = vcmask 294144  }
  0xfc   : > { %v2024_v32 = vpop.permute.xlu0 %2023  ;;  %v3703_v35 = vld [vmem:[#allocation4 + $0x28] sm:$0xff]  ;;  %2468 = vrot.lane.b32.xlu0 %v2407_v28, %s8906_s30  ;;  %v2723_v34 = vsel %vm1785_vm9, %v2721_v24, %v2722_v29  ;;  %v842_v56 = vrot.slane %v840_v43, 7 }
  0xfd   : > { %2066 = vst.msk [vmem:[#allocation4 + $0x30] sm:$0xff] %vm2059_vm14, %v2024_v32  ;;  %v1849_v62 = vpop.permute.xlu1 %1848  ;;  %v339_v32 = vld [vmem:[#allocation2 + $0xbc] sm:$0x1]  ;;  %8323 = vmatmul.mubr.msk.bf16.gmra.mrb[8].mxu0 %vm3740_vm12, %v3703_v35  ;;  %v8589_v48 = vld [vmem:[#allocation2 + $0xa8] sm:$0xff]  }
  0xfe   : > { %1890 = vst.msk [vmem:[#allocation4 + $0x38] sm:$0xff] %vm10710_vm6, %v1849_v62  ;;  %1860 = vrot.lane.b32.xlu1 %v1827_v18, %s8900_s24  ;;  %v340_v46 = vsel %vm8973_vm5, 0, %v339_v32  ;;  %v8592_v8 = vld [vmem:[#allocation2 + $0xa8] sm:$0xff]   ;;  %v845_v58 = vor.u32 %v843_v41, %v842_v56  ;;  %v847_v53 = vrot.slane %v842_v56, 4  ;;  %v1015_v62 = vsel %vm9007_vm8, %v837_v55, %v1014_v2  ;;  %v494_v56 = vld [vmem:[%s8982_s23 + $0xf8] sm:$0xff]  ;;  %vm10712_vm6 = vmmov %vm10711_vm13 }
  0xff   : > { %341 = vst [vmem:[#allocation2 + $0xbc] sm:$0x1] %v340_v46  ;;  %v8597_v52 = vld [vmem:[#allocation2 + $0xa8] sm:$0xfe]   ;;  %v2409_v30 = vshrl.u32 %v8592_v8, 16  ;;  %v852_v18 = vshll.u32 %v9565_v47, 16 }
 0x100   : > { %v2457_v57 = vpop.permute.xlu0 %2456  ;;  %2757 = vrot.lane.b32.xlu0 %v2723_v34, %s8904_s28  ;;  %v8600_v22 = vld [vmem:[#allocation2 + $0xa8] sm:$0xff]   ;;  %v2724_v60 = vrot.slane %v8597_v52, 1  ;;  %v846_v16 = vsel %vm8999_vm7, %v838_v54, %v845_v58  ;;  %1016 = vst [vmem:[#allocation2 + $0xb4] sm:$0xf] %v1015_v62 }
 0x101   : > { %2499 = vst.msk [vmem:[#allocation4 + $0x30] sm:$0xff] %vm2492_vm15, %v2457_v57  ;;  %v2026_v33 = vpop.permute.xlu1 %2025  ;;  %v2411_v57 = vshll.u32 %v8592_v8, 16  ;;  %v8602_v17 = vld [vmem:[#allocation2 + $0xa8] sm:$0xff]  }
 0x102   : > { %2067 = vst.msk [vmem:[#allocation4 + $0x38] sm:$0xff] %vm2059_vm14, %v2026_v33  ;;  %2037 = vrot.lane.b32.xlu1 %v8589_v48, %s8901_s25  ;;  %v9572_v59 = vld [vmem:[#allocation2 + $0xa8] sm:$0xff]   ;;  %v3297_v1 = vshrl.u32 %v8602_v17, 16  ;;  %v3299_v4 = vshll.u32 %v8602_v17, 16 }
 0x103   : > { %v2413_v39 = vrot.slane %v2411_v57, 1  ;;  %v8606_v63 = vld [vmem:[#allocation2 + $0xa8] sm:$0xfe]   ;;  %1017 = vst.msk [vmem:[#allocation2 + $0xb8] sm:$0xf] %vm226_vm0, %v846_v16  ;;  %v1521_v21 = vshrl.u32 %v9572_v59, 16 }
 0x104   : > { %v2746_v50 = vpop.permute.xlu0 %2745  ;;  %2935 = vrot.lane.b32.xlu0 %v8600_v22, %s8902_s26  ;;  %v1523_v5 = vshll.u32 %v9572_v59, 16  ;;  %v3621_v9 = vrot.slane %v8606_v63, 1  ;;  %v8593_v11 = vld [vmem:[#allocation2 + $0xb0] ss:$0 sps:$4 sm:$0x11]   ;;  %v3301_v12 = vrot.slane %v3299_v4, 1 }
 0x105   : > { %2788 = vst.msk [vmem:[#allocation4 + $0x30] sm:$0xff] %vm2781_vm1, %v2746_v50  ;;  %v8598_v14 = vld [vmem:[#allocation2 + $0xb0] ss:$0 sps:$4 sm:$0x11]   ;;  %v2414_v20 = vor.u32 %v2413_v39, %v2409_v30  ;;  %v2416_v23 = vshll.u32 %v8593_v11, 16 }
 0x106   : > { %v1018_v50 = vld [vmem:[#allocation2 + $0xbc] sm:$0x1]  ;;  %v8603_v24 = vld [vmem:[#allocation2 + $0xb0] ss:$0 sps:$4 sm:$0x11]   ;;  %v2725_v7 = vrot.slane %v8598_v14, 1  ;;  %v3302_v26 = vor.u32 %v3301_v12, %v3297_v1 }
 0x107   : > { %v1019_v13 = vsel %vm8948_vm3, %v847_v53, %v1018_v50  ;;  %v8607_v25 = vld [vmem:[#allocation2 + $0xb0] ss:$0 sps:$4 sm:$0x11]   ;;  %v2418_v3 = vrot.slane %v2416_v23, 1  ;;  %v3304_v28 = vshll.u32 %v8603_v24, 16  ;;  %v1525_v15 = vrot.slane %v1523_v5, 1 }
 0x108   : > { %v2924_v45 = vpop.permute.xlu0 %2923  ;;  %1020 = vst [vmem:[#allocation2 + $0xbc] sm:$0x1] %v1019_v13  ;;  %v3622_v29 = vrot.slane %v8607_v25, 1  ;;  %v8609_v34 = vld [vmem:[#allocation2 + $0xb0] ss:$0 sps:$4 sm:$0x11]   ;;  %v2726_v43 = vsel %vm1785_vm9, %v2724_v60, %v2725_v7  ;;  %v8237_v50 = vpack.c.bf16 %v494_v56, %v494_v56 }
 0x109   : > { %2966 = vst.msk [vmem:[#allocation4 + $0x30] sm:$0xff] %vm2959_vm2, %v2924_v45  ;;  %v2419_v32 = vsel %vm10695_vm10, %v2414_v20, %v2418_v3  ;;  %v3306_v33 = vrot.slane %v3304_v28, 1  ;;  %v1528_v46 = vshll.u32 %v8609_v34, 16  ;;  %v8615_v1 = vld [vmem:[#allocation2 + $0xb0] ss:$0 sps:$4 sm:$0x11]   ;;  %v1526_v11 = vor.u32 %v1525_v15, %v1521_v21 }
 0x10a   : > { %v8604_v35 = vld [vmem:[#allocation2 + $0xb4] sm:$0xff]   ;;  %2470 = vrot.lane.b32.xlu1 %v2419_v32, %s8906_s30  ;;  %v3623_v8 = vsel %vm1785_vm9, %v3621_v9, %v3622_v29  ;;  %v1829_v13 = vrot.slane %v8615_v1, 1  ;;  %v286_v25 = vld [vmem:[#allocation2 + $0xc0] sm:$0x1]  ;;  %v855_v3 = vrot.slane %v9583_v10, 4  ;;  %v857_v28 = vshrl.u32 %v8237_v50, 16 }
 0x10b   : > { %v8612_v42 = vld [vmem:[#allocation2 + $0xb4] sm:$0xff]   ;;  %v3307_v45 = vsel %vm10695_vm10, %v3302_v26, %v3306_v33  ;;  %v3309_v37 = vshrl.u32 %v8604_v35, 16  ;;  %v3311_v41 = vshll.u32 %v8604_v35, 16  ;;  %v1530_v58 = vrot.slane %v1528_v46, 1  ;;  %v8624_v32 = vld [vmem:[#allocation2 + $0x60] sm:$0xff]  }
 0x10c   : > { %v3357_v19 = vpop.permute.xlu0 %3356  ;;  %3368 = vrot.lane.b32.xlu0 %v3307_v45, %s8907_s6  ;;  %v8610_v52 = vld [vmem:[#allocation2 + $0xb4] sm:$0xfe]   ;;  %v1535_v39 = vshll.u32 %v8612_v42, 16  ;;  %v1533_v63 = vshrl.u32 %v8612_v42, 16  ;;  %v287_v26 = vsel %vm8948_vm3, 0, %v286_v25  ;;  %v9622_v33 = vrot.slane %v857_v28, 7 }
 0x10d   : > { %3399 = vst.msk [vmem:[#allocation4 + $0x30] sm:$0xff] %vm3392_vm4, %v3357_v19  ;;  %v8601_v22 = vld [vmem:[#allocation2 + $0xb4] sm:$0xff]   ;;  %v3313_v30 = vrot.slane %v3311_v41, 1  ;;  %v3624_v17 = vrot.slane %v8610_v52, 1  ;;  %v1531_v15 = vsel %vm10695_vm10, %v1526_v11, %v1530_v58  ;;  %288 = vst [vmem:[#allocation2 + $0xc0] sm:$0x1] %v287_v26 }
 0x10e   : > { %2759 = vrot.lane.b32.xlu1 %v2726_v43, %s8904_s28  ;;  %v1537_v4 = vrot.slane %v1535_v39, 1  ;;  %v9608_v14 = vld [vmem:[#allocation2 + $0xb4] sm:$0xfe]   ;;  %1167 = vst.msk [vmem:[#allocation4 + $0x40] sm:$0xff] %vm10696_vm11, %v8624_v32  ;;  %v864_v52 = vrot.slane %v9622_v33, 4  ;;  %v8641_v11 = vld [vmem:[#allocation2 + $0x84] sm:$0xff]  }
 0x10f   : > { %v8605_v44 = vld [vmem:[#allocation2 + $0xbc] ss:$0 sps:$4 sm:$0x11]   ;;  %v3314_v2 = vor.u32 %v3313_v30, %v3309_v37  ;;  %v1831_v7 = vrot.slane %v9608_v14, 1  ;;  %v8618_v21 = vld [vmem:[#allocation2 + $0xb4] sm:$0xff]   ;;  %1170 = vst.msk [vmem:[#allocation4 + $0x58] sm:$0xff] %vm10696_vm11, %v8641_v11 }
 0x110   : > { %v3316_v54 = vshll.u32 %v8605_v44, 16  ;;  %v8611_v55 = vld [vmem:[#allocation2 + $0xbc] ss:$0 sps:$4 sm:$0x11]   ;;  %3657 = vrot.lane.b32.xlu0 %v3623_v8, %s8905_s29  ;;  %v8620_v29 = vld [vmem:[#allocation2 + $0xb4] sm:$0xff]   ;;  %v854_v8 = vor.u32 %v852_v18, %v9583_v10 }
 0x111   : > { %v3625_v38 = vrot.slane %v8611_v55, 1  ;;  %v8613_v53 = vld [vmem:[#allocation2 + $0xbc] ss:$0 sps:$4 sm:$0x11]   ;;  %v2421_v34 = vshrl.u32 %v8620_v29, 16  ;;  %v2423_v42 = vshll.u32 %v8620_v29, 16 }
 0x112   : > { %v3646_v61 = vpop.permute.xlu0 %3645  ;;  %v3318_v57 = vrot.slane %v3316_v54, 1  ;;  %2937 = vrot.lane.b32.xlu1 %v8601_v22, %s8902_s26  ;;  %v1540_v5 = vshll.u32 %v8613_v53, 16  ;;  %v9611_v19 = vld [vmem:[#allocation2 + $0xbc] ss:$0 sps:$4 sm:$0x11]  }
 0x113   : > { %3688 = vst.msk [vmem:[#allocation4 + $0x30] sm:$0xff] %vm10711_vm13, %v3646_v61  ;;  %v3626_v62 = vsel %vm1785_vm9, %v3624_v17, %v3625_v38  ;;  %v1832_v59 = vrot.slane %v9611_v19, 1  ;;  %v860_v61 = vshll.u32 %v8237_v50, 16  ;;  %v8621_v35 = vld [vmem:[#allocation2 + $0xbc] ss:$0 sps:$4 sm:$0x11]  }
 0x114   : > { %v3319_v9 = vsel %vm10695_vm10, %v3314_v2, %v3318_v57  ;;  %3659 = vrot.lane.b32.xlu0 %v3626_v62, %s8905_s29  ;;  %v342_v44 = vld [vmem:[#allocation2 + $0xc8] sm:$0x1]  ;;  %v2425_v41 = vrot.slane %v2423_v42, 1  ;;  %v2428_v46 = vshll.u32 %v8621_v35, 16  ;;  %vm10713_vm13 = vcmask 64544  }
 0x115   : > { %v862_v37 = vor.u32 %v860_v61, %v9622_v33  ;;  %v8625_v57 = vld [vmem:[#allocation2 + $0xb4] sm:$0xfe]   ;;  %v8626_v58 = vld [vmem:[#allocation2 + $0xbc] ss:$0 sps:$4 sm:$0x11]  }
 0x116   : > { %3370 = vrot.lane.b32.xlu1 %v3319_v9, %s8907_s6  ;;  %v2426_v22 = vor.u32 %v2425_v41, %v2421_v34  ;;  %v2430_v30 = vrot.slane %v2428_v46, 1  ;;  %v289_v18 = vld [vmem:[#allocation2 + $0xcc] sm:$0x1]  ;;  %v1021_v17 = vld [vmem:[#allocation2 + $0xc0] sm:$0xf]  ;;  %v2727_v2 = vrot.slane %v8625_v57, 1 }
 0x117   : > { %v863_v56 = vsel %vm8999_vm7, %v855_v3, %v862_v37  ;;  %v2728_v53 = vrot.slane %v8626_v58, 1  ;;  %v290_v39 = vsel %vm8948_vm3, 0, %v289_v18  ;;  %v1022_v62 = vsel %vm9007_vm8, %v854_v8, %v1021_v17  ;;  %v8643_v18 = vld [vmem:[#allocation2 + $0x9c] sm:$0xff]   ;;  %v8644_v17 = vld [vmem:[#allocation2 + $0xa8] sm:$0xff]  }
 0x118   : > { %v2459_v49 = vpop.permute.xlu1 %2458  ;;  %v3648_v51 = vpop.permute.xlu0 %3647  ;;  %1024 = vst.msk [vmem:[#allocation2 + $0xc4] sm:$0xf] %vm226_vm0, %v863_v56  ;;  %v2431_v38 = vsel %vm10695_vm10, %v2426_v22, %v2430_v30  ;;  %291 = vst [vmem:[#allocation2 + $0xcc] sm:$0x1] %v290_v39  ;;  %v8638_v30 = vld [vmem:[#allocation2 + $0xcc] sm:$0xfe]  }
 0x119   : > { %2500 = vst.msk [vmem:[#allocation4 + $0x38] sm:$0xff] %vm2492_vm15, %v2459_v49  ;;  %v8614_v49 = vld [vmem:[#allocation2 + $0xa8] sm:$0xfe]   ;;  %1023 = vst [vmem:[#allocation2 + $0xc0] sm:$0xf] %v1022_v62  ;;  %v8645_v39 = vld [vmem:[#allocation2 + $0xb4] sm:$0xff]  }
 0x11a   : > { %v1828_v12 = vrot.slane %v8614_v49, 1  ;;  %1572 = vrot.lane.b32.xlu1 %v1531_v15, %s8903_s27  ;;  %v3704_v55 = vld [vmem:[#allocation4 + $0x30] sm:$0xff]  ;;  %1172 = vst.msk [vmem:[#allocation4 + $0x68] sm:$0xff] %vm10696_vm11, %v8643_v18  ;;  %1173 = vst.msk [vmem:[#allocation4 + $0x70] sm:$0xff] %vm10696_vm11, %v8644_v17 }
 0x11b   : > { %8326 = vmatprep.mubr.msk.bf16.mxu0 %vm3740_vm12, %v3704_v55  ;;  %1174 = vst.msk [vmem:[#allocation4 + $0x78] sm:$0xff] %vm10696_vm11, %v8645_v39  ;;  %v370_v39 = vld [vmem:[#allocation3 + $0x3c] sm:$0x1] }
 0x11c   : > { %v2748_v27 = vpop.permute.xlu1 %2747  ;;  %v1830_v24 = vsel %vm1785_vm9, %v1828_v12, %v1829_v13 }
 0x11d   : > { %2789 = vst.msk [vmem:[#allocation4 + $0x38] sm:$0xff] %vm2781_vm1, %v2748_v27  ;;  %v1542_v27 = vrot.slane %v1540_v5, 1  ;;  %1862 = vrot.lane.b32.xlu0 %v1830_v24, %s8900_s24  ;;  %v2729_v5 = vsel %vm1785_vm9, %v2727_v2, %v2728_v53 }
 0x11f   : > { %v8634_v25 = vld [vmem:[#allocation2 + $0xcc] sm:$0xff]  }
 0x120   : > { %v2926_v40 = vpop.permute.xlu1 %2925  ;;  %v8619_v12 = vld [vmem:[#allocation2 + $0xc0] sm:$0xff]  }
 0x121   : > { %2967 = vst.msk [vmem:[#allocation4 + $0x38] sm:$0xff] %vm2959_vm2, %v2926_v40  ;;  %v1538_v40 = vor.u32 %v1537_v4, %v1533_v63  ;;  %2039 = vrot.lane.b32.xlu0 %v8618_v21, %s8901_s25  ;;  %v345_v63 = vld [vmem:[#allocation2 + $0xd4] sm:$0x1]  ;;  %v8640_v4 = vld [vmem:[#allocation2 + $0x78] sm:$0xff]   ;;  %v8622_v13 = vld [vmem:[#allocation2 + $0xc0] sm:$0xff]  }
 0x122   : > { %v346_v49 = vsel %vm8973_vm5, 0, %v345_v63  ;;  %1169 = vst.msk [vmem:[#allocation4 + $0x50] sm:$0xff] %vm10696_vm11, %v8640_v4  ;;  %v8627_v14 = vld [vmem:[#allocation2 + $0xc0] sm:$0xfe]   ;;  %v3630_v4 = vrot.slane %v8638_v30, 1 }
 0x123   : > { %v1543_v54 = vsel %vm10695_vm10, %v1538_v40, %v1542_v27  ;;  %347 = vst [vmem:[#allocation2 + $0xd4] sm:$0x1] %v346_v49  ;;  %v8630_v27 = vld [vmem:[#allocation2 + $0xc0] sm:$0xff]   ;;  %v2730_v40 = vrot.slane %v8627_v14, 1 }
 0x124   : > { %v3359_v48 = vpop.permute.xlu1 %3358  ;;  %1574 = vrot.lane.b32.xlu1 %v1543_v54, %s8903_s27  ;;  %v8632_v24 = vld [vmem:[#allocation2 + $0xc0] sm:$0xff]  }
 0x125   : > { %3400 = vst.msk [vmem:[#allocation4 + $0x38] sm:$0xff] %vm3392_vm4, %v3359_v48  ;;  %v1851_v16 = vpop.permute.xlu0 %1850  ;;  %v343_v48 = vsel %vm8973_vm5, 0, %v342_v44  ;;  %2472 = vrot.lane.b32.xlu0 %v2431_v38, %s8906_s30  ;;  %v3321_v61 = vshrl.u32 %v8632_v24, 16  ;;  %v3323_v32 = vshll.u32 %v8632_v24, 16  ;;  %v3333_v44 = vshrl.u32 %v8634_v25, 16  ;;  %v8631_v38 = vld [vmem:[#allocation2 + $0xcc] sm:$0xff]  }
 0x126   : > { %3689 = vst.msk [vmem:[#allocation4 + $0x38] sm:$0xff] %vm10712_vm6, %v3648_v51  ;;  %v8629_v51 = vld [vmem:[#allocation2 + $0x6c] sm:$0xff]   ;;  %344 = vst [vmem:[#allocation2 + $0xc8] sm:$0x1] %v343_v48  ;;  %vm10714_vm6 = vcmask 97344  }
 0x127   : > { %1168 = vst.msk [vmem:[#allocation4 + $0x48] sm:$0xff] %vm10696_vm11, %v8629_v51  ;;  %v8636_v37 = vld [vmem:[#allocation2 + $0xc0] sm:$0xfe]  }
 0x128   : > { %v1561_v60 = vpop.permute.xlu1 %1560  ;;  %v3627_v22 = vrot.slane %v8636_v37, 1  ;;  %v358_v49 = vld [vmem:[#allocation3 + $0xc] sm:$0x1] }
 0x129   : > { %v2028_v23 = vpop.permute.xlu0 %2027  ;;  %1601 = vst.msk [vmem:[#allocation4 + $0x40] sm:$0xff] %vm10713_vm13, %v1561_v60  ;;  %2761 = vrot.lane.b32.xlu0 %v2729_v5, %s8904_s28 }
 0x12a   : > { %1891 = vst.msk [vmem:[#allocation4 + $0x40] sm:$0xff] %vm10714_vm6, %v1851_v16  ;;  %v1833_v16 = vsel %vm1785_vm9, %v1831_v7, %v1832_v59  ;;  %v8635_v33 = vld [vmem:[#allocation2 + $0xd4] ss:$0 sps:$4 sm:$0x11]  }
 0x12b   : > { %2068 = vst.msk [vmem:[#allocation4 + $0x40] sm:$0xff] %vm2059_vm14, %v2028_v23  ;;  %1864 = vrot.lane.b32.xlu1 %v1833_v16, %s8900_s24  ;;  %v2435_v23 = vshll.u32 %v8622_v13, 16  ;;  %v3340_v51 = vshll.u32 %v8635_v33, 16 }
 0x12c   : > { %v1563_v20 = vpop.permute.xlu1 %1562 }
 0x12d   : > { %v2461_v45 = vpop.permute.xlu0 %2460  ;;  %1602 = vst.msk [vmem:[#allocation4 + $0x48] sm:$0xff] %vm10713_vm13, %v1563_v20  ;;  %v3705_v60 = vld [vmem:[#allocation4 + $0x38] sm:$0xff]  ;;  %v2433_v20 = vshrl.u32 %v8622_v13, 16  ;;  %2939 = vrot.lane.b32.xlu0 %v8630_v27, %s8902_s26  ;;  %v2437_v3 = vrot.slane %v2435_v23, 1  ;;  %vm10715_vm13 = vcmask 294144   ;;  %v3342_v62 = vrot.slane %v3340_v51, 1 }
 0x12e   : > { %2501 = vst.msk [vmem:[#allocation4 + $0x40] sm:$0xff] %vm2492_vm15, %v2461_v45  ;;  %8327 = vmatmul.mubr.msk.bf16.gmra.mrb[12].mxu0 %vm3740_vm12, %v3705_v60  ;;  %v1025_v50 = vld [vmem:[#allocation2 + $0xc8] sm:$0x1]  ;;  %v3325_v45 = vrot.slane %v3323_v32, 1  ;;  %v361_v60 = vld [vmem:[#allocation3 + $0x18] sm:$0x1] }
 0x12f   : > { %v1026_v9 = vsel %vm8948_vm3, %v864_v52, %v1025_v50  ;;  %2041 = vrot.lane.b32.xlu1 %v8619_v12, %s8901_s25  ;;  %v2438_v15 = vor.u32 %v2437_v3, %v2433_v20  ;;  %v8642_v52 = vld [vmem:[#allocation2 + $0x90] sm:$0xff]   ;;  %v362_v63 = vsel %vm8948_vm3, 0, %v361_v60  ;;  %v412_v12 = vld [vmem:[#allocation3 + $0x14] sm:$0x1]  ;;  %v355_v27 = vld [vmem:[#allocation3] sm:$0x1] }
 0x130   : > { %v1853_v43 = vpop.permute.xlu1 %1852  ;;  %1027 = vst [vmem:[#allocation2 + $0xc8] sm:$0x1] %v1026_v9  ;;  %v3326_v55 = vor.u32 %v3325_v45, %v3321_v61  ;;  %1171 = vst.msk [vmem:[#allocation4 + $0x60] sm:$0xff] %vm10696_vm11, %v8642_v52  ;;  %v359_v9 = vsel %vm8948_vm3, 0, %v358_v49  ;;  %v413_v14 = vsel %vm8973_vm5, 0, %v412_v12  ;;  %v356_v23 = vsel %vm8948_vm3, 0, %v355_v27 }
 0x131   : > { %v2750_v10 = vpop.permute.xlu0 %2749  ;;  %1892 = vst.msk [vmem:[#allocation4 + $0x48] sm:$0xff] %vm10714_vm6, %v1853_v43  ;;  %v3335_v43 = vshll.u32 %v8634_v25, 16  ;;  %363 = vst [vmem:[#allocation3 + $0x18] sm:$0x1] %v362_v63  ;;  %v367_v3 = vld [vmem:[#allocation3 + $0x30] sm:$0x1] }
 0x132   : > { %2790 = vst.msk [vmem:[#allocation4 + $0x40] sm:$0xff] %vm2781_vm1, %v2750_v10  ;;  %360 = vst [vmem:[#allocation3 + $0xc] sm:$0x1] %v359_v9  ;;  %v371_v60 = vsel %vm8948_vm3, 0, %v370_v39  ;;  %v424_v49 = vld [vmem:[#allocation3 + $0x44] sm:$0x1] }
 0x133   : > { %v3337_v56 = vrot.slane %v3335_v43, 1  ;;  %vm10716_vm6 = vmmov %vm10715_vm13  ;;  %414 = vst [vmem:[#allocation3 + $0x14] sm:$0x1] %v413_v14  ;;  %v8648_v43 = vld [vmem:[#allocation3] sm:$0xfe]  }
 0x134   : > { %v2030_v47 = vpop.permute.xlu1 %2029  ;;  %357 = vst [vmem:[#allocation3] sm:$0x1] %v356_v23  ;;  %372 = vst [vmem:[#allocation3 + $0x3c] sm:$0x1] %v371_v60  ;;  %v379_v23 = vld [vmem:[#allocation3 + $0x60] sm:$0x1] }
 0x135   : > { %2069 = vst.msk [vmem:[#allocation4 + $0x48] sm:$0xff] %vm2059_vm14, %v2030_v47  ;;  %v2928_v1 = vpop.permute.xlu0 %2927  ;;  %v8639_v47 = vld [vmem:[#allocation2 + $0xd4] ss:$0 sps:$4 sm:$0x11]   ;;  %v3338_v16 = vor.u32 %v3337_v56, %v3333_v44 }
 0x136   : > { %2968 = vst.msk [vmem:[#allocation4 + $0x40] sm:$0xff] %vm2959_vm2, %v2928_v1  ;;  %v415_v1 = vld [vmem:[#allocation3 + $0x20] sm:$0x1]  ;;  %v3631_v13 = vrot.slane %v8639_v47, 1  ;;  %v373_v47 = vld [vmem:[#allocation3 + $0x48] sm:$0x1] }
 0x137   : > { %v8623_v7 = vld [vmem:[#allocation2 + $0xc8] ss:$0 sps:$4 sm:$0x11]   ;;  %v416_v11 = vsel %vm8973_vm5, 0, %v415_v1 }
 0x138   : > { %v2463_v19 = vpop.permute.xlu1 %2462  ;;  %v8628_v59 = vld [vmem:[#allocation2 + $0xc8] ss:$0 sps:$4 sm:$0x11]   ;;  %v2440_v26 = vshll.u32 %v8623_v7, 16  ;;  %417 = vst [vmem:[#allocation3 + $0x20] sm:$0x1] %v416_v11  ;;  %v3343_v7 = vsel %vm10695_vm10, %v3338_v16, %v3342_v62 }
 0x139   : > { %2502 = vst.msk [vmem:[#allocation4 + $0x48] sm:$0xff] %vm2492_vm15, %v2463_v19  ;;  %v3361_v21 = vpop.permute.xlu0 %3360  ;;  %v8633_v28 = vld [vmem:[#allocation2 + $0xc8] ss:$0 sps:$4 sm:$0x11]   ;;  %v2731_v34 = vrot.slane %v8628_v59, 1 }
 0x13a   : > { %3401 = vst.msk [vmem:[#allocation4 + $0x40] sm:$0xff] %vm3392_vm4, %v3361_v21  ;;  %v2442_v35 = vrot.slane %v2440_v26, 1  ;;  %v3328_v42 = vshll.u32 %v8633_v28, 16  ;;  %v8637_v54 = vld [vmem:[#allocation2 + $0xc8] ss:$0 sps:$4 sm:$0x11]  }
 0x13b   : > { %v2732_v57 = vsel %vm1785_vm9, %v2730_v40, %v2731_v34  ;;  %v3628_v58 = vrot.slane %v8637_v54, 1  ;;  %v409_v19 = vld [vmem:[#allocation3 + $0x8] sm:$0x1]  ;;  %v364_v59 = vld [vmem:[#allocation3 + $0x24] sm:$0x1]  ;;  %v368_v26 = vsel %vm8948_vm3, 0, %v367_v3  ;;  %v3632_v40 = vsel %vm1785_vm9, %v3630_v4, %v3631_v13 }
 0x13c   : > { %v2752_v29 = vpop.permute.xlu1 %2751  ;;  %v2443_v46 = vsel %vm10695_vm10, %v2438_v15, %v2442_v35  ;;  %v3330_v48 = vrot.slane %v3328_v42, 1  ;;  %v410_v24 = vsel %vm8973_vm5, 0, %v409_v19  ;;  %v365_v28 = vsel %vm8948_vm3, 0, %v364_v59  ;;  %v418_v15 = vld [vmem:[#allocation3 + $0x2c] sm:$0x1]  ;;  %v8646_v42 = vld [vmem:[#allocation3] sm:$0xff]  }
 0x13d   : > { %2791 = vst.msk [vmem:[#allocation4 + $0x48] sm:$0xff] %vm2781_vm1, %v2752_v29  ;;  %v3650_v41 = vpop.permute.xlu0 %3649  ;;  %2474 = vrot.lane.b32.xlu1 %v2443_v46, %s8906_s30  ;;  %v3629_v2 = vsel %vm1785_vm9, %v3627_v22, %v3628_v58  ;;  %411 = vst [vmem:[#allocation3 + $0x8] sm:$0x1] %v410_v24  ;;  %v421_v29 = vld [vmem:[#allocation3 + $0x38] sm:$0x1]  ;;  %v419_v32 = vsel %vm8973_vm5, 0, %v418_v15 }
 0x13e   : > { %3690 = vst.msk [vmem:[#allocation4 + $0x40] sm:$0xff] %vm10715_vm13, %v3650_v41  ;;  %v3331_v10 = vsel %vm10695_vm10, %v3326_v55, %v3330_v48  ;;  %vm10717_vm13 = vcmask 64544   ;;  %369 = vst [vmem:[#allocation3 + $0x30] sm:$0x1] %v368_v26  ;;  %v422_v61 = vsel %vm8973_vm5, 0, %v421_v29  ;;  %v4836_v37 = vshrl.u32 %v8646_v42, 16 }
 0x13f   : > { %3372 = vrot.lane.b32.xlu0 %v3331_v10, %s8907_s6  ;;  %366 = vst [vmem:[#allocation3 + $0x24] sm:$0x1] %v365_v28  ;;  %423 = vst [vmem:[#allocation3 + $0x38] sm:$0x1] %v422_v61  ;;  %v4838_v41 = vshll.u32 %v8646_v42, 16  ;;  %v5267_v55 = vrot.slane %v8648_v43, 1 }
 0x140   : > { %v2930_v8 = vpop.permute.xlu1 %2929  ;;  %420 = vst [vmem:[#allocation3 + $0x2c] sm:$0x1] %v419_v32  ;;  %v374_v10 = vsel %vm8948_vm3, 0, %v373_v47  ;;  %v427_v16 = vld [vmem:[#allocation3 + $0x50] sm:$0x1]  ;;  %v425_v4 = vsel %vm8973_vm5, 0, %v424_v49 }
 0x141   : > { %2969 = vst.msk [vmem:[#allocation4 + $0x48] sm:$0xff] %vm2959_vm2, %v2930_v8  ;;  %2763 = vrot.lane.b32.xlu1 %v2732_v57, %s8904_s28  ;;  %v3652_v53 = vpop.permute.xlu0 %3651  ;;  %v4840_v54 = vrot.slane %v4838_v41, 1  ;;  %375 = vst [vmem:[#allocation3 + $0x48] sm:$0x1] %v374_v10  ;;  %v428_v63 = vsel %vm8973_vm5, 0, %v427_v16  ;;  %v380_v24 = vsel %vm8948_vm3, 0, %v379_v23 }
 0x142   : > { %429 = vst [vmem:[#allocation3 + $0x50] sm:$0x1] %v428_v63  ;;  %426 = vst [vmem:[#allocation3 + $0x44] sm:$0x1] %v425_v4  ;;  %v433_v28 = vld [vmem:[#allocation3 + $0x68] sm:$0x1] }
 0x143   : > { %3661 = vrot.lane.b32.xlu0 %v3629_v2, %s8905_s29  ;;  %v4841_v52 = vor.u32 %v4840_v54, %v4836_v37  ;;  %381 = vst [vmem:[#allocation3 + $0x60] sm:$0x1] %v380_v24  ;;  %v434_v15 = vsel %vm8973_vm5, 0, %v433_v28  ;;  %v4410_v63 = vld [vmem:[#allocation3 + $0x18] sm:$0xf] }
 0x144   : > { %v3363_v5 = vpop.permute.xlu1 %3362  ;;  %v8647_v45 = vld [vmem:[#allocation3 + $0x8] ss:$0 sps:$4 sm:$0x11]   ;;  %435 = vst [vmem:[#allocation3 + $0x68] sm:$0x1] %v434_v15 }
 0x145   : > { %v3706_v50 = vld [vmem:[#allocation4 + $0x40] sm:$0xff]  ;;  %3402 = vst.msk [vmem:[#allocation4 + $0x48] sm:$0xff] %vm3392_vm4, %v3363_v5  ;;  %2941 = vrot.lane.b32.xlu1 %v8631_v38, %s8902_s26  ;;  %v1855_v20 = vpop.permute.xlu0 %1854  ;;  %v8649_v46 = vld [vmem:[#allocation3 + $0x8] ss:$0 sps:$4 sm:$0x11]   ;;  %v4843_v48 = vshll.u32 %v8647_v45, 16 }
 0x146   : > { %8330 = vmatprep.mubr.msk.bf16.mxu0 %vm3740_vm12, %v3706_v50  ;;  %3691 = vst.msk [vmem:[#allocation4 + $0x48] sm:$0xff] %vm10716_vm6, %v3652_v53  ;;  %vm10718_vm6 = vcmask 97344   ;;  %v5268_v56 = vrot.slane %v8649_v46, 1 }
 0x147   : > { %v4845_v8 = vrot.slane %v4843_v48, 1 }
 0x148   : > { %v1565_v25 = vpop.permute.xlu1 %1564  ;;  %v5269_v58 = vsel %vm1785_vm9, %v5267_v55, %v5268_v56 }
 0x149   : > { %1603 = vst.msk [vmem:[#allocation4 + $0x50] sm:$0xff] %vm10717_vm13, %v1565_v25  ;;  %3374 = vrot.lane.b32.xlu1 %v3343_v7, %s8907_s6  ;;  %v2032_v21 = vpop.permute.xlu0 %2031  ;;  %v4846_v30 = vsel %vm10695_vm10, %v4841_v52, %v4845_v8  ;;  %vm10722_vm10 = vcmask 97344  }
 0x14a   : > { %1893 = vst.msk [vmem:[#allocation4 + $0x50] sm:$0xff] %vm10718_vm6, %v1855_v20  ;;  %5027 = vrot.lane.b32.xlu0 %v4846_v30, %s8903_s27 }
 0x14b   : > { %2070 = vst.msk [vmem:[#allocation4 + $0x50] sm:$0xff] %vm2059_vm14, %v2032_v21  ;;  %v376_v21 = vld [vmem:[#allocation3 + $0x54] sm:$0x1] }
 0x14c   : > { %v1567_v33 = vpop.permute.xlu1 %1566  ;;  %v377_v26 = vsel %vm8948_vm3, 0, %v376_v21 }
 0x14d   : > { %1604 = vst.msk [vmem:[#allocation4 + $0x58] sm:$0xff] %vm10717_vm13, %v1567_v33  ;;  %v3707_v35 = vld [vmem:[#allocation4 + $0x48] sm:$0xff]  ;;  %3663 = vrot.lane.b32.xlu1 %v3632_v40, %s8905_s29  ;;  %v2465_v34 = vpop.permute.xlu0 %2464  ;;  %vm10719_vm13 = vcmask 294144   ;;  %378 = vst [vmem:[#allocation3 + $0x54] sm:$0x1] %v377_v26 }
 0x14e   : > { %8331 = vmatmul.mubr.msk.bf16.gmra.mrb[16].mxu0 %vm3740_vm12, %v3707_v35  ;;  %2503 = vst.msk [vmem:[#allocation4 + $0x50] sm:$0xff] %vm2492_vm15, %v2465_v34  ;;  %5315 = vrot.lane.b32.xlu0 %v5269_v58, %s8900_s24  ;;  %v430_v40 = vld [vmem:[#allocation3 + $0x5c] sm:$0x1]  ;;  %v9770_v34 = vld [vmem:[%s10688_s3] ss:$0 sm:$0xff] }
 0x14f   : > { %v431_v61 = vsel %vm8973_vm5, 0, %v430_v40 }
 0x150   : > { %v1857_v44 = vpop.permute.xlu1 %1856  ;;  %432 = vst [vmem:[#allocation3 + $0x5c] sm:$0x1] %v431_v61 }
 0x151   : > { %1894 = vst.msk [vmem:[#allocation4 + $0x58] sm:$0xff] %vm10718_vm6, %v1857_v44  ;;  %v2754_v51 = vpop.permute.xlu0 %2753  ;;  %vm10720_vm6 = vmmov %vm10719_vm13 }
 0x152   : > { %2792 = vst.msk [vmem:[#allocation4 + $0x50] sm:$0xff] %vm2781_vm1, %v2754_v51 }
 0x154   : > { %v2034_v22 = vpop.permute.xlu1 %2033 }
 0x155   : > { %2071 = vst.msk [vmem:[#allocation4 + $0x58] sm:$0xff] %vm2059_vm14, %v2034_v22  ;;  %v2932_v57 = vpop.permute.xlu0 %2931 }
 0x156   : > { %2970 = vst.msk [vmem:[#allocation4 + $0x50] sm:$0xff] %vm2959_vm2, %v2932_v57 }
 0x158   : > { %v2467_v18 = vpop.permute.xlu1 %2466 }
 0x159   : > { %2504 = vst.msk [vmem:[#allocation4 + $0x58] sm:$0xff] %vm2492_vm15, %v2467_v18 }
 0x15a   : > { %v3365_v17 = vpop.permute.xlu0 %3364 }
 0x15b   : > { %3403 = vst.msk [vmem:[#allocation4 + $0x50] sm:$0xff] %vm3392_vm4, %v3365_v17 }
 0x15c   : > { %v2756_v38 = vpop.permute.xlu1 %2755 }
 0x15d   : > { %2793 = vst.msk [vmem:[#allocation4 + $0x58] sm:$0xff] %vm2781_vm1, %v2756_v38 }
 0x15e   : > { %v3654_v2 = vpop.permute.xlu0 %3653 }
 0x15f   : > { %3692 = vst.msk [vmem:[#allocation4 + $0x50] sm:$0xff] %vm10719_vm13, %v3654_v2  ;;  %vm10721_vm13 = vcmask 64544  }
 0x160   : > { %v2934_v53 = vpop.permute.xlu1 %2933  ;;  %vm10723_vm11 = vmmov %vm10721_vm13 }
 0x161   : > { %2971 = vst.msk [vmem:[#allocation4 + $0x58] sm:$0xff] %vm2959_vm2, %v2934_v53 }
 0x162   : > { %v3656_v62 = vpop.permute.xlu0 %3655 }
 0x164   : > { %v3367_v1 = vpop.permute.xlu1 %3366 }
 0x165   : > { %3404 = vst.msk [vmem:[#allocation4 + $0x58] sm:$0xff] %vm3392_vm4, %v3367_v1 }
 0x166   : > { %3693 = vst.msk [vmem:[#allocation4 + $0x58] sm:$0xff] %vm10720_vm6, %v3656_v62  ;;  %v1859_v5 = vpop.permute.xlu0 %1858  ;;  %v3708_v50 = vld [vmem:[#allocation4 + $0x50] sm:$0xff]  ;;  %vm10724_vm6 = vmmov %vm10722_vm10 }
 0x167   : > { %8334 = vmatprep.mubr.msk.bf16.mxu0 %vm3740_vm12, %v3708_v50  ;;  %v4403_v50 = vld [vmem:[#allocation3 + $0xc] sm:$0xf] }
 0x168   : > { %v1569_v9 = vpop.permute.xlu1 %1568 }
 0x169   : > { %1605 = vst.msk [vmem:[#allocation4 + $0x60] sm:$0xff] %vm10721_vm13, %v1569_v9 }
 0x16a   : > { %1895 = vst.msk [vmem:[#allocation4 + $0x60] sm:$0xff] %vm10722_vm10, %v1859_v5  ;;  %v2036_v11 = vpop.permute.xlu0 %2035  ;;  %vm10725_vm10 = vcmask 294144  }
 0x16b   : > { %2072 = vst.msk [vmem:[#allocation4 + $0x60] sm:$0xff] %vm2059_vm14, %v2036_v11 }
 0x16c   : > { %v1571_v12 = vpop.permute.xlu1 %1570 }
 0x16d   : > { %1606 = vst.msk [vmem:[#allocation4 + $0x68] sm:$0xff] %vm10723_vm11, %v1571_v12  ;;  %v3709_v13 = vld [vmem:[#allocation4 + $0x58] sm:$0xff]  ;;  %vm10726_vm11 = vmmov %vm10725_vm10  ;;  %v385_v12 = vld [vmem:[#allocation3 + $0x78] sm:$0x1] }
 0x16e   : > { %8335 = vmatmul.mubr.msk.bf16.gmra.mrb[20].mxu0 %vm3740_vm12, %v3709_v13  ;;  %v2469_v27 = vpop.permute.xlu0 %2468  ;;  %v386_v23 = vsel %vm8948_vm3, 0, %v385_v12 }
 0x16f   : > { %2505 = vst.msk [vmem:[#allocation4 + $0x60] sm:$0xff] %vm2492_vm15, %v2469_v27  ;;  %v4414_v27 = vld [vmem:[#allocation3 + $0x20] sm:$0x1]  ;;  %387 = vst [vmem:[#allocation3 + $0x78] sm:$0x1] %v386_v23 }
 0x170   : > { %v1861_v14 = vpop.permute.xlu1 %1860 }
 0x171   : > { %1896 = vst.msk [vmem:[#allocation4 + $0x68] sm:$0xff] %vm10724_vm6, %v1861_v14 }
 0x172   : > { %v2758_v19 = vpop.permute.xlu0 %2757 }
 0x173   : > { %2794 = vst.msk [vmem:[#allocation4 + $0x60] sm:$0xff] %vm2781_vm1, %v2758_v19 }
 0x174   : > { %v2038_v20 = vpop.permute.xlu1 %2037 }
 0x175   : > { %2073 = vst.msk [vmem:[#allocation4 + $0x68] sm:$0xff] %vm2059_vm14, %v2038_v20 }
 0x176   : > { %v2936_v7 = vpop.permute.xlu0 %2935 }
 0x177   : > { %2972 = vst.msk [vmem:[#allocation4 + $0x60] sm:$0xff] %vm2959_vm2, %v2936_v7 }
 0x17c   : > { %v2471_v25 = vpop.permute.xlu1 %2470 }
 0x17d   : > { %2506 = vst.msk [vmem:[#allocation4 + $0x68] sm:$0xff] %vm2492_vm15, %v2471_v25 }
 0x17e   : > { %v3369_v3 = vpop.permute.xlu0 %3368 }
 0x17f   : > { %3405 = vst.msk [vmem:[#allocation4 + $0x60] sm:$0xff] %vm3392_vm4, %v3369_v3 }
 0x180   : > { %v2760_v59 = vpop.permute.xlu1 %2759 }
 0x181   : > { %2795 = vst.msk [vmem:[#allocation4 + $0x68] sm:$0xff] %vm2781_vm1, %v2760_v59  ;;  %v4407_v59 = vld [vmem:[#allocation3 + $0x14] sm:$0x1] }
 0x182   : > { %v3658_v29 = vpop.permute.xlu0 %3657 }
 0x183   : > { %3694 = vst.msk [vmem:[#allocation4 + $0x60] sm:$0xff] %vm10725_vm10, %v3658_v29  ;;  %vm10727_vm10 = vmmov %vm10721_vm13 }
 0x184   : > { %v2938_v32 = vpop.permute.xlu1 %2937 }
 0x185   : > { %2973 = vst.msk [vmem:[#allocation4 + $0x68] sm:$0xff] %vm2959_vm2, %v2938_v32 }
 0x186   : > { %v3660_v33 = vpop.permute.xlu0 %3659 }
 0x188   : > { %v3371_v35 = vpop.permute.xlu1 %3370 }
 0x189   : > { %3406 = vst.msk [vmem:[#allocation4 + $0x68] sm:$0xff] %vm3392_vm4, %v3371_v35 }
 0x18a   : > { %3695 = vst.msk [vmem:[#allocation4 + $0x68] sm:$0xff] %vm10726_vm11, %v3660_v33  ;;  %v3710_v43 = vld [vmem:[#allocation4 + $0x60] sm:$0xff]  ;;  %vm10728_vm11 = vmmov %vm10724_vm6 }
 0x18b   : > { %8338 = vmatprep.mubr.msk.bf16.mxu0 %vm3740_vm12, %v3710_v43 }
 0x18c   : > { %v1573_v41 = vpop.permute.xlu1 %1572 }
 0x18d   : > { %1607 = vst.msk [vmem:[#allocation4 + $0x70] sm:$0xff] %vm10721_vm13, %v1573_v41  ;;  %vm10729_vm13 = vcmask 294144  }
 0x18f   : > { %v1863_v42 = vpop.permute.xlu0 %1862 }
 0x190   : > { %1897 = vst.msk [vmem:[#allocation4 + $0x70] sm:$0xff] %vm10724_vm6, %v1863_v42  ;;  %vm10730_vm6 = vcmask 31744  }
 0x191   : > { %v3711_v10 = vld [vmem:[#allocation4 + $0x68] sm:$0xff] }
 0x192   : > { %8339 = vmatmul.mubr.msk.bf16.gmra.mrb[24].mxu0 %vm3740_vm12, %v3711_v10 }
 0x193   : > { %v2040_v52 = vpop.permute.xlu0 %2039 }
 0x194   : > { %2074 = vst.msk [vmem:[#allocation4 + $0x70] sm:$0xff] %vm2059_vm14, %v2040_v52 }
 0x195   : > { %v8316_v45 = vpop.f32.mrb[0].mxu0 }
 0x196   : > { %v3836_v44 = vadd.f32 %v8316_v45, %v9770_v34  ;;  %v3827_v37 = vpop.f32.mrb[1].mxu0  ;;  %v1575_v57 = vpop.permute.xlu1 %1574 }
 0x197   : > { %v3828_v46 = vadd.f32 %v9770_v34, %v3827_v37  ;;  %v8317_v48 = vpop.f32.mrb[2].mxu0  ;;  %1608 = vst.msk [vmem:[#allocation4 + $0x78] sm:$0xff] %vm10727_vm10, %v1575_v57  ;;  %v2473_v38 = vpop.permute.xlu0 %2472  ;;  %vm10731_vm10 = vmmov %vm10730_vm6 }
 0x198   : > { %v3956_v51 = vmax.f32 %v3836_v44, 0.0  ;;  %v3839_v54 = vadd.f32 %v8317_v48, %v9770_v34  ;;  %v3830_v8 = vpop.f32.mrb[3].mxu0  ;;  %2507 = vst.msk [vmem:[#allocation4 + $0x70] sm:$0xff] %vm2492_vm15, %v2473_v38 }
 0x199   : > { %v3954_v55 = vmax.f32 %v3828_v46, 0.0  ;;  %v3831_v56 = vadd.f32 %v9770_v34, %v3830_v8 }
 0x19a   : > { %v8240_v22 = vpack.c.bf16 %v3956_v51, %v3956_v51  ;;  %v3957_v30 = vmax.f32 %v3839_v54, 0.0 }
 0x19b   : > { %v8238_v58 = vpack.c.bf16 %v3954_v55, %v3954_v55  ;;  %v3955_v47 = vmax.f32 %v3831_v56, 0.0  ;;  %v2762_v13 = vpop.permute.xlu0 %2761 }
 0x19c   : > { %v4100_v18 = vshrl.u32 %v8240_v22, 16  ;;  %v8241_v17 = vpack.c.bf16 %v3957_v30, %v3957_v30  ;;  %v4103_v60 = vshll.u32 %v8240_v22, 16  ;;  %2796 = vst.msk [vmem:[#allocation4 + $0x70] sm:$0xff] %vm2781_vm1, %v2762_v13 }
 0x19d   : > { %v4083_v2 = vshrl.u32 %v8238_v58, 16  ;;  %v8239_v53 = vpack.c.bf16 %v3955_v47, %v3955_v47  ;;  %v1865_v62 = vpop.permute.xlu1 %1864  ;;  %v4086_v1 = vshll.u32 %v8238_v58, 16 }
 0x19e   : > { %v4102_v39 = vrot.slane %v4100_v18, 7  ;;  %v4108_v16 = vshrl.u32 %v8241_v17, 16  ;;  %1898 = vst.msk [vmem:[#allocation4 + $0x78] sm:$0xff] %vm10728_vm11, %v1865_v62  ;;  %v4111_v11 = vshll.u32 %v8241_v17, 16  ;;  %vm10732_vm11 = vmmov %vm10729_vm13 }
 0x19f   : > { %v4085_v49 = vrot.slane %v4083_v2, 7  ;;  %v4091_v4 = vshrl.u32 %v8239_v53, 16  ;;  %v4094_v20 = vshll.u32 %v8239_v53, 16  ;;  %v2940_v35 = vpop.permute.xlu0 %2939 }
 0x1a0   : > { %v4105_v5 = vor.u32 %v4103_v60, %v4102_v39  ;;  %v4110_v9 = vrot.slane %v4108_v16, 7  ;;  %v4106_v24 = vrot.slane %v4102_v39, 4  ;;  %2974 = vst.msk [vmem:[#allocation4 + $0x70] sm:$0xff] %vm2959_vm2, %v2940_v35 }
 0x1a1   : > { %v4088_v14 = vor.u32 %v4086_v1, %v4085_v49  ;;  %v4093_v19 = vrot.slane %v4091_v4, 7  ;;  %v4089_v21 = vrot.slane %v4085_v49, 4  ;;  %v2042_v33 = vpop.permute.xlu1 %2041 }
 0x1a2   : > { %v4411_v7 = vsel %vm9007_vm8, %v4105_v5, %v4410_v63  ;;  %v4113_v25 = vor.u32 %v4111_v11, %v4110_v9  ;;  %v4115_v3 = vrot.slane %v4110_v9, 4  ;;  %2075 = vst.msk [vmem:[#allocation4 + $0x78] sm:$0xff] %vm2059_vm14, %v2042_v33 }
 0x1a3   : > { %4412 = vst [vmem:[#allocation3 + $0x18] sm:$0xf] %v4411_v7  ;;  %v4404_v26 = vsel %vm9007_vm8, %v4088_v14, %v4403_v50  ;;  %v4096_v28 = vor.u32 %v4094_v20, %v4093_v19  ;;  %v4098_v29 = vrot.slane %v4093_v19, 4  ;;  %v4424_v19 = vld [vmem:[#allocation3 + $0x30] sm:$0xf] }
 0x1a4   : > { %4405 = vst [vmem:[#allocation3 + $0xc] sm:$0xf] %v4404_v26  ;;  %v4114_v15 = vsel %vm8999_vm7, %v4106_v24, %v4113_v25  ;;  %v4415_v40 = vsel %vm8948_vm3, %v4115_v3, %v4414_v27 }
 0x1a5   : > { %4413 = vst.msk [vmem:[#allocation3 + $0x1c] sm:$0xf] %vm226_vm0, %v4114_v15  ;;  %4416 = vst [vmem:[#allocation3 + $0x20] sm:$0x1] %v4415_v40  ;;  %v4097_v61 = vsel %vm8999_vm7, %v4089_v21, %v4096_v28  ;;  %v4408_v32 = vsel %vm8948_vm3, %v4098_v29, %v4407_v59  ;;  %v4417_v59 = vld [vmem:[#allocation3 + $0x24] sm:$0xf] }
 0x1a6   : > { %4406 = vst.msk [vmem:[#allocation3 + $0x10] sm:$0xf] %vm226_vm0, %v4097_v61  ;;  %4409 = vst [vmem:[#allocation3 + $0x14] sm:$0x1] %v4408_v32  ;;  %v4428_v40 = vld [vmem:[#allocation3 + $0x38] sm:$0x1] }
 0x1ac   : > { %v8650_v42 = vld [vmem:[#allocation3 + $0x18] sm:$0xff]   ;;  %v8653_v44 = vld [vmem:[#allocation3 + $0x20] ss:$0 sps:$4 sm:$0x11]  }
 0x1ad   : > { %v8651_v43 = vld [vmem:[#allocation3 + $0x18] sm:$0xff]   ;;  %6388 = vrot.lane.b32.xlu0 %v8650_v42, %s8902_s26  ;;  %v6167_v48 = vrot.slane %v8653_v44, 1  ;;  %v8654_v54 = vld [vmem:[#allocation3 + $0xc] sm:$0xff]   ;;  %v8656_v22 = vld [vmem:[#allocation3 + $0x20] ss:$0 sps:$4 sm:$0x11]  }
 0x1ae   : > { %v8652_v45 = vld [vmem:[#allocation3 + $0x18] sm:$0xfe]   ;;  %5493 = vrot.lane.b32.xlu1 %v8651_v43, %s8901_s25  ;;  %v7061_v53 = vrot.slane %v8656_v22, 1  ;;  %v8657_v39 = vld [vmem:[#allocation3 + $0xc] sm:$0xfe]  }
 0x1af   : > { %v2475_v37 = vpop.permute.xlu1 %2474  ;;  %v6166_v46 = vrot.slane %v8652_v45, 1  ;;  %v8655_v56 = vld [vmem:[#allocation3 + $0x18] sm:$0xfe]   ;;  %v8658_v63 = vld [vmem:[#allocation3 + $0x14] ss:$0 sps:$4 sm:$0x11]  }
 0x1b0   : > { %v8320_v41 = vpop.f32.mrb[4].mxu0  ;;  %2508 = vst.msk [vmem:[#allocation4 + $0x78] sm:$0xff] %vm2492_vm15, %v2475_v37  ;;  %v7060_v2 = vrot.slane %v8655_v56, 1  ;;  %v9816_v60 = vld [vmem:[#allocation3 + $0x18] sm:$0xff]   ;;  %v5270_v5 = vrot.slane %v8657_v39, 1  ;;  %v5271_v13 = vrot.slane %v8658_v63, 1 }
 0x1b1   : > { %v3852_v51 = vadd.f32 %v8320_v41, %v9770_v34  ;;  %v3843_v8 = vpop.f32.mrb[5].mxu0  ;;  %v3373_v30 = vpop.permute.xlu0 %3372  ;;  %v6168_v57 = vsel %vm1785_vm9, %v6166_v46, %v6167_v48  ;;  %5491 = vrot.lane.b32.xlu0 %v8654_v54, %s8901_s25  ;;  %v8659_v14 = vld [vmem:[#allocation3 + $0x18] sm:$0xfe]   ;;  %v8660_v7 = vld [vmem:[#allocation3 + $0x20] ss:$0 sps:$4 sm:$0x11]  }
 0x1b2   : > { %v3844_v52 = vadd.f32 %v9770_v34, %v3843_v8  ;;  %v8321_v55 = vpop.f32.mrb[6].mxu0  ;;  %3407 = vst.msk [vmem:[#allocation4 + $0x70] sm:$0xff] %vm3392_vm4, %v3373_v30  ;;  %6213 = vrot.lane.b32.xlu1 %v6168_v57, %s8904_s28  ;;  %v7062_v4 = vsel %vm1785_vm9, %v7060_v2, %v7061_v53  ;;  %v5744_v25 = vshrl.u32 %v9816_v60, 16  ;;  %v5272_v28 = vsel %vm1785_vm9, %v5270_v5, %v5271_v13  ;;  %v9825_v29 = vld [vmem:[#allocation3 + $0x18] sm:$0xff]   ;;  %v4421_v45 = vld [vmem:[#allocation3 + $0x2c] sm:$0x1] }
 0x1b3   : > { %v3960_v58 = vmax.f32 %v3852_v51, 0.0  ;;  %v3855_v47 = vadd.f32 %v8321_v55, %v9770_v34  ;;  %v3846_v10 = vpop.f32.mrb[7].mxu0  ;;  %v2764_v18 = vpop.permute.xlu1 %2763  ;;  %v5273_v33 = vrot.slane %v8659_v14, 1  ;;  %v5274_v44 = vrot.slane %v8660_v7, 1  ;;  %v8667_v37 = vld [vmem:[#allocation3 + $0x18] sm:$0xff]   ;;  %v8737_v41 = vld [vmem:[#allocation3] sm:$0xff]  }
 0x1b4   : > { %v3958_v17 = vmax.f32 %v3844_v52, 0.0  ;;  %v3847_v38 = vadd.f32 %v9770_v34, %v3846_v10  ;;  %2797 = vst.msk [vmem:[#allocation4 + $0x78] sm:$0xff] %vm2781_vm1, %v2764_v18  ;;  %v8662_v8 = vld [vmem:[#allocation3 + $0x20] ss:$0 sps:$4 sm:$0x11]   ;;  %v5746_v52 = vshll.u32 %v9816_v60, 16 }
 0x1b5   : > { %v8244_v16 = vpack.c.bf16 %v3960_v58, %v3960_v58  ;;  %v3961_v62 = vmax.f32 %v3855_v47, 0.0  ;;  %v3662_v50 = vpop.permute.xlu0 %3661  ;;  %7108 = vrot.lane.b32.xlu0 %v7062_v4, %s8905_s29  ;;  %v5275_v30 = vsel %vm1785_vm9, %v5273_v33, %v5274_v44  ;;  %v8669_v57 = vld [vmem:[#allocation3 + $0xc] sm:$0xff]   ;;  %4643 = vst.msk [vmem:[#allocation4] sm:$0xff] %vm10730_vm6, %v8737_v41  ;;  %v8761_v58 = vld [vmem:[#allocation3 + $0x18] sm:$0xff]   ;;  %v5751_v60 = vshll.u32 %v8662_v8, 16 }
 0x1b6   : > { %v8242_v49 = vpack.c.bf16 %v3958_v17, %v3958_v17  ;;  %v3959_v1 = vmax.f32 %v3847_v38, 0.0  ;;  %3696 = vst.msk [vmem:[#allocation4 + $0x70] sm:$0xff] %vm10729_vm13, %v3662_v50  ;;  %5317 = vrot.lane.b32.xlu1 %v5272_v28, %s8900_s24  ;;  %v5748_v17 = vrot.slane %v5746_v52, 1  ;;  %v8663_v38 = vld [vmem:[#allocation3 + $0xc] sm:$0xfe]   ;;  %v6631_v14 = vshll.u32 %v8667_v37, 16 }
 0x1b7   : > { %v4134_v9 = vshrl.u32 %v8244_v16, 16  ;;  %v4137_v11 = vshll.u32 %v8244_v16, 16  ;;  %v8245_v12 = vpack.c.bf16 %v3961_v62, %v3961_v62  ;;  %v2942_v27 = vpop.permute.xlu1 %2941  ;;  %v8664_v16 = vld [vmem:[#allocation3 + $0x14] ss:$0 sps:$4 sm:$0x11]   ;;  %v4860_v62 = vshrl.u32 %v9825_v29, 16 }
 0x1b8   : > { %v4117_v20 = vshrl.u32 %v8242_v49, 16  ;;  %v4120_v23 = vshll.u32 %v8242_v49, 16  ;;  %v8243_v24 = vpack.c.bf16 %v3959_v1, %v3959_v1  ;;  %2975 = vst.msk [vmem:[#allocation4 + $0x78] sm:$0xff] %vm2959_vm2, %v2942_v27  ;;  %v5749_v4 = vor.u32 %v5748_v17, %v5744_v25  ;;  %v8666_v13 = vld [vmem:[#allocation3 + $0x20] ss:$0 sps:$4 sm:$0x11]  }
 0x1b9   : > { %v4136_v3 = vrot.slane %v4134_v9, 7  ;;  %v4142_v21 = vshrl.u32 %v8245_v12, 16  ;;  %v4145_v26 = vshll.u32 %v8245_v12, 16  ;;  %5319 = vrot.lane.b32.xlu0 %v5275_v30, %s8900_s24  ;;  %4645 = vst.msk [vmem:[#allocation4 + $0x10] sm:$0xff] %vm10731_vm10, %v8761_v58  ;;  %v6163_v5 = vrot.slane %v8663_v38, 1 }
 0x1ba   : > { %v4119_v15 = vrot.slane %v4117_v20, 7  ;;  %v4125_v61 = vshrl.u32 %v8243_v24, 16  ;;  %v4128_v32 = vshll.u32 %v8243_v24, 16  ;;  %v5753_v50 = vrot.slane %v5751_v60, 1  ;;  %v8671_v24 = vld [vmem:[#allocation3 + $0xc] sm:$0xff]  }
 0x1bb   : > { %v4139_v35 = vor.u32 %v4137_v11, %v4136_v3  ;;  %v4140_v42 = vrot.slane %v4136_v3, 4  ;;  %v4144_v43 = vrot.slane %v4142_v21, 7  ;;  %v3375_v46 = vpop.permute.xlu1 %3374  ;;  %v6164_v9 = vrot.slane %v8664_v16, 1  ;;  %v8668_v25 = vld [vmem:[#allocation3 + $0x20] ss:$0 sps:$4 sm:$0x11]  }
 0x1bc   : > { %v4122_v48 = vor.u32 %v4120_v23, %v4119_v15  ;;  %v4123_v51 = vrot.slane %v4119_v15, 4  ;;  %v4127_v54 = vrot.slane %v4125_v61, 7  ;;  %3408 = vst.msk [vmem:[#allocation4 + $0x78] sm:$0xff] %vm3392_vm4, %v3375_v46  ;;  %v4862_v11 = vshll.u32 %v9825_v29, 16  ;;  %v5028_v44 = vpop.permute.xlu0 %5027 }
 0x1bd   : > { %v4425_v55 = vsel %vm9007_vm8, %v4139_v35, %v4424_v19  ;;  %v4147_v56 = vor.u32 %v4145_v26, %v4144_v43  ;;  %v4149_v22 = vrot.slane %v4144_v43, 4  ;;  %v3712_v2 = vld [vmem:[#allocation4 + $0x70] sm:$0xff]  ;;  %v6629_v12 = vshrl.u32 %v8667_v37, 16  ;;  %v8670_v15 = vld [vmem:[#allocation3 + $0x14] ss:$0 sps:$4 sm:$0x11]  }
 0x1be   : > { %4426 = vst [vmem:[#allocation3 + $0x30] sm:$0xf] %v4425_v55  ;;  %v4418_v47 = vsel %vm9007_vm8, %v4122_v48, %v4417_v59  ;;  %v4130_v10 = vor.u32 %v4128_v32, %v4127_v54  ;;  %v4132_v18 = vrot.slane %v4127_v54, 4  ;;  %8342 = vmatprep.mubr.msk.bf16.mxu0 %vm3740_vm12, %v3712_v2  ;;  %vm10733_vm13 = vsmask.f32 7424 }
 0x1bf   : > { %4419 = vst [vmem:[#allocation3 + $0x24] sm:$0xf] %v4418_v47  ;;  %v4148_v53 = vsel %vm8999_vm7, %v4140_v42, %v4147_v56  ;;  %v4429_v39 = vsel %vm8948_vm3, %v4149_v22, %v4428_v40  ;;  %v3664_v63 = vpop.permute.xlu1 %3663  ;;  %v5754_v27 = vsel %vm10733_vm13, %v5749_v4, %v5753_v50  ;;  %v6165_v19 = vsel %vm1785_vm9, %v6163_v5, %v6164_v9  ;;  %vm10734_vm6 = vmmov %vm10733_vm13  ;;  %v8672_v43 = vld [vmem:[#allocation3 + $0x14] ss:$0 sps:$4 sm:$0x11]  }
 0x1c0   : > { %4427 = vst.msk [vmem:[#allocation3 + $0x34] sm:$0xf] %vm226_vm0, %v4148_v53  ;;  %4430 = vst [vmem:[#allocation3 + $0x38] sm:$0x1] %v4429_v39  ;;  %v4131_v49 = vsel %vm8999_vm7, %v4123_v51, %v4130_v10  ;;  %v4422_v1 = vsel %vm8948_vm3, %v4132_v18, %v4421_v45  ;;  %v4864_v20 = vrot.slane %v4862_v11, 1  ;;  %v4848_v23 = vshrl.u32 %v8669_v57, 16  ;;  %5925 = vrot.lane.b32.xlu1 %v5754_v27, %s8906_s30  ;;  %v5316_v56 = vpop.permute.xlu0 %5315 }
 0x1c1   : > { %3697 = vst.msk [vmem:[#allocation4 + $0x78] sm:$0xff] %vm10732_vm11, %v3664_v63  ;;  %4423 = vst [vmem:[#allocation3 + $0x2c] sm:$0x1] %v4422_v1  ;;  %6211 = vrot.lane.b32.xlu0 %v6165_v19, %s8904_s28  ;;  %v4867_v7 = vshll.u32 %v8666_v13, 16  ;;  %v6633_v3 = vrot.slane %v6631_v14, 1  ;;  %v4850_v59 = vshll.u32 %v8669_v57, 16 }
 0x1c2   : > { %4420 = vst.msk [vmem:[#allocation3 + $0x28] sm:$0xf] %vm226_vm0, %v4131_v49  ;;  %v4865_v21 = vor.u32 %v4864_v20, %v4860_v62  ;;  %v6636_v29 = vshll.u32 %v8668_v25, 16  ;;  %v4855_v42 = vshll.u32 %v8670_v15, 16  ;;  %v5734_v45 = vshll.u32 %v8671_v24, 16  ;;  %vm10735_vm10 = vmmov %vm10734_vm6 }
 0x1c3   : > { %v4869_v26 = vrot.slane %v4867_v7, 1  ;;  %v6634_v28 = vor.u32 %v6633_v3, %v6629_v12  ;;  %v4852_v40 = vrot.slane %v4850_v59, 1  ;;  %v5739_v46 = vshll.u32 %v8672_v43, 16  ;;  %vm10737_vm13 = vmmov %vm10734_vm6 }
 0x1c4   : > { %v6638_v33 = vrot.slane %v6636_v29, 1  ;;  %v4857_v41 = vrot.slane %v4855_v42, 1  ;;  %vm10736_vm11 = vcmask 64544   ;;  %v5732_v48 = vshrl.u32 %v8671_v24, 16 }
 0x1c5   : > { %v4870_v32 = vsel %vm10734_vm6, %v4865_v21, %v4869_v26  ;;  %v4853_v35 = vor.u32 %v4852_v40, %v4848_v23  ;;  %5075 = vst.msk [vmem:[#allocation4] sm:$0xff] %vm10736_vm11, %v5028_v44  ;;  %v5736_v51 = vrot.slane %v5734_v45, 1  ;;  %v5741_v8 = vrot.slane %v5739_v46, 1  ;;  %vm10739_vm11 = vmmov %vm10735_vm10 }
 0x1c6   : > { %5031 = vrot.lane.b32.xlu1 %v4870_v32, %s8903_s27  ;;  %v6639_v37 = vsel %vm10735_vm10, %v6634_v28, %v6638_v33  ;;  %vm10738_vm6 = vcmask 97344  }
 0x1c7   : > { %6820 = vrot.lane.b32.xlu0 %v6639_v37, %s8907_s6  ;;  %v4858_v54 = vsel %vm10737_vm13, %v4853_v35, %v4857_v41  ;;  %v8674_v52 = vld [vmem:[#allocation3 + $0x30] sm:$0xff]   ;;  %v5737_v55 = vor.u32 %v5736_v51, %v5732_v48  ;;  %5363 = vst.msk [vmem:[#allocation4] sm:$0xff] %vm10738_vm6, %v5316_v56  ;;  %v8678_v57 = vld [vmem:[#allocation3 + $0x38] ss:$0 sps:$4 sm:$0x11]   ;;  %vm10740_vm13 = vmmov %vm10735_vm10  ;;  %vm10741_vm6 = vcmask 31744  }
 0x1c8   : > { %v3713_v61 = vld [vmem:[#allocation4 + $0x78] sm:$0xff]  ;;  %v7067_v38 = vrot.slane %v8678_v57, 1  ;;  %v8680_v2 = vld [vmem:[#allocation3 + $0x38] ss:$0 sps:$4 sm:$0x11]  }
 0x1c9   : > { %8343 = vmatmul.mubr.msk.bf16.gmra.mrb[28].mxu0 %vm3740_vm12, %v3713_v61  ;;  %v8677_v22 = vld [vmem:[#allocation3 + $0x30] sm:$0xfe]   ;;  %v5742_v30 = vsel %vm10735_vm10, %v5737_v55, %v5741_v8  ;;  %v8676_v17 = vld [vmem:[#allocation3 + $0x24] sm:$0xff]   ;;  %v6173_v16 = vrot.slane %v8680_v2, 1 }
 0x1ca   : > { %5029 = vrot.lane.b32.xlu1 %v4858_v54, %s8903_s27  ;;  %v8687_v58 = vld [vmem:[#allocation3 + $0x30] sm:$0xff]   ;;  %v7066_v10 = vrot.slane %v8677_v22, 1  ;;  %v8682_v63 = vld [vmem:[#allocation3 + $0x38] ss:$0 sps:$4 sm:$0x11]   ;;  %v8675_v49 = vld [vmem:[#allocation3 + $0x24] sm:$0xff]  }
 0x1cb   : > { %5923 = vrot.lane.b32.xlu0 %v5742_v30, %s8906_s30  ;;  %v8673_v47 = vld [vmem:[#allocation3 + $0x30] sm:$0xff]   ;;  %v5768_v60 = vshrl.u32 %v8687_v58, 16  ;;  %v5280_v4 = vrot.slane %v8682_v63, 1  ;;  %v8683_v5 = vld [vmem:[#allocation3 + $0x24] sm:$0xfe]   ;;  %v5770_v9 = vshll.u32 %v8687_v58, 16 }
 0x1cc   : > { %v8679_v18 = vld [vmem:[#allocation3 + $0x30] sm:$0xfe]   ;;  %v8684_v50 = vld [vmem:[#allocation3 + $0x2c] ss:$0 sps:$4 sm:$0x11]   ;;  %v5276_v11 = vrot.slane %v8683_v5, 1  ;;  %v7068_v28 = vsel %vm1785_vm9, %v7066_v10, %v7067_v38 }
 0x1cd   : > { %v8691_v53 = vld [vmem:[#allocation3 + $0x30] sm:$0xff]   ;;  %v6172_v39 = vrot.slane %v8679_v18, 1  ;;  %v8685_v12 = vld [vmem:[#allocation3 + $0x24] sm:$0xfe]   ;;  %v5277_v27 = vrot.slane %v8684_v50, 1  ;;  %v5772_v59 = vrot.slane %v5770_v9, 1 }
 0x1ce   : > { %5497 = vrot.lane.b32.xlu1 %v8674_v52, %s8901_s25  ;;  %v8681_v62 = vld [vmem:[#allocation3 + $0x30] sm:$0xfe]   ;;  %v4884_v13 = vshrl.u32 %v8691_v53, 16  ;;  %v8686_v19 = vld [vmem:[#allocation3 + $0x2c] ss:$0 sps:$4 sm:$0x11]  }
 0x1cf   : > { %6392 = vrot.lane.b32.xlu0 %v8673_v47, %s8902_s26  ;;  %v5279_v1 = vrot.slane %v8681_v62, 1  ;;  %v6174_v14 = vsel %vm1785_vm9, %v6172_v39, %v6173_v16  ;;  %v7063_v23 = vrot.slane %v8685_v12, 1  ;;  %v7064_v25 = vrot.slane %v8686_v19, 1  ;;  %v8688_v3 = vld [vmem:[#allocation3 + $0x38] ss:$0 sps:$4 sm:$0x11]  }
 0x1d0   : > { %v8324_v20 = vpop.f32.mrb[8].mxu0  ;;  %v4886_v15 = vshll.u32 %v8691_v53, 16  ;;  %v5278_v33 = vsel %vm1785_vm9, %v5276_v11, %v5277_v27  ;;  %v5773_v35 = vor.u32 %v5772_v59, %v5768_v60  ;;  %v8689_v42 = vld [vmem:[#allocation3 + $0x24] sm:$0xfe]   ;;  %v5775_v44 = vshll.u32 %v8688_v3, 16  ;;  %v8693_v47 = vld [vmem:[#allocation3 + $0x30] sm:$0xff]  }
 0x1d1   : > { %v3868_v24 = vadd.f32 %v8324_v20, %v9770_v34  ;;  %v3859_v7 = vpop.f32.mrb[9].mxu0  ;;  %v5281_v29 = vsel %vm1785_vm9, %v5279_v1, %v5280_v4  ;;  %v8690_v37 = vld [vmem:[#allocation3 + $0x2c] ss:$0 sps:$4 sm:$0x11]   ;;  %v7065_v51 = vsel %vm1785_vm9, %v7063_v23, %v7064_v25  ;;  %v6169_v54 = vrot.slane %v8689_v42, 1  ;;  %v8695_v50 = vld [vmem:[#allocation3 + $0x24] sm:$0xff]  }
 0x1d2   : > { %6390 = vrot.lane.b32.xlu1 %v8676_v17, %s8902_s26  ;;  %v3860_v21 = vadd.f32 %v9770_v34, %v3859_v7  ;;  %v8325_v26 = vpop.f32.mrb[10].mxu0  ;;  %v4888_v41 = vrot.slane %v4886_v15, 1  ;;  %v5777_v55 = vrot.slane %v5775_v44, 1  ;;  %v6170_v56 = vrot.slane %v8690_v37, 1  ;;  %v4438_v10 = vld [vmem:[#allocation3 + $0x48] sm:$0xf] }
 0x1d3   : > { %5495 = vrot.lane.b32.xlu0 %v8675_v49, %s8901_s25  ;;  %v3964_v40 = vmax.f32 %v3868_v24, 0.0  ;;  %v3871_v61 = vadd.f32 %v8325_v26, %v9770_v34  ;;  %v3862_v32 = vpop.f32.mrb[11].mxu0  ;;  %v4431_v39 = vld [vmem:[#allocation3 + $0x3c] sm:$0xf]  ;;  %v4442_v49 = vld [vmem:[#allocation3 + $0x50] sm:$0x1] }
 0x1d4   : > { %v3962_v43 = vmax.f32 %v3860_v21, 0.0  ;;  %v3863_v45 = vadd.f32 %v9770_v34, %v3862_v32  ;;  %v8692_v34 = vld [vmem:[#allocation3 + $0x38] ss:$0 sps:$4 sm:$0x11]   ;;  %v4889_v58 = vor.u32 %v4888_v41, %v4884_v13  ;;  %v5778_v2 = vsel %vm10739_vm11, %v5773_v35, %v5777_v55  ;;  %v4435_v13 = vld [vmem:[#allocation3 + $0x44] sm:$0x1]  ;;  %vm10742_vm11 = vmmov %vm10741_vm6 }
 0x1d5   : > { %v8248_v46 = vpack.c.bf16 %v3964_v40, %v3964_v40  ;;  %v3965_v48 = vmax.f32 %v3871_v61, 0.0  ;;  %v6171_v62 = vsel %vm1785_vm9, %v6169_v54, %v6170_v56  ;;  %v4891_v5 = vshll.u32 %v8692_v34, 16  ;;  %v8697_v7 = vld [vmem:[#allocation3 + $0x24] sm:$0xff]   ;;  %v8696_v61 = vld [vmem:[#allocation3 + $0x2c] ss:$0 sps:$4 sm:$0x11]  }
 0x1d6   : > { %6217 = vrot.lane.b32.xlu1 %v6174_v14, %s8904_s28  ;;  %v8246_v8 = vpack.c.bf16 %v3962_v43, %v3962_v43  ;;  %v3963_v52 = vmax.f32 %v3863_v45, 0.0  ;;  %v8694_v14 = vld [vmem:[#allocation3 + $0x38] ss:$0 sps:$4 sm:$0x11]   ;;  %v6653_v27 = vshrl.u32 %v8693_v47, 16  ;;  %v6655_v21 = vshll.u32 %v8693_v47, 16 }
 0x1d7   : > { %7112 = vrot.lane.b32.xlu0 %v7068_v28, %s8905_s29  ;;  %v4168_v22 = vshrl.u32 %v8248_v46, 16  ;;  %v4171_v30 = vshll.u32 %v8248_v46, 16  ;;  %v8249_v57 = vpack.c.bf16 %v3965_v48, %v3965_v48  ;;  %v4893_v24 = vrot.slane %v4891_v5, 1  ;;  %v8699_v26 = vld [vmem:[#allocation3 + $0x24] sm:$0xff]   ;;  %v8767_v41 = vld [vmem:[#allocation3 + $0xc] sm:$0xff]  }
 0x1d8   : > { %v4151_v18 = vshrl.u32 %v8246_v8, 16  ;;  %v4154_v17 = vshll.u32 %v8246_v8, 16  ;;  %v8247_v38 = vpack.c.bf16 %v3963_v52, %v3963_v52  ;;  %v6657_v35 = vrot.slane %v6655_v21, 1  ;;  %v8698_v37 = vld [vmem:[#allocation3 + $0x2c] ss:$0 sps:$4 sm:$0x11]  }
 0x1d9   : > { %v4170_v53 = vrot.slane %v4168_v22, 7  ;;  %v4176_v60 = vshrl.u32 %v8249_v57, 16  ;;  %v4179_v16 = vshll.u32 %v8249_v57, 16  ;;  %v4894_v40 = vsel %vm10740_vm13, %v4889_v58, %v4893_v24  ;;  %v8792_v54 = vld [vmem:[#allocation3 + $0x30] sm:$0xff]   ;;  %4644 = vst.msk [vmem:[#allocation4 + $0x8] sm:$0xff] %vm10741_vm6, %v8767_v41  ;;  %vm10743_vm13 = vmmov %vm10735_vm10 }
 0x1da   : > { %5321 = vrot.lane.b32.xlu1 %v5278_v33, %s8900_s24  ;;  %v4153_v63 = vrot.slane %v4151_v18, 7  ;;  %v4159_v1 = vshrl.u32 %v8247_v38, 16  ;;  %v4162_v4 = vshll.u32 %v8247_v38, 16  ;;  %v6660_v42 = vshll.u32 %v8694_v14, 16  ;;  %4647 = vst.msk [vmem:[#allocation4 + $0x20] sm:$0xff] %vm10742_vm11, %v8792_v54  ;;  %vm10744_vm6 = vmmov %vm10735_vm10 }
 0x1db   : > { %5323 = vrot.lane.b32.xlu0 %v5281_v29, %s8900_s24  ;;  %v4173_v9 = vor.u32 %v4171_v30, %v4170_v53  ;;  %v4174_v11 = vrot.slane %v4170_v53, 4  ;;  %v4178_v12 = vrot.slane %v4176_v60, 7  ;;  %v6643_v44 = vshll.u32 %v8695_v50, 16  ;;  %v8700_v57 = vld [vmem:[#allocation3 + $0x2c] ss:$0 sps:$4 sm:$0x11]   ;;  %vm10746_vm11 = vmmov %vm10744_vm6 }
 0x1dc   : > { %v4156_v19 = vor.u32 %v4154_v17, %v4153_v63  ;;  %v4157_v20 = vrot.slane %v4153_v63, 4  ;;  %v4161_v23 = vrot.slane %v4159_v1, 7  ;;  %v6658_v46 = vor.u32 %v6657_v35, %v6653_v27  ;;  %v382_v38 = vld [vmem:[#allocation3 + $0x6c] sm:$0x1] }
 0x1dd   : > { %v4439_v25 = vsel %vm9007_vm8, %v4173_v9, %v4438_v10  ;;  %v4181_v3 = vor.u32 %v4179_v16, %v4178_v12  ;;  %v4183_v59 = vrot.slane %v4178_v12, 4  ;;  %v6662_v48 = vrot.slane %v6660_v42, 1 }
 0x1de   : > { %5929 = vrot.lane.b32.xlu1 %v5778_v2, %s8906_s30  ;;  %4440 = vst [vmem:[#allocation3 + $0x48] sm:$0xf] %v4439_v25  ;;  %v4432_v28 = vsel %vm9007_vm8, %v4156_v19, %v4431_v39  ;;  %v4164_v29 = vor.u32 %v4162_v4, %v4161_v23  ;;  %v4166_v15 = vrot.slane %v4161_v23, 4  ;;  %v6641_v8 = vshrl.u32 %v8695_v50, 16 }
 0x1df   : > { %7110 = vrot.lane.b32.xlu0 %v7065_v51, %s8905_s29  ;;  %4433 = vst [vmem:[#allocation3 + $0x3c] sm:$0xf] %v4432_v28  ;;  %v4182_v32 = vsel %vm8999_vm7, %v4174_v11, %v4181_v3  ;;  %v4443_v33 = vsel %vm8948_vm3, %v4183_v59, %v4442_v49  ;;  %v6648_v51 = vshll.u32 %v8696_v61, 16  ;;  %v6645_v52 = vrot.slane %v6643_v44, 1  ;;  %v9926_v44 = vld [vmem:[%s10688_s3] ss:$0 sm:$0xff] }
 0x1e0   : > { %4441 = vst.msk [vmem:[#allocation3 + $0x4c] sm:$0xf] %vm226_vm0, %v4182_v32  ;;  %4444 = vst [vmem:[#allocation3 + $0x50] sm:$0x1] %v4443_v33  ;;  %v4165_v43 = vsel %vm8999_vm7, %v4157_v20, %v4164_v29  ;;  %v4436_v45 = vsel %vm8948_vm3, %v4166_v15, %v4435_v13  ;;  %v5758_v55 = vshll.u32 %v8697_v7, 16  ;;  %v5763_v56 = vshll.u32 %v8698_v37, 16 }
 0x1e1   : > { %4434 = vst.msk [vmem:[#allocation3 + $0x40] sm:$0xf] %vm226_vm0, %v4165_v43  ;;  %4437 = vst [vmem:[#allocation3 + $0x44] sm:$0x1] %v4436_v45  ;;  %v6663_v22 = vsel %vm10735_vm10, %v6658_v46, %v6662_v48  ;;  %v5756_v30 = vshrl.u32 %v8697_v7, 16  ;;  %v4872_v34 = vshrl.u32 %v8699_v26, 16  ;;  %v6646_v47 = vor.u32 %v6645_v52, %v6641_v8 }
 0x1e2   : > { %5035 = vrot.lane.b32.xlu1 %v4894_v40, %s8903_s27  ;;  %v4874_v58 = vshll.u32 %v8699_v26, 16  ;;  %v6650_v10 = vrot.slane %v6648_v51, 1  ;;  %v5760_v18 = vrot.slane %v5758_v55, 1  ;;  %v5765_v17 = vrot.slane %v5763_v56, 1  ;;  %vm10745_vm10 = vmmov %vm10744_vm6 }
 0x1e3   : > { %6215 = vrot.lane.b32.xlu0 %v6171_v62, %s8904_s28  ;;  %v4879_v53 = vshll.u32 %v8700_v57, 16  ;;  %v383_v1 = vsel %vm8948_vm3, 0, %v382_v38 }
 0x1e4   : > { %v4876_v2 = vrot.slane %v4874_v58, 1  ;;  %v6651_v39 = vsel %vm10743_vm13, %v6646_v47, %v6650_v10  ;;  %v5761_v60 = vor.u32 %v5760_v18, %v5756_v30  ;;  %384 = vst [vmem:[#allocation3 + $0x6c] sm:$0x1] %v383_v1  ;;  %vm10747_vm13 = vmmov %vm10744_vm6 }
 0x1e5   : > { %v4881_v63 = vrot.slane %v4879_v53, 1 }
 0x1e6   : > { %6822 = vrot.lane.b32.xlu1 %v6651_v39, %s8907_s6  ;;  %v4877_v16 = vor.u32 %v4876_v2, %v4872_v34  ;;  %v5766_v62 = vsel %vm10744_vm6, %v5761_v60, %v5765_v17 }
 0x1e7   : > { %6824 = vrot.lane.b32.xlu0 %v6663_v22, %s8907_s6  ;;  %v8701_v49 = vld [vmem:[#allocation3 + $0x48] sm:$0xff]   ;;  %v8706_v9 = vld [vmem:[#allocation3 + $0x50] ss:$0 sps:$4 sm:$0x11]  }
 0x1e8   : > { %v8702_v4 = vld [vmem:[#allocation3 + $0x48] sm:$0xff]   ;;  %v4882_v5 = vsel %vm10745_vm10, %v4877_v16, %v4881_v63  ;;  %v8703_v14 = vld [vmem:[#allocation3 + $0x3c] sm:$0xff]   ;;  %v7073_v27 = vrot.slane %v8706_v9, 1  ;;  %v8708_v19 = vld [vmem:[#allocation3 + $0x50] ss:$0 sps:$4 sm:$0x11]  }
 0x1e9   : > { %v8705_v50 = vld [vmem:[#allocation3 + $0x48] sm:$0xfe]   ;;  %v8704_v7 = vld [vmem:[#allocation3 + $0x3c] sm:$0xff]   ;;  %v6179_v25 = vrot.slane %v8708_v19, 1  ;;  %vm10748_vm10 = vcmask 31744  }
 0x1ea   : > { %5033 = vrot.lane.b32.xlu1 %v4882_v5, %s8903_s27  ;;  %v8715_v11 = vld [vmem:[#allocation3 + $0x48] sm:$0xff]   ;;  %v7072_v12 = vrot.slane %v8705_v50, 1  ;;  %v8710_v59 = vld [vmem:[#allocation3 + $0x50] ss:$0 sps:$4 sm:$0x11]  }
 0x1eb   : > { %5927 = vrot.lane.b32.xlu0 %v5766_v62, %s8906_s30  ;;  %v8707_v13 = vld [vmem:[#allocation3 + $0x48] sm:$0xfe]   ;;  %v5792_v24 = vshrl.u32 %v8715_v11, 16  ;;  %v5286_v26 = vrot.slane %v8710_v59, 1  ;;  %v8711_v28 = vld [vmem:[#allocation3 + $0x3c] sm:$0xfe]  }
 0x1ec   : > { %v8719_v20 = vld [vmem:[#allocation3 + $0x48] sm:$0xff]   ;;  %v6178_v23 = vrot.slane %v8707_v13, 1  ;;  %v8712_v29 = vld [vmem:[#allocation3 + $0x44] ss:$0 sps:$4 sm:$0x11]   ;;  %v5794_v15 = vshll.u32 %v8715_v11, 16  ;;  %v7074_v33 = vsel %vm1785_vm9, %v7072_v12, %v7073_v27 }
 0x1ed   : > { %v8709_v3 = vld [vmem:[#allocation3 + $0x48] sm:$0xfe]   ;;  %v5282_v40 = vrot.slane %v8711_v28, 1  ;;  %v8713_v61 = vld [vmem:[#allocation3 + $0x3c] sm:$0xfe]   ;;  %v4908_v32 = vshrl.u32 %v8719_v20, 16 }
 0x1ee   : > { %5501 = vrot.lane.b32.xlu1 %v8702_v4, %s8901_s25  ;;  %v5285_v21 = vrot.slane %v8709_v3, 1  ;;  %v5283_v35 = vrot.slane %v8712_v29, 1  ;;  %v8714_v42 = vld [vmem:[#allocation3 + $0x44] ss:$0 sps:$4 sm:$0x11]   ;;  %v7069_v45 = vrot.slane %v8713_v61, 1  ;;  %v6180_v46 = vsel %vm1785_vm9, %v6178_v23, %v6179_v25 }
 0x1ef   : > { %6396 = vrot.lane.b32.xlu0 %v8701_v49, %s8902_s26  ;;  %v7070_v48 = vrot.slane %v8714_v42, 1  ;;  %v8716_v51 = vld [vmem:[#allocation3 + $0x50] ss:$0 sps:$4 sm:$0x11]   ;;  %v5796_v54 = vrot.slane %v5794_v15, 1  ;;  %v4910_v56 = vshll.u32 %v8719_v20, 16 }
 0x1f0   : > { %v5287_v55 = vsel %vm1785_vm9, %v5285_v21, %v5286_v26  ;;  %v5284_v34 = vsel %vm1785_vm9, %v5282_v40, %v5283_v35  ;;  %v8717_v47 = vld [vmem:[#allocation3 + $0x3c] sm:$0xfe]   ;;  %v5799_v17 = vshll.u32 %v8716_v51, 16  ;;  %v8718_v38 = vld [vmem:[#allocation3 + $0x44] ss:$0 sps:$4 sm:$0x11]  }
 0x1f1   : > { %v5797_v58 = vor.u32 %v5796_v54, %v5792_v24  ;;  %v4912_v2 = vrot.slane %v4910_v56, 1  ;;  %v7071_v60 = vsel %vm1785_vm9, %v7069_v45, %v7070_v48  ;;  %v6175_v16 = vrot.slane %v8717_v47, 1  ;;  %v8720_v9 = vld [vmem:[#allocation3 + $0x50] ss:$0 sps:$4 sm:$0x11]   ;;  %v8721_v12 = vld [vmem:[#allocation3 + $0x48] sm:$0xff]  }
 0x1f2   : > { %6394 = vrot.lane.b32.xlu1 %v8704_v7, %s8902_s26  ;;  %v5801_v49 = vrot.slane %v5799_v17, 1  ;;  %v6176_v1 = vrot.slane %v8718_v38, 1  ;;  %v4452_v13 = vld [vmem:[#allocation3 + $0x60] sm:$0xf]  ;;  %v4445_v24 = vld [vmem:[#allocation3 + $0x54] sm:$0xf] }
 0x1f3   : > { %5499 = vrot.lane.b32.xlu0 %v8703_v14, %s8901_s25  ;;  %v4913_v11 = vor.u32 %v4912_v2, %v4908_v32  ;;  %v4456_v21 = vld [vmem:[#allocation3 + $0x68] sm:$0x1]  ;;  %v4915_v29 = vshll.u32 %v8720_v9, 16  ;;  %v8723_v15 = vld [vmem:[#allocation3 + $0x3c] sm:$0xff]   ;;  %v6677_v42 = vshrl.u32 %v8721_v12, 16 }
 0x1f4   : > { %v5802_v20 = vsel %vm10746_vm11, %v5797_v58, %v5801_v49  ;;  %v6177_v3 = vsel %vm1785_vm9, %v6175_v16, %v6176_v1  ;;  %v8722_v35 = vld [vmem:[#allocation3 + $0x50] ss:$0 sps:$4 sm:$0x11]   ;;  %v6667_v38 = vshll.u32 %v8723_v15, 16  ;;  %v6665_v16 = vshrl.u32 %v8723_v15, 16  ;;  %vm10749_vm11 = vmmov %vm10744_vm6 }
 0x1f5   : > { %v8726_v2 = vld [vmem:[#allocation3 + $0x44] ss:$0 sps:$4 sm:$0x11]  }
 0x1f6   : > { %6221 = vrot.lane.b32.xlu1 %v6180_v46, %s8904_s28  ;;  %v8725_v46 = vld [vmem:[#allocation3 + $0x3c] sm:$0xff]   ;;  %v6669_v49 = vrot.slane %v6667_v38, 1  ;;  %v8728_v9 = vld [vmem:[#allocation3 + $0x44] ss:$0 sps:$4 sm:$0x11]  }
 0x1f7   : > { %7116 = vrot.lane.b32.xlu0 %v7074_v33, %s8905_s29  ;;  %v4449_v33 = vld [vmem:[#allocation3 + $0x5c] sm:$0x1]  ;;  %v5780_v1 = vshrl.u32 %v8725_v46, 16 }
 0x1fa   : > { %5325 = vrot.lane.b32.xlu1 %v5284_v34, %s8900_s24 }
 0x1fb   : > { %5327 = vrot.lane.b32.xlu0 %v5287_v55, %s8900_s24 }
 0x1fe   : > { %5933 = vrot.lane.b32.xlu1 %v5802_v20, %s8906_s30 }
 0x1ff   : > { %7114 = vrot.lane.b32.xlu0 %v7071_v60, %s8905_s29 }
 0x201   : > { %v8328_v43 = vpop.f32.mrb[12].mxu0 }
 0x202   : > { %v3884_v37 = vadd.f32 %v9926_v44, %v8328_v43  ;;  %v3875_v41 = vpop.f32.mrb[13].mxu0 }
 0x203   : > { %v3876_v8 = vadd.f32 %v9926_v44, %v3875_v41  ;;  %v8329_v52 = vpop.f32.mrb[14].mxu0  ;;  %6219 = vrot.lane.b32.xlu0 %v6177_v3, %s8904_s28  ;;  %v4917_v41 = vrot.slane %v4915_v29, 1 }
 0x204   : > { %v3968_v22 = vmax.f32 %v3884_v37, 0.0  ;;  %v3887_v30 = vadd.f32 %v9926_v44, %v8329_v52  ;;  %v3878_v57 = vpop.f32.mrb[15].mxu0  ;;  %v8727_v52 = vld [vmem:[#allocation3 + $0x3c] sm:$0xff]  }
 0x205   : > { %v3966_v10 = vmax.f32 %v3876_v8, 0.0  ;;  %v3879_v18 = vadd.f32 %v9926_v44, %v3878_v57  ;;  %v6679_v8 = vshll.u32 %v8721_v12, 16  ;;  %v8724_v57 = vld [vmem:[#allocation3 + $0x44] ss:$0 sps:$4 sm:$0x11]   ;;  %v4898_v12 = vshll.u32 %v8727_v52, 16 }
 0x206   : > { %v8252_v53 = vpack.c.bf16 %v3968_v22, %v3968_v22  ;;  %v3969_v39 = vmax.f32 %v3887_v30, 0.0  ;;  %v4918_v30 = vsel %vm10747_vm13, %v4913_v11, %v4917_v41  ;;  %v4896_v11 = vshrl.u32 %v8727_v52, 16  ;;  %vm10750_vm13 = vmmov %vm10744_vm6 }
 0x207   : > { %v8250_v62 = vpack.c.bf16 %v3966_v10, %v3966_v10  ;;  %v3967_v63 = vmax.f32 %v3879_v18, 0.0  ;;  %5039 = vrot.lane.b32.xlu1 %v4918_v30, %s8903_s27  ;;  %v6681_v47 = vrot.slane %v6679_v8, 1  ;;  %v6684_v10 = vshll.u32 %v8722_v35, 16 }
 0x208   : > { %v4202_v4 = vshrl.u32 %v8252_v53, 16  ;;  %v4205_v5 = vshll.u32 %v8252_v53, 16  ;;  %v8253_v50 = vpack.c.bf16 %v3969_v39, %v3969_v39  ;;  %v8793_v53 = vld [vmem:[%s10687_s2] sm:$0xff]  }
 0x209   : > { %v4185_v14 = vshrl.u32 %v8250_v62, 16  ;;  %v4188_v27 = vshll.u32 %v8250_v62, 16  ;;  %v8251_v19 = vpack.c.bf16 %v3967_v63, %v3967_v63  ;;  %v6682_v39 = vor.u32 %v6681_v47, %v6677_v42  ;;  %v8798_v63 = vld [vmem:[%s10687_s2 + $0x8] sm:$0xff]   ;;  %8346 = vmatprep.subr.bf16.mxu1 %v8793_v53 }
 0x20a   : > { %v4204_v23 = vrot.slane %v4202_v4, 7  ;;  %v4210_v7 = vshrl.u32 %v8253_v50, 16  ;;  %v4213_v25 = vshll.u32 %v8253_v50, 16  ;;  %v6686_v60 = vrot.slane %v6684_v10, 1  ;;  %8347 = vmatpush3.bf16.msra.mxu1 %v8793_v53 }
 0x20b   : > { %v4187_v59 = vrot.slane %v4185_v14, 7  ;;  %v4193_v26 = vshrl.u32 %v8251_v19, 16  ;;  %v4196_v28 = vshll.u32 %v8251_v19, 16  ;;  %v6672_v62 = vshll.u32 %v8724_v57, 16  ;;  %8348 = vmatprep.subr.bf16.mxu1 %v8798_v63 }
 0x20c   : > { %v4207_v40 = vor.u32 %v4205_v5, %v4204_v23  ;;  %v4208_v61 = vrot.slane %v4204_v23, 4  ;;  %v4212_v32 = vrot.slane %v4210_v7, 7  ;;  %v5782_v4 = vshll.u32 %v8725_v46, 16  ;;  %v439_v23 = vld [vmem:[#allocation3 + $0x80] sm:$0x1] }
 0x20d   : > { %v4190_v43 = vor.u32 %v4188_v27, %v4187_v59  ;;  %v4191_v45 = vrot.slane %v4187_v59, 4  ;;  %v4195_v37 = vrot.slane %v4193_v26, 7  ;;  %v5787_v5 = vshll.u32 %v8726_v2, 16 }
 0x20e   : > { %v4453_v48 = vsel %vm9007_vm8, %v4207_v40, %v4452_v13  ;;  %v4215_v51 = vor.u32 %v4213_v25, %v4212_v32  ;;  %v4217_v54 = vrot.slane %v4212_v32, 4  ;;  %v6687_v50 = vsel %vm10744_vm6, %v6682_v39, %v6686_v60  ;;  %v8803_v13 = vld [vmem:[#allocation3 + $0x24] sm:$0xff]   ;;  %8349 = vmatpush3.bf16.msra.mxu1 %v8798_v63  ;;  %vm10751_vm6 = vmmov %vm10748_vm10 }
 0x20f   : > { %4454 = vst [vmem:[#allocation3 + $0x60] sm:$0xf] %v4453_v48  ;;  %v4446_v55 = vsel %vm9007_vm8, %v4190_v43, %v4445_v24  ;;  %v4198_v56 = vor.u32 %v4196_v28, %v4195_v37  ;;  %v4200_v22 = vrot.slane %v4195_v37, 4  ;;  %6828 = vrot.lane.b32.xlu0 %v6687_v50, %s8907_s6  ;;  %v6670_v14 = vor.u32 %v6669_v49, %v6665_v16 }
 0x210   : > { %4447 = vst [vmem:[#allocation3 + $0x54] sm:$0xf] %v4446_v55  ;;  %v4216_v34 = vsel %vm8999_vm7, %v4208_v61, %v4215_v51  ;;  %v4457_v58 = vsel %vm8948_vm3, %v4217_v54, %v4456_v21  ;;  %v6674_v27 = vrot.slane %v6672_v62, 1  ;;  %v5784_v19 = vrot.slane %v5782_v4, 1  ;;  %4646 = vst.msk [vmem:[#allocation4 + $0x18] sm:$0xff] %vm10748_vm10, %v8803_v13  ;;  %v8825_v21 = vld [vmem:[#allocation3 + $0x48] sm:$0xff]  }
 0x211   : > { %4455 = vst.msk [vmem:[#allocation3 + $0x64] sm:$0xf] %vm226_vm0, %v4216_v34  ;;  %4458 = vst [vmem:[#allocation3 + $0x68] sm:$0x1] %v4457_v58  ;;  %v4199_v18 = vsel %vm8999_vm7, %v4191_v45, %v4198_v56  ;;  %v4450_v17 = vsel %vm8948_vm3, %v4200_v22, %v4449_v33  ;;  %v5789_v20 = vrot.slane %v5787_v5, 1  ;;  %v4900_v24 = vrot.slane %v4898_v12, 1 }
 0x212   : > { %4448 = vst.msk [vmem:[#allocation3 + $0x58] sm:$0xf] %vm226_vm0, %v4199_v18  ;;  %4451 = vst [vmem:[#allocation3 + $0x5c] sm:$0x1] %v4450_v17  ;;  %v4903_v7 = vshll.u32 %v8728_v9, 16  ;;  %v6675_v25 = vsel %vm10749_vm11, %v6670_v14, %v6674_v27  ;;  %v5785_v3 = vor.u32 %v5784_v19, %v5780_v1  ;;  %v440_v59 = vsel %vm8973_vm5, 0, %v439_v23 }
 0x213   : > { %6826 = vrot.lane.b32.xlu1 %v6675_v25, %s8907_s6  ;;  %v4901_v26 = vor.u32 %v4900_v24, %v4896_v11  ;;  %441 = vst [vmem:[#allocation3 + $0x80] sm:$0x1] %v440_v59  ;;  %4649 = vst.msk [vmem:[#allocation4 + $0x30] sm:$0xff] %vm10751_vm6, %v8825_v21  ;;  %v436_v45 = vld [vmem:[#allocation3 + $0x74] sm:$0x1] }
 0x214   : > { %v5790_v28 = vsel %vm10750_vm13, %v5785_v3, %v5789_v20  ;;  %v4905_v29 = vrot.slane %v4903_v7, 1  ;;  %vm10752_vm10 = vmmov %vm10749_vm11  ;;  %v437_v54 = vsel %vm8973_vm5, 0, %v436_v45 }
 0x215   : > { %5931 = vrot.lane.b32.xlu0 %v5790_v28, %s8906_s30  ;;  %438 = vst [vmem:[#allocation3 + $0x74] sm:$0x1] %v437_v54  ;;  %vm10753_vm11 = vmmov %vm10752_vm10 }
 0x216   : > { %v4906_v40 = vsel %vm10752_vm10, %v4901_v26, %v4905_v29  ;;  %vm10754_vm13 = vmmov %vm10752_vm10 }
 0x217   : > { %5037 = vrot.lane.b32.xlu1 %v4906_v40, %s8903_s27  ;;  %vm10755_vm6 = vmmov %vm10752_vm10 }
 0x218   : > { %v8729_v15 = vld [vmem:[#allocation3 + $0x60] sm:$0xff]   ;;  %v8734_v33 = vld [vmem:[#allocation3 + $0x68] ss:$0 sps:$4 sm:$0x11]   ;;  %vm10756_vm10 = vmmov %vm10755_vm6 }
 0x219   : > { %v8733_v61 = vld [vmem:[#allocation3 + $0x60] sm:$0xfe]   ;;  %6400 = vrot.lane.b32.xlu0 %v8729_v15, %s8902_s26  ;;  %v8731_v35 = vld [vmem:[#allocation3 + $0x54] sm:$0xff]   ;;  %v8736_v43 = vld [vmem:[#allocation3 + $0x68] ss:$0 sps:$4 sm:$0x11]  }
 0x21a   : > { %v8730_v32 = vld [vmem:[#allocation3 + $0x60] sm:$0xff]   ;;  %v8732_v41 = vld [vmem:[#allocation3 + $0x54] sm:$0xff]   ;;  %v7078_v46 = vrot.slane %v8733_v61, 1  ;;  %v7079_v48 = vrot.slane %v8734_v33, 1  ;;  %v6185_v52 = vrot.slane %v8736_v43, 1 }
 0x21b   : > { %v8735_v42 = vld [vmem:[#allocation3 + $0x60] sm:$0xfe]   ;;  %5505 = vrot.lane.b32.xlu1 %v8730_v32, %s8901_s25  ;;  %v8739_v55 = vld [vmem:[#allocation3 + $0x68] ss:$0 sps:$4 sm:$0x11]  }
 0x21c   : > { %v8744_v37 = vld [vmem:[#allocation3 + $0x60] sm:$0xff]   ;;  %v6184_v51 = vrot.slane %v8735_v42, 1  ;;  %v8740_v22 = vld [vmem:[#allocation3 + $0x54] sm:$0xfe]   ;;  %v5292_v47 = vrot.slane %v8739_v55, 1  ;;  %v7080_v2 = vsel %vm1785_vm9, %v7078_v46, %v7079_v48 }
 0x21d   : > { %v8738_v8 = vld [vmem:[#allocation3 + $0x60] sm:$0xfe]   ;;  %5503 = vrot.lane.b32.xlu0 %v8731_v35, %s8901_s25  ;;  %v5816_v30 = vshrl.u32 %v8744_v37, 16  ;;  %v5818_v57 = vshll.u32 %v8744_v37, 16  ;;  %v5288_v53 = vrot.slane %v8740_v22, 1 }
 0x21e   : > { %v9983_v56 = vld [vmem:[#allocation3 + $0x60] sm:$0xff]   ;;  %v5291_v58 = vrot.slane %v8738_v8, 1  ;;  %v8741_v10 = vld [vmem:[#allocation3 + $0x5c] ss:$0 sps:$4 sm:$0x11]   ;;  %v6186_v1 = vsel %vm1785_vm9, %v6184_v51, %v6185_v52 }
 0x21f   : > { %6398 = vrot.lane.b32.xlu1 %v8732_v41, %s8902_s26  ;;  %v9986_v18 = vpop.permute.xlu0 %6388  ;;  %v5289_v16 = vrot.slane %v8741_v10, 1  ;;  %v8742_v62 = vld [vmem:[#allocation3 + $0x54] sm:$0xfe]   ;;  %v8743_v5 = vld [vmem:[#allocation3 + $0x5c] ss:$0 sps:$4 sm:$0x11]  }
 0x220   : > { %v5820_v50 = vrot.slane %v5818_v57, 1  ;;  %v9994_v9 = vpop.permute.xlu1 %5493  ;;  %v7075_v13 = vrot.slane %v8742_v62, 1  ;;  %v4932_v14 = vshrl.u32 %v9983_v56, 16  ;;  %v5293_v23 = vsel %vm1785_vm9, %v5291_v58, %v5292_v47  ;;  %v8745_v59 = vld [vmem:[#allocation3 + $0x68] ss:$0 sps:$4 sm:$0x11]  }
 0x221   : > { %v8332_v34 = vpop.f32.mrb[16].mxu0  ;;  %7120 = vrot.lane.b32.xlu0 %v7080_v2, %s8905_s29  ;;  %v7076_v24 = vrot.slane %v8743_v5, 1  ;;  %v5290_v3 = vsel %vm1785_vm9, %v5288_v53, %v5289_v16  ;;  %v4466_v15 = vld [vmem:[#allocation3 + $0x78] sm:$0xf]  ;;  %v5823_v33 = vshll.u32 %v8745_v59, 16  ;;  %v8750_v10 = vld [vmem:[#allocation3 + $0x60] sm:$0xff]  }
 0x222   : > { %v3900_v17 = vadd.f32 %v9926_v44, %v8332_v34  ;;  %v3891_v38 = vpop.f32.mrb[17].mxu0  ;;  %v5821_v29 = vor.u32 %v5820_v50, %v5816_v30  ;;  %v8746_v35 = vld [vmem:[#allocation3 + $0x54] sm:$0xfe]   ;;  %v4459_v43 = vld [vmem:[#allocation3 + $0x6c] sm:$0xf]  ;;  %v6701_v59 = vshrl.u32 %v8750_v10, 16 }
 0x223   : > { %v3892_v39 = vadd.f32 %v9926_v44, %v3891_v38  ;;  %v8333_v60 = vpop.f32.mrb[18].mxu0  ;;  %6225 = vrot.lane.b32.xlu1 %v6186_v1, %s8904_s28  ;;  %v5492_v27 = vpop.permute.xlu0 %5491  ;;  %v7077_v41 = vsel %vm1785_vm9, %v7075_v13, %v7076_v24  ;;  %v8747_v46 = vld [vmem:[#allocation3 + $0x5c] ss:$0 sps:$4 sm:$0x11]   ;;  %v4470_v54 = vld [vmem:[#allocation3 + $0x80] sm:$0x1] }
 0x224   : > { %v3972_v63 = vmax.f32 %v3900_v17, 0.0  ;;  %v3903_v49 = vadd.f32 %v9926_v44, %v8333_v60  ;;  %v3894_v4 = vpop.f32.mrb[19].mxu0  ;;  %5539 = vst.msk [vmem:[#allocation4] sm:$0xff] %vm2059_vm14, %v5492_v27  ;;  %v10005_v48 = vpop.permute.xlu1 %6213  ;;  %v5825_v55 = vrot.slane %v5823_v33, 1  ;;  %v4463_v58 = vld [vmem:[#allocation3 + $0x74] sm:$0x1] }
 0x225   : > { %v3970_v11 = vmax.f32 %v3892_v39, 0.0  ;;  %v3895_v12 = vadd.f32 %v9926_v44, %v3894_v4  ;;  %5331 = vrot.lane.b32.xlu0 %v5293_v23, %s8900_s24  ;;  %v6181_v47 = vrot.slane %v8746_v35, 1  ;;  %v8752_v39 = vld [vmem:[#allocation3 + $0x54] sm:$0xff]   ;;  %v8751_v23 = vld [vmem:[#allocation3 + $0x68] ss:$0 sps:$4 sm:$0x11]  }
 0x226   : > { %v8256_v19 = vpack.c.bf16 %v3972_v63, %v3972_v63  ;;  %v3973_v20 = vmax.f32 %v3903_v49, 0.0  ;;  %v5826_v53 = vsel %vm10753_vm11, %v5821_v29, %v5825_v55  ;;  %v6182_v63 = vrot.slane %v8747_v46, 1  ;;  %v8749_v49 = vld [vmem:[#allocation3 + $0x68] ss:$0 sps:$4 sm:$0x11]   ;;  %v8754_v1 = vld [vmem:[#allocation3 + $0x54] sm:$0xff]   ;;  %vm10757_vm11 = vmmov %vm10755_vm6 }
 0x227   : > { %v8254_v7 = vpack.c.bf16 %v3970_v11, %v3970_v11  ;;  %v3971_v25 = vmax.f32 %v3895_v12, 0.0  ;;  %5329 = vrot.lane.b32.xlu1 %v5290_v3, %s8900_s24  ;;  %v10008_v22 = vpop.permute.xlu0 %7108  ;;  %v4934_v11 = vshll.u32 %v9983_v56, 16  ;;  %v8756_v12 = vld [vmem:[#allocation3 + $0x54] sm:$0xff]   ;;  %v6708_v29 = vshll.u32 %v8751_v23, 16 }
 0x228   : > { %v4236_v21 = vshrl.u32 %v8256_v19, 16  ;;  %v4239_v26 = vshll.u32 %v8256_v19, 16  ;;  %v8257_v28 = vpack.c.bf16 %v3973_v20, %v3973_v20  ;;  %v6183_v19 = vsel %vm1785_vm9, %v6181_v47, %v6182_v63  ;;  %v10022_v24 = vpop.permute.xlu1 %5317 }
 0x229   : > { %v4219_v40 = vshrl.u32 %v8254_v7, 16  ;;  %v4222_v61 = vshll.u32 %v8254_v7, 16  ;;  %v8255_v32 = vpack.c.bf16 %v3971_v25, %v3971_v25  ;;  %7118 = vrot.lane.b32.xlu0 %v7077_v41, %s8905_s29  ;;  %v4939_v20 = vshll.u32 %v8749_v49, 16  ;;  %v8755_v41 = vld [vmem:[#allocation3 + $0x5c] ss:$0 sps:$4 sm:$0x11]  }
 0x22a   : > { %v4238_v42 = vrot.slane %v4236_v21, 7  ;;  %v4244_v45 = vshrl.u32 %v8257_v28, 16  ;;  %v4247_v37 = vshll.u32 %v8257_v28, 16  ;;  %v4936_v3 = vrot.slane %v4934_v11, 1  ;;  %v391_v49 = vld [vmem:[#allocation3 + $0x90] sm:$0x1] }
 0x22b   : > { %v4221_v51 = vrot.slane %v4219_v40, 7  ;;  %v4227_v8 = vshrl.u32 %v8255_v32, 16  ;;  %v4230_v52 = vshll.u32 %v8255_v32, 16  ;;  %5937 = vrot.lane.b32.xlu1 %v5826_v53, %s8906_s30  ;;  %v5320_v21 = vpop.permute.xlu0 %5319  ;;  %v6703_v28 = vshll.u32 %v8750_v10, 16 }
 0x22c   : > { %v4241_v30 = vor.u32 %v4239_v26, %v4238_v42  ;;  %v4242_v57 = vrot.slane %v4238_v42, 4  ;;  %v4246_v34 = vrot.slane %v4244_v45, 7  ;;  %v4941_v26 = vrot.slane %v4939_v20, 1 }
 0x22d   : > { %v4224_v17 = vor.u32 %v4222_v61, %v4221_v51  ;;  %v4225_v38 = vrot.slane %v4221_v51, 4  ;;  %v4229_v2 = vrot.slane %v4227_v8, 7  ;;  %6223 = vrot.lane.b32.xlu0 %v6183_v19, %s8904_s28  ;;  %v4937_v40 = vor.u32 %v4936_v3, %v4932_v14 }
 0x22e   : > { %v4467_v60 = vsel %vm9007_vm8, %v4241_v30, %v4466_v15  ;;  %v4249_v16 = vor.u32 %v4247_v37, %v4246_v34  ;;  %v4251_v62 = vrot.slane %v4246_v34, 4  ;;  %v8753_v15 = vld [vmem:[#allocation3 + $0x5c] ss:$0 sps:$4 sm:$0x11]   ;;  %v6689_v61 = vshrl.u32 %v8752_v39, 16 }
 0x22f   : > { %4468 = vst [vmem:[#allocation3 + $0x78] sm:$0xf] %v4467_v60  ;;  %v4460_v4 = vsel %vm9007_vm8, %v4224_v17, %v4459_v43  ;;  %v4232_v5 = vor.u32 %v4230_v52, %v4229_v2  ;;  %v4234_v50 = vrot.slane %v4229_v2, 4  ;;  %v6691_v32 = vshll.u32 %v8752_v39, 16 }
 0x230   : > { %4461 = vst [vmem:[#allocation3 + $0x6c] sm:$0xf] %v4460_v4  ;;  %v4250_v13 = vsel %vm8999_vm7, %v4242_v57, %v4249_v16  ;;  %v4471_v27 = vsel %vm8948_vm3, %v4251_v62, %v4470_v54  ;;  %v6705_v33 = vrot.slane %v6703_v28, 1  ;;  %v6710_v35 = vrot.slane %v6708_v29, 1  ;;  %v445_v4 = vld [vmem:[#allocation3 + $0x98] sm:$0x1] }
 0x231   : > { %4469 = vst.msk [vmem:[#allocation3 + $0x7c] sm:$0xf] %vm226_vm0, %v4250_v13  ;;  %4472 = vst [vmem:[#allocation3 + $0x80] sm:$0x1] %v4471_v27  ;;  %v4233_v7 = vsel %vm8999_vm7, %v4225_v38, %v4232_v5  ;;  %v4464_v25 = vsel %vm8948_vm3, %v4234_v50, %v4463_v58  ;;  %v6696_v42 = vshll.u32 %v8753_v15, 16  ;;  %v5804_v43 = vshrl.u32 %v8754_v1, 16 }
 0x232   : > { %4462 = vst.msk [vmem:[#allocation3 + $0x70] sm:$0xf] %vm226_vm0, %v4233_v7  ;;  %4465 = vst [vmem:[#allocation3 + $0x74] sm:$0x1] %v4464_v25  ;;  %v4942_v45 = vsel %vm10754_vm13, %v4937_v40, %v4941_v26  ;;  %v6693_v37 = vrot.slane %v6691_v32, 1  ;;  %v5806_v46 = vshll.u32 %v8754_v1, 16  ;;  %v6706_v54 = vor.u32 %v6705_v33, %v6701_v59  ;;  %v5926_v55 = vpop.permute.xlu1 %5925 }
 0x233   : > { %v4920_v51 = vshrl.u32 %v8756_v12, 16  ;;  %5043 = vrot.lane.b32.xlu1 %v4942_v45, %s8903_s27  ;;  %v6698_v8 = vrot.slane %v6696_v42, 1  ;;  %v4922_v52 = vshll.u32 %v8756_v12, 16  ;;  %v5811_v30 = vshll.u32 %v8755_v41, 16  ;;  %v6212_v57 = vpop.permute.xlu0 %6211  ;;  %v388_v1 = vld [vmem:[#allocation3 + $0x84] sm:$0x1] }
 0x234   : > { %v6694_v56 = vor.u32 %v6693_v37, %v6689_v61  ;;  %v5808_v14 = vrot.slane %v5806_v46, 1  ;;  %v6711_v34 = vsel %vm10755_vm6, %v6706_v54, %v6710_v35  ;;  %v8757_v58 = vld [vmem:[#allocation3 + $0x5c] ss:$0 sps:$4 sm:$0x11]   ;;  %vm10758_vm13 = vcmask 64544  }
 0x235   : > { %v4924_v47 = vrot.slane %v4922_v52, 1  ;;  %6832 = vrot.lane.b32.xlu0 %v6711_v34, %s8907_s6  ;;  %v5813_v38 = vrot.slane %v5811_v30, 1  ;;  %v4927_v53 = vshll.u32 %v8757_v58, 16  ;;  %vm10759_vm6 = vcmask 97344   ;;  %v442_v28 = vld [vmem:[#allocation3 + $0x8c] sm:$0x1] }
 0x236   : > { %v6699_v10 = vsel %vm10756_vm10, %v6694_v56, %v6698_v8  ;;  %v5809_v17 = vor.u32 %v5808_v14, %v5804_v43  ;;  %v392_v11 = vsel %vm8948_vm3, 0, %v391_v49  ;;  %v389_v12 = vsel %vm8948_vm3, 0, %v388_v1 }
 0x237   : > { %6830 = vrot.lane.b32.xlu1 %v6699_v10, %s8907_s6  ;;  %v4925_v2 = vor.u32 %v4924_v47, %v4920_v51  ;;  %v4929_v16 = vrot.slane %v4927_v53, 1  ;;  %v446_v13 = vsel %vm8973_vm5, 0, %v445_v4  ;;  %393 = vst [vmem:[#allocation3 + $0x90] sm:$0x1] %v392_v11  ;;  %390 = vst [vmem:[#allocation3 + $0x84] sm:$0x1] %v389_v12 }
 0x238   : > { %v5032_v39 = vpop.permute.xlu1 %5031  ;;  %v5814_v60 = vsel %vm10757_vm11, %v5809_v17, %v5813_v38  ;;  %v8758_v62 = vld [vmem:[#allocation3 + $0x78] sm:$0xff]   ;;  %447 = vst [vmem:[#allocation3 + $0x98] sm:$0x1] %v446_v13  ;;  %v8764_v23 = vld [vmem:[#allocation3 + $0x80] ss:$0 sps:$4 sm:$0x11]   ;;  %vm10760_vm11 = vmmov %vm10758_vm13 }
 0x239   : > { %5077 = vst.msk [vmem:[#allocation4 + $0x10] sm:$0xff] %vm10758_vm13, %v5032_v39  ;;  %5935 = vrot.lane.b32.xlu0 %v5814_v60, %s8906_s30  ;;  %v8759_v63 = vld [vmem:[#allocation3 + $0x78] sm:$0xff]   ;;  %v6821_v5 = vpop.permute.xlu0 %6820  ;;  %v4930_v50 = vsel %vm10756_vm10, %v4925_v2, %v4929_v16  ;;  %v8760_v7 = vld [vmem:[#allocation3 + $0x6c] sm:$0xff]   ;;  %vm10761_vm13 = vmmov %vm10759_vm6  ;;  %v443_v40 = vsel %vm8973_vm5, 0, %v442_v28 }
 0x23a   : > { %5365 = vst.msk [vmem:[#allocation4 + $0x10] sm:$0xff] %vm10759_vm6, %v5320_v21  ;;  %v10050_v27 = vld [vmem:[#allocation3 + $0x78] sm:$0xff]   ;;  %v8766_v3 = vld [vmem:[#allocation3 + $0x80] ss:$0 sps:$4 sm:$0x11]   ;;  %v8762_v26 = vld [vmem:[#allocation3 + $0x6c] sm:$0xff]  }
 0x23b   : > { %5041 = vrot.lane.b32.xlu1 %v4930_v50, %s8903_s27  ;;  %v8763_v19 = vld [vmem:[#allocation3 + $0x78] sm:$0xfe]   ;;  %v5842_v21 = vshll.u32 %v10050_v27, 16  ;;  %444 = vst [vmem:[#allocation3 + $0x8c] sm:$0x1] %v443_v40  ;;  %v6191_v33 = vrot.slane %v8766_v3, 1 }
 0x23c   : > { %v5030_v20 = vpop.permute.xlu1 %5029  ;;  %v8765_v25 = vld [vmem:[#allocation3 + $0x78] sm:$0xfe]   ;;  %v7084_v15 = vrot.slane %v8763_v19, 1  ;;  %v5840_v35 = vshrl.u32 %v10050_v27, 16  ;;  %vm10762_vm6 = vcmask 294144  }
 0x23d   : > { %5076 = vst.msk [vmem:[#allocation4 + $0x8] sm:$0xff] %vm10760_vm11, %v5030_v20  ;;  %6404 = vrot.lane.b32.xlu0 %v8758_v62, %s8902_s26  ;;  %v5924_v59 = vpop.permute.xlu0 %5923  ;;  %v8768_v61 = vld [vmem:[#allocation3 + $0x78] sm:$0xfe]   ;;  %v6190_v32 = vrot.slane %v8765_v25, 1  ;;  %v5844_v37 = vrot.slane %v5842_v21, 1 }
 0x23e   : > { %5364 = vst.msk [vmem:[#allocation4 + $0x8] sm:$0xff] %vm10761_vm13, %v10022_v24  ;;  %v7085_v24 = vrot.slane %v8764_v23, 1  ;;  %v8769_v43 = vld [vmem:[#allocation3 + $0x80] ss:$0 sps:$4 sm:$0x11]   ;;  %v5297_v45 = vrot.slane %v8768_v61, 1  ;;  %vm10763_vm13 = vmmov %vm10756_vm10 }
 0x23f   : > { %5540 = vst.msk [vmem:[#allocation4 + $0x8] sm:$0xff] %vm2059_vm14, %v9994_v9  ;;  %5509 = vrot.lane.b32.xlu1 %v8759_v63, %s8901_s25  ;;  %v10070_v9 = vld [vmem:[#allocation3 + $0x78] sm:$0xff]   ;;  %v8770_v56 = vld [vmem:[#allocation3 + $0x6c] sm:$0xfe]   ;;  %v6192_v30 = vsel %vm1785_vm9, %v6190_v32, %v6191_v33  ;;  %v4473_v3 = vld [vmem:[#allocation3 + $0x84] sm:$0xf]  ;;  %v5845_v32 = vor.u32 %v5844_v37, %v5840_v35 }
 0x240   : > { %5972 = vst.msk [vmem:[#allocation4 + $0x8] sm:$0xff] %vm2492_vm15, %v5926_v55  ;;  %5971 = vst.msk [vmem:[#allocation4] sm:$0xff] %vm2492_vm15, %v5924_v59  ;;  %v10063_v29 = vpop.permute.xlu1 %5497  ;;  %v7086_v51 = vsel %vm1785_vm9, %v7084_v15, %v7085_v24  ;;  %v4956_v54 = vshrl.u32 %v10070_v9, 16  ;;  %v5298_v55 = vrot.slane %v8769_v43, 1  ;;  %v4958_v58 = vshll.u32 %v10070_v9, 16 }
 0x241   : > { %6260 = vst.msk [vmem:[#allocation4 + $0x8] sm:$0xff] %vm2781_vm1, %v10005_v48  ;;  %6259 = vst.msk [vmem:[#allocation4] sm:$0xff] %vm2781_vm1, %v6212_v57  ;;  %5507 = vrot.lane.b32.xlu0 %v8760_v7, %s8901_s25  ;;  %v10077_v42 = vpop.permute.xlu0 %6392  ;;  %v8336_v48 = vpop.f32.mrb[20].mxu0  ;;  %v8771_v34 = vld [vmem:[#allocation3 + $0x74] ss:$0 sps:$4 sm:$0x11]  }
 0x242   : > { %6436 = vst.msk [vmem:[#allocation4] sm:$0xff] %vm2959_vm2, %v9986_v18  ;;  %v3916_v18 = vadd.f32 %v9926_v44, %v8336_v48  ;;  %v3907_v46 = vpop.f32.mrb[21].mxu0  ;;  %v5294_v38 = vrot.slane %v8770_v56, 1  ;;  %v5299_v60 = vsel %vm1785_vm9, %v5297_v45, %v5298_v55  ;;  %v5295_v16 = vrot.slane %v8771_v34, 1  ;;  %v8772_v49 = vld [vmem:[#allocation3 + $0x6c] sm:$0xfe]  }
 0x243   : > { %6868 = vst.msk [vmem:[#allocation4] sm:$0xff] %vm3392_vm4, %v6821_v5  ;;  %6402 = vrot.lane.b32.xlu1 %v8762_v26, %s8902_s26  ;;  %v3908_v8 = vadd.f32 %v9926_v44, %v3907_v46  ;;  %v8337_v52 = vpop.f32.mrb[22].mxu0  ;;  %v8773_v1 = vld [vmem:[#allocation3 + $0x74] ss:$0 sps:$4 sm:$0x11]   ;;  %v7081_v23 = vrot.slane %v8772_v49, 1 }
 0x244   : > { %7156 = vst.msk [vmem:[#allocation4] sm:$0xff] %vm10762_vm6, %v10008_v22  ;;  %v6391_v41 = vpop.permute.xlu1 %6390  ;;  %v3976_v14 = vmax.f32 %v3916_v18, 0.0  ;;  %v3919_v22 = vadd.f32 %v9926_v44, %v8337_v52  ;;  %v3910_v57 = vpop.f32.mrb[23].mxu0  ;;  %v4480_v12 = vld [vmem:[#allocation3 + $0x90] sm:$0xf]  ;;  %v7082_v26 = vrot.slane %v8773_v1, 1 }
 0x245   : > { %6437 = vst.msk [vmem:[#allocation4 + $0x8] sm:$0xff] %vm2959_vm2, %v6391_v41  ;;  %7124 = vrot.lane.b32.xlu0 %v7086_v51, %s8905_s29  ;;  %v5496_v47 = vpop.permute.xlu0 %5495  ;;  %v3974_v10 = vmax.f32 %v3908_v8, 0.0  ;;  %v3911_v17 = vadd.f32 %v9926_v44, %v3910_v57  ;;  %v5296_v44 = vsel %vm1785_vm9, %v5294_v38, %v5295_v16  ;;  %v4484_v15 = vld [vmem:[#allocation3 + $0x98] sm:$0x1]  ;;  %v4477_v45 = vld [vmem:[#allocation3 + $0x8c] sm:$0x1] }
 0x246   : > { %5541 = vst.msk [vmem:[#allocation4 + $0x10] sm:$0xff] %vm2059_vm14, %v5496_v47  ;;  %v8260_v53 = vpack.c.bf16 %v3976_v14, %v3976_v14  ;;  %v3977_v39 = vmax.f32 %v3919_v22, 0.0  ;;  %v8775_v61 = vld [vmem:[#allocation3 + $0x80] ss:$0 sps:$4 sm:$0x11]   ;;  %v7083_v41 = vsel %vm1785_vm9, %v7081_v23, %v7082_v26  ;;  %v8780_v56 = vld [vmem:[#allocation3 + $0x78] sm:$0xff]  }
 0x247   : > { %6229 = vrot.lane.b32.xlu1 %v6192_v30, %s8904_s28  ;;  %v8258_v62 = vpack.c.bf16 %v3974_v10, %v3974_v10  ;;  %v3975_v63 = vmax.f32 %v3911_v17, 0.0  ;;  %v5847_v52 = vshll.u32 %v8775_v61, 16  ;;  %v8776_v55 = vld [vmem:[#allocation3 + $0x6c] sm:$0xfe]   ;;  %vm10764_vm6 = vcmask 97344  }
 0x248   : > { %v10094_v2 = vpop.permute.xlu1 %6217  ;;  %v4270_v4 = vshrl.u32 %v8260_v53, 16  ;;  %v4273_v5 = vshll.u32 %v8260_v53, 16  ;;  %v8261_v50 = vpack.c.bf16 %v3977_v39, %v3977_v39  ;;  %v8777_v37 = vld [vmem:[#allocation3 + $0x74] ss:$0 sps:$4 sm:$0x11]   ;;  %v8782_v22 = vld [vmem:[#allocation3 + $0x6c] sm:$0xff]  }
 0x249   : > { %5335 = vrot.lane.b32.xlu0 %v5299_v60, %s8900_s24  ;;  %v10099_v11 = vpop.permute.xlu0 %7112  ;;  %v4253_v13 = vshrl.u32 %v8258_v62, 16  ;;  %v4256_v19 = vshll.u32 %v8258_v62, 16  ;;  %v8259_v20 = vpack.c.bf16 %v3975_v63, %v3975_v63  ;;  %v5849_v10 = vrot.slane %v5847_v52, 1  ;;  %v8779_v60 = vld [vmem:[#allocation3 + $0x80] ss:$0 sps:$4 sm:$0x11]  }
 0x24a   : > { %v4272_v25 = vrot.slane %v4270_v4, 7  ;;  %v4278_v59 = vshrl.u32 %v8261_v50, 16  ;;  %v4281_v21 = vshll.u32 %v8261_v50, 16  ;;  %v6187_v53 = vrot.slane %v8776_v55, 1 }
 0x24b   : > { %5333 = vrot.lane.b32.xlu1 %v5296_v44, %s8900_s24  ;;  %v4255_v28 = vrot.slane %v4253_v13, 7  ;;  %v4261_v24 = vshrl.u32 %v8259_v20, 16  ;;  %v4264_v40 = vshll.u32 %v8259_v20, 16  ;;  %v6188_v39 = vrot.slane %v8777_v37, 1  ;;  %v7172_v16 = vld [vmem:[#allocation4] sm:$0xff] }
 0x24c   : > { %v10102_v7 = vpop.permute.xlu1 %5321  ;;  %v4275_v33 = vor.u32 %v4273_v5, %v4272_v25  ;;  %v4276_v48 = vrot.slane %v4272_v25, 4  ;;  %v4280_v43 = vrot.slane %v4278_v59, 7  ;;  %v5850_v1 = vsel %vm10756_vm10, %v5845_v32, %v5849_v10  ;;  %8352 = vmatprep.mubr.msk.bf16.mxu1 %vm3740_vm12, %v7172_v16  ;;  %v8784_v5 = vld [vmem:[#allocation3 + $0x6c] sm:$0xff]   ;;  %v8785_v61 = vld [vmem:[#allocation3 + $0x74] ss:$0 sps:$4 sm:$0x11]  }
 0x24d   : > { %v5324_v18 = vpop.permute.xlu0 %5323  ;;  %v4258_v46 = vor.u32 %v4256_v19, %v4255_v28  ;;  %v4259_v51 = vrot.slane %v4255_v28, 4  ;;  %v4263_v8 = vrot.slane %v4261_v24, 7  ;;  %7122 = vrot.lane.b32.xlu0 %v7083_v41, %s8905_s29  ;;  %v4960_v4 = vrot.slane %v4958_v58, 1  ;;  %v8783_v28 = vld [vmem:[#allocation3 + $0x74] ss:$0 sps:$4 sm:$0x11]  }
 0x24e   : > { %v4481_v14 = vsel %vm9007_vm8, %v4275_v33, %v4480_v12  ;;  %v4283_v27 = vor.u32 %v4281_v21, %v4280_v43  ;;  %v4285_v35 = vrot.slane %v4280_v43, 4  ;;  %v6189_v50 = vsel %vm1785_vm9, %v6187_v53, %v6188_v39  ;;  %v8781_v12 = vld [vmem:[#allocation3 + $0x80] ss:$0 sps:$4 sm:$0x11]   ;;  %v394_v39 = vld [vmem:[#allocation3 + $0x9c] sm:$0x1] }
 0x24f   : > { %4482 = vst [vmem:[#allocation3 + $0x90] sm:$0xf] %v4481_v14  ;;  %v4474_v57 = vsel %vm9007_vm8, %v4258_v46, %v4473_v3  ;;  %v4266_v34 = vor.u32 %v4264_v40, %v4263_v8  ;;  %v4268_v47 = vrot.slane %v4263_v8, 4  ;;  %5941 = vrot.lane.b32.xlu1 %v5850_v1, %s8906_s30  ;;  %v4963_v44 = vshll.u32 %v8779_v60, 16  ;;  %v451_v60 = vld [vmem:[#allocation3 + $0xb0] sm:$0x1] }
 0x250   : > { %v10110_v30 = vpop.permute.xlu1 %5929  ;;  %4475 = vst [vmem:[#allocation3 + $0x84] sm:$0xf] %v4474_v57  ;;  %v4284_v17 = vsel %vm8999_vm7, %v4276_v48, %v4283_v27  ;;  %v4485_v38 = vsel %vm8948_vm3, %v4285_v35, %v4484_v15  ;;  %v4961_v13 = vor.u32 %v4960_v4, %v4956_v54  ;;  %v6725_v19 = vshrl.u32 %v8780_v56, 16  ;;  %v8787_v52 = vld [vmem:[#allocation3 + $0x74] ss:$0 sps:$4 sm:$0x11]  }
 0x251   : > { %v7111_v62 = vpop.permute.xlu0 %7110  ;;  %4483 = vst.msk [vmem:[#allocation3 + $0x94] sm:$0xf] %vm226_vm0, %v4284_v17  ;;  %4486 = vst [vmem:[#allocation3 + $0x98] sm:$0x1] %v4485_v38  ;;  %v4267_v63 = vsel %vm8999_vm7, %v4259_v51, %v4266_v34  ;;  %v4478_v49 = vsel %vm8948_vm3, %v4268_v47, %v4477_v45  ;;  %6227 = vrot.lane.b32.xlu0 %v6189_v50, %s8904_s28  ;;  %v6727_v20 = vshll.u32 %v8780_v56, 16  ;;  %v4965_v58 = vrot.slane %v4963_v44, 1 }
 0x252   : > { %4476 = vst.msk [vmem:[#allocation3 + $0x88] sm:$0xf] %vm226_vm0, %v4267_v63  ;;  %4479 = vst [vmem:[#allocation3 + $0x8c] sm:$0x1] %v4478_v49  ;;  %v6732_v23 = vshll.u32 %v8781_v12, 16  ;;  %v6713_v25 = vshrl.u32 %v8782_v22, 16 }
 0x253   : > { %v6715_v3 = vshll.u32 %v8782_v22, 16  ;;  %v6729_v26 = vrot.slane %v6727_v20, 1  ;;  %v4966_v15 = vsel %vm10763_vm13, %v4961_v13, %v4965_v58  ;;  %v6720_v54 = vshll.u32 %v8783_v28, 16  ;;  %v8786_v51 = vld [vmem:[#allocation3 + $0x6c] sm:$0xff]   ;;  %vm10766_vm13 = vmmov %vm10756_vm10  ;;  %v397_v47 = vld [vmem:[#allocation3 + $0xa8] sm:$0x1] }
 0x254   : > { %v5036_v21 = vpop.permute.xlu1 %5035  ;;  %v6734_v24 = vrot.slane %v6732_v23, 1  ;;  %5047 = vrot.lane.b32.xlu1 %v4966_v15, %s8903_s27  ;;  %v5828_v32 = vshrl.u32 %v8784_v5, 16  ;;  %v5830_v33 = vshll.u32 %v8784_v5, 16  ;;  %v5835_v46 = vshll.u32 %v8785_v61, 16  ;;  %v448_v58 = vld [vmem:[#allocation3 + $0xa4] sm:$0x1] }
 0x255   : > { %v6216_v59 = vpop.permute.xlu0 %6215  ;;  %5079 = vst.msk [vmem:[#allocation4 + $0x20] sm:$0xff] %vm10760_vm11, %v5036_v21  ;;  %v6717_v40 = vrot.slane %v6715_v3, 1  ;;  %v6730_v9 = vor.u32 %v6729_v26, %v6725_v19  ;;  %v6722_v45 = vrot.slane %v6720_v54, 1  ;;  %vm10765_vm11 = vmmov %vm10756_vm10  ;;  %v4946_v14 = vshll.u32 %v8786_v51, 16 }
 0x256   : > { %5367 = vst.msk [vmem:[#allocation4 + $0x20] sm:$0xff] %vm10764_vm6, %v5324_v18  ;;  %v5832_v41 = vrot.slane %v5830_v33, 1  ;;  %v5837_v56 = vrot.slane %v5835_v46, 1  ;;  %v4951_v27 = vshll.u32 %v8787_v52, 16  ;;  %v4944_v22 = vshrl.u32 %v8786_v51, 16 }
 0x257   : > { %v6718_v48 = vor.u32 %v6717_v40, %v6713_v25  ;;  %v6735_v43 = vsel %vm10756_vm10, %v6730_v9, %v6734_v24  ;;  %v4948_v57 = vrot.slane %v4946_v14, 1  ;;  %vm10767_vm6 = vcmask 294144  }
 0x258   : > { %6836 = vrot.lane.b32.xlu0 %v6735_v43, %s8907_s6  ;;  %v5833_v55 = vor.u32 %v5832_v41, %v5828_v32  ;;  %v6823_v35 = vpop.permute.xlu1 %6822  ;;  %v8788_v34 = vld [vmem:[#allocation3 + $0x90] sm:$0xff]   ;;  %v4953_v17 = vrot.slane %v4951_v27, 1  ;;  %v398_v38 = vsel %vm8948_vm3, 0, %v397_v47  ;;  %v395_v49 = vsel %vm8948_vm3, 0, %v394_v39  ;;  %v10196_v43 = vld [vmem:[%s10688_s3] ss:$0 sm:$0xff] }
 0x259   : > { %v6825_v8 = vpop.permute.xlu0 %6824  ;;  %v6723_v18 = vsel %vm10765_vm11, %v6718_v48, %v6722_v45  ;;  %6869 = vst.msk [vmem:[#allocation4 + $0x8] sm:$0xff] %vm3392_vm4, %v6823_v35  ;;  %v4949_v53 = vor.u32 %v4948_v57, %v4944_v22  ;;  %399 = vst [vmem:[#allocation3 + $0xa8] sm:$0x1] %v398_v38  ;;  %v8789_v63 = vld [vmem:[#allocation3 + $0x90] sm:$0xff]   ;;  %vm10768_vm10 = vcmask 64544   ;;  %v8790_v4 = vld [vmem:[#allocation3 + $0x84] sm:$0xff]  }
 0x25a   : > { %6834 = vrot.lane.b32.xlu1 %v6723_v18, %s8907_s6  ;;  %v5838_v37 = vsel %vm10766_vm13, %v5833_v55, %v5837_v56  ;;  %7157 = vst.msk [vmem:[#allocation4 + $0x8] sm:$0xff] %vm10767_vm6, %v7111_v62  ;;  %v452_v62 = vsel %vm8973_vm5, 0, %v451_v60  ;;  %396 = vst [vmem:[#allocation3 + $0x9c] sm:$0x1] %v395_v49  ;;  %v8794_v5 = vld [vmem:[#allocation3 + $0x90] sm:$0xfe]  }
 0x25b   : > { %v4954_v1 = vsel %vm10765_vm11, %v4949_v53, %v4953_v17  ;;  %453 = vst [vmem:[#allocation3 + $0xb0] sm:$0x1] %v452_v62  ;;  %v8795_v50 = vld [vmem:[#allocation3 + $0x98] ss:$0 sps:$4 sm:$0x11]   ;;  %vm10769_vm13 = vcmask 97344  }
 0x25c   : > { %5939 = vrot.lane.b32.xlu0 %v5838_v37, %s8906_s30  ;;  %v5034_v16 = vpop.permute.xlu1 %5033  ;;  %v10161_v44 = vld [vmem:[#allocation3 + $0x90] sm:$0xff]   ;;  %v7090_v13 = vrot.slane %v8794_v5, 1  ;;  %v7091_v19 = vrot.slane %v8795_v50, 1  ;;  %v8797_v23 = vld [vmem:[#allocation3 + $0x98] ss:$0 sps:$4 sm:$0x11]  }
 0x25d   : > { %v5928_v10 = vpop.permute.xlu0 %5927  ;;  %5078 = vst.msk [vmem:[#allocation4 + $0x18] sm:$0xff] %vm10768_vm10, %v5034_v16  ;;  %v8796_v20 = vld [vmem:[#allocation3 + $0x90] sm:$0xfe]   ;;  %v449_v25 = vsel %vm8973_vm5, 0, %v448_v58  ;;  %v5864_v3 = vshrl.u32 %v10161_v44, 16  ;;  %v5866_v21 = vshll.u32 %v10161_v44, 16 }
 0x25e   : > { %5973 = vst.msk [vmem:[#allocation4 + $0x10] sm:$0xff] %vm2492_vm15, %v5928_v10  ;;  %5045 = vrot.lane.b32.xlu1 %v4954_v1, %s8903_s27  ;;  %450 = vst [vmem:[#allocation3 + $0xa4] sm:$0x1] %v449_v25  ;;  %v8791_v28 = vld [vmem:[#allocation3 + $0x84] sm:$0xff]   ;;  %v6196_v15 = vrot.slane %v8796_v20, 1  ;;  %v10203_v14 = vld [vmem:[#allocation3 + $0x90] sm:$0xff]  }
 0x25f   : > { %6261 = vst.msk [vmem:[#allocation4 + $0x10] sm:$0xff] %vm2781_vm1, %v6216_v59  ;;  %v8800_v59 = vld [vmem:[#allocation3 + $0x98] ss:$0 sps:$4 sm:$0x11]   ;;  %v8801_v33 = vld [vmem:[#allocation3 + $0x84] sm:$0xfe]  }
 0x260   : > { %6438 = vst.msk [vmem:[#allocation4 + $0x10] sm:$0xff] %vm2959_vm2, %v10077_v42  ;;  %6408 = vrot.lane.b32.xlu0 %v8788_v34, %s8902_s26  ;;  %v10170_v42 = vld [vmem:[#allocation3 + $0x90] sm:$0xff]   ;;  %v5304_v9 = vrot.slane %v8800_v59, 1  ;;  %v8802_v48 = vld [vmem:[#allocation3 + $0x8c] ss:$0 sps:$4 sm:$0x11]  }
 0x261   : > { %6870 = vst.msk [vmem:[#allocation4 + $0x10] sm:$0xff] %vm3392_vm4, %v6825_v8  ;;  %v10163_v12 = vpop.permute.xlu0 %6396  ;;  %v4980_v40 = vshrl.u32 %v10170_v42, 16  ;;  %v4982_v54 = vshll.u32 %v10170_v42, 16  ;;  %v5868_v46 = vrot.slane %v5866_v21, 1  ;;  %v5300_v55 = vrot.slane %v8801_v33, 1  ;;  %v7173_v38 = vld [vmem:[#allocation4 + $0x8] sm:$0xff] }
 0x262   : > { %5366 = vst.msk [vmem:[#allocation4 + $0x18] sm:$0xff] %vm10769_vm13, %v10102_v7  ;;  %v10174_v7 = vpop.permute.xlu1 %5501  ;;  %5513 = vrot.lane.b32.xlu1 %v8789_v63, %s8901_s25  ;;  %v5301_v56 = vrot.slane %v8802_v48, 1  ;;  %v8804_v57 = vld [vmem:[%s10687_s2 + $0x10] ss:$0 sps:$4 sm:$0x33]   ;;  %v6749_v53 = vshrl.u32 %v10203_v14, 16 }
 0x263   : > { %7158 = vst.msk [vmem:[#allocation4 + $0x10] sm:$0xff] %vm10767_vm6, %v10099_v11  ;;  %v8799_v11 = vld [vmem:[#allocation3 + $0x90] sm:$0xfe]   ;;  %v10211_v34 = vrot.slane %v4982_v54, 1  ;;  %vm10770_vm10 = vcmask 1041408   ;;  %vm10772_vm13 = vcmask 31744  }
 0x264   : > { %5542 = vst.msk [vmem:[#allocation4 + $0x18] sm:$0xff] %vm2059_vm14, %v10063_v29  ;;  %5511 = vrot.lane.b32.xlu0 %v8790_v4, %s8901_s25  ;;  %v5303_v24 = vrot.slane %v8799_v11, 1  ;;  %8385 = vmatprep.subr.msk.bf16.mxu1 %vm10770_vm10, %v8804_v57  ;;  %v8805_v16 = vld [vmem:[#allocation3 + $0x84] sm:$0xfe]   ;;  %vm10771_vm11 = vmmov %vm10770_vm10  ;;  %v5302_v4 = vsel %vm1785_vm9, %v5300_v55, %v5301_v56  ;;  %vm10773_vm6 = vsmask.f32 7424 }
 0x265   : > { %5974 = vst.msk [vmem:[#allocation4 + $0x18] sm:$0xff] %vm2492_vm15, %v10110_v30  ;;  %v5500_v29 = vpop.permute.xlu0 %5499  ;;  %v7092_v30 = vsel %vm1785_vm9, %v7090_v13, %v7091_v19  ;;  %v8340_v32 = vpop.f32.mrb[24].mxu0  ;;  %v7295_v63 = vsel %vm10771_vm11, %v8804_v57, 0  ;;  %v8806_v5 = vld [vmem:[#allocation3 + $0x8c] ss:$0 sps:$4 sm:$0x11]   ;;  %vm10775_vm11 = vmmov %vm10772_vm13 }
 0x266   : > { %6262 = vst.msk [vmem:[#allocation4 + $0x18] sm:$0xff] %vm2781_vm1, %v10094_v2  ;;  %v6395_v26 = vpop.permute.xlu1 %6394  ;;  %v6197_v2 = vrot.slane %v8797_v23, 1  ;;  %6406 = vrot.lane.b32.xlu1 %v8791_v28, %s8902_s26  ;;  %v3932_v45 = vadd.f32 %v10196_v43, %v8340_v32  ;;  %v3923_v41 = vpop.f32.mrb[25].mxu0  ;;  %v5305_v18 = vsel %vm1785_vm9, %v5303_v24, %v5304_v9  ;;  %8351 = vmatpush3.bf16.msra.mxu1 %v7295_v63  ;;  %v7087_v20 = vrot.slane %v8805_v16, 1  ;;  %v4494_v25 = vld [vmem:[#allocation3 + $0xa8] sm:$0xf] }
 0x267   : > { %5543 = vst.msk [vmem:[#allocation4 + $0x20] sm:$0xff] %vm2059_vm14, %v5500_v29  ;;  %v3924_v8 = vadd.f32 %v10196_v43, %v3923_v41  ;;  %v8341_v52 = vpop.f32.mrb[26].mxu0  ;;  %v7088_v59 = vrot.slane %v8806_v5, 1  ;;  %v5869_v24 = vor.u32 %v5868_v46, %v5864_v3  ;;  %v4498_v32 = vld [vmem:[#allocation3 + $0xb0] sm:$0x1]  ;;  %v8833_v3 = vld [vmem:[#allocation3 + $0x3c] sm:$0xff]  }
 0x268   : > { %6439 = vst.msk [vmem:[#allocation4 + $0x18] sm:$0xff] %vm2959_vm2, %v6395_v26  ;;  %7128 = vrot.lane.b32.xlu0 %v7092_v30, %s8905_s29  ;;  %v3980_v27 = vmax.f32 %v3932_v45, 0.0  ;;  %v3935_v35 = vadd.f32 %v10196_v43, %v8341_v52  ;;  %v6198_v37 = vsel %vm1785_vm9, %v6196_v15, %v6197_v2  ;;  %v3926_v22 = vpop.f32.mrb[27].mxu0  ;;  %v4487_v26 = vld [vmem:[#allocation3 + $0x9c] sm:$0xf]  ;;  %vm10774_vm10 = vcmask 64544  }
 0x269   : > { %v10190_v61 = vpop.permute.xlu0 %7116  ;;  %v3978_v10 = vmax.f32 %v3924_v8, 0.0  ;;  %v3927_v17 = vadd.f32 %v10196_v43, %v3926_v22  ;;  %v8808_v2 = vld [vmem:[#allocation3 + $0x98] ss:$0 sps:$4 sm:$0x11]   ;;  %8353 = vmatmul.mubr.msk.bf16.vlgmr.msra.gmra.mrb[0].mxu1 %vm3740_vm12, %v7173_v38  ;;  %v7089_v45 = vsel %vm1785_vm9, %v7087_v20, %v7088_v59  ;;  %4648 = vst.msk [vmem:[#allocation4 + $0x28] sm:$0xff] %vm10772_vm13, %v8833_v3  ;;  %v8854_v38 = vld [vmem:[#allocation3 + $0x60] sm:$0xff]  }
 0x26a   : > { %v10199_v51 = vpop.permute.xlu1 %6221  ;;  %6233 = vrot.lane.b32.xlu1 %v6198_v37, %s8904_s28  ;;  %v8264_v39 = vpack.c.bf16 %v3980_v27, %v3980_v27  ;;  %v3981_v60 = vmax.f32 %v3935_v35, 0.0  ;;  %v7174_v58 = vld [vmem:[#allocation4 + $0x10] sm:$0xff]  ;;  %v5871_v44 = vshll.u32 %v8808_v2, 16  ;;  %4651 = vst.msk [vmem:[#allocation4 + $0x40] sm:$0xff] %vm10775_vm11, %v8854_v38  ;;  %vm10776_vm13 = vcmask 97344  }
 0x26b   : > { %v8262_v62 = vpack.c.bf16 %v3978_v10, %v3978_v10  ;;  %v3979_v1 = vmax.f32 %v3927_v17, 0.0  ;;  %8356 = vmatprep.mubr.msk.bf16.mxu1 %vm3740_vm12, %v7174_v58  ;;  %v8809_v27 = vld [vmem:[#allocation3 + $0x84] sm:$0xfe]   ;;  %v8810_v10 = vld [vmem:[#allocation3 + $0x8c] ss:$0 sps:$4 sm:$0x11]  }
 0x26c   : > { %5339 = vrot.lane.b32.xlu0 %v5305_v18, %s8900_s24  ;;  %v4304_v50 = vshrl.u32 %v8264_v39, 16  ;;  %v4307_v13 = vshll.u32 %v8264_v39, 16  ;;  %v8265_v19 = vpack.c.bf16 %v3981_v60, %v3981_v60  ;;  %v4491_v18 = vld [vmem:[#allocation3 + $0xa4] sm:$0x1]  ;;  %v5873_v57 = vrot.slane %v5871_v44, 1 }
 0x26d   : > { %v10213_v47 = vpop.permute.xlu0 %5327  ;;  %v4287_v29 = vshrl.u32 %v8262_v62, 16  ;;  %v4290_v11 = vshll.u32 %v8262_v62, 16  ;;  %v8263_v30 = vpack.c.bf16 %v3979_v1, %v3979_v1  ;;  %v6193_v63 = vrot.slane %v8809_v27, 1  ;;  %v8815_v62 = vld [vmem:[#allocation3 + $0x84] sm:$0xff]   ;;  %v403_v38 = vld [vmem:[#allocation3 + $0xc0] sm:$0x1] }
 0x26e   : > { %v10220_v49 = vpop.permute.xlu1 %5325  ;;  %5337 = vrot.lane.b32.xlu1 %v5302_v4, %s8900_s24  ;;  %v4306_v21 = vrot.slane %v4304_v50, 7  ;;  %v4312_v28 = vshrl.u32 %v8265_v19, 16  ;;  %v4315_v15 = vshll.u32 %v8265_v19, 16  ;;  %v5874_v50 = vsel %vm10773_vm6, %v5869_v24, %v5873_v57  ;;  %v8812_v19 = vld [vmem:[#allocation3 + $0x98] ss:$0 sps:$4 sm:$0x11]  }
 0x26f   : > { %v4289_v54 = vrot.slane %v4287_v29, 7  ;;  %v4295_v33 = vshrl.u32 %v8263_v30, 16  ;;  %v4298_v48 = vshll.u32 %v8263_v30, 16  ;;  %v4987_v30 = vshll.u32 %v8812_v19, 16 }
 0x270   : > { %v4309_v41 = vor.u32 %v4307_v13, %v4306_v21  ;;  %v4310_v8 = vrot.slane %v4306_v21, 4  ;;  %v4314_v52 = vrot.slane %v4312_v28, 7  ;;  %7126 = vrot.lane.b32.xlu0 %v7089_v45, %s8905_s29  ;;  %v6194_v13 = vrot.slane %v8810_v10, 1  ;;  %v8814_v59 = vld [vmem:[#allocation3 + $0x98] ss:$0 sps:$4 sm:$0x11]  }
 0x271   : > { %v10223_v23 = vpop.permute.xlu0 %7114  ;;  %v4292_v46 = vor.u32 %v4290_v11, %v4289_v54  ;;  %v4293_v55 = vrot.slane %v4289_v54, 4  ;;  %v4297_v56 = vrot.slane %v4295_v33, 7  ;;  %v4985_v11 = vor.u32 %v10211_v34, %v4980_v40  ;;  %v8818_v45 = vld [vmem:[#allocation3 + $0x8c] ss:$0 sps:$4 sm:$0x11]  }
 0x272   : > { %v10229_v9 = vpop.permute.xlu1 %5933  ;;  %v4495_v35 = vsel %vm9007_vm8, %v4309_v41, %v4494_v25  ;;  %v4317_v37 = vor.u32 %v4315_v15, %v4314_v52  ;;  %v4319_v22 = vrot.slane %v4314_v52, 4  ;;  %5945 = vrot.lane.b32.xlu1 %v5874_v50, %s8906_s30  ;;  %v8817_v25 = vld [vmem:[#allocation3 + $0x84] sm:$0xff]   ;;  %v6195_v29 = vsel %vm1785_vm9, %v6193_v63, %v6194_v13 }
 0x273   : > { %4496 = vst [vmem:[#allocation3 + $0xa8] sm:$0xf] %v4495_v35  ;;  %v4488_v39 = vsel %vm9007_vm8, %v4292_v46, %v4487_v26  ;;  %v4300_v60 = vor.u32 %v4298_v48, %v4297_v56  ;;  %v4302_v16 = vrot.slane %v4297_v56, 4  ;;  %v6751_v21 = vshll.u32 %v10203_v14, 16  ;;  %v8819_v26 = vld [vmem:[#allocation3 + $0x84] sm:$0xff]  }
 0x274   : > { %4489 = vst [vmem:[#allocation3 + $0x9c] sm:$0xf] %v4488_v39  ;;  %v4318_v4 = vsel %vm8999_vm7, %v4310_v8, %v4317_v37  ;;  %v4499_v5 = vsel %vm8948_vm3, %v4319_v22, %v4498_v32  ;;  %6231 = vrot.lane.b32.xlu0 %v6195_v29, %s8904_s28  ;;  %v4989_v28 = vrot.slane %v4987_v30, 1  ;;  %v6756_v2 = vshll.u32 %v8814_v59, 16  ;;  %v400_v39 = vld [vmem:[#allocation3 + $0xb4] sm:$0x1] }
 0x275   : > { %v10236_v17 = vpop.permute.xlu0 %6219  ;;  %4497 = vst.msk [vmem:[#allocation3 + $0xac] sm:$0xf] %vm226_vm0, %v4318_v4  ;;  %4500 = vst [vmem:[#allocation3 + $0xb0] sm:$0x1] %v4499_v5  ;;  %v4301_v20 = vsel %vm8999_vm7, %v4293_v55, %v4300_v60  ;;  %v4492_v58 = vsel %vm8948_vm3, %v4302_v16, %v4491_v18  ;;  %v6753_v15 = vrot.slane %v6751_v21, 1  ;;  %v6739_v54 = vshll.u32 %v8815_v62, 16 }
 0x276   : > { %4490 = vst.msk [vmem:[#allocation3 + $0xa0] sm:$0xf] %vm226_vm0, %v4301_v20  ;;  %4493 = vst [vmem:[#allocation3 + $0xa4] sm:$0x1] %v4492_v58  ;;  %v4990_v32 = vsel %vm10773_vm6, %v4985_v11, %v4989_v28  ;;  %v6758_v33 = vrot.slane %v6756_v2, 1  ;;  %v6737_v34 = vshrl.u32 %v8815_v62, 16 }
 0x277   : > { %v6754_v42 = vor.u32 %v6753_v15, %v6749_v53  ;;  %5051 = vrot.lane.b32.xlu1 %v4990_v32, %s8903_s27  ;;  %v6741_v48 = vrot.slane %v6739_v54, 1  ;;  %v5854_v41 = vshll.u32 %v8817_v25, 16  ;;  %v5852_v18 = vshrl.u32 %v8817_v25, 16  ;;  %v8820_v55 = vld [vmem:[#allocation3 + $0x8c] ss:$0 sps:$4 sm:$0x11]  }
 0x278   : > { %v4970_v44 = vshll.u32 %v8819_v26, 16  ;;  %v5859_v46 = vshll.u32 %v8818_v45, 16  ;;  %vm10778_vm11 = vcmask 294144   ;;  %v4968_v27 = vshrl.u32 %v8819_v26, 16  ;;  %v457_v50 = vld [vmem:[#allocation3 + $0xc8] sm:$0x1] }
 0x279   : > { %v5040_v1 = vpop.permute.xlu1 %5039  ;;  %v6742_v3 = vor.u32 %v6741_v48, %v6737_v34  ;;  %v5856_v53 = vrot.slane %v5854_v41, 1  ;;  %v4975_v10 = vshll.u32 %v8820_v55, 16  ;;  %v401_v63 = vsel %vm8948_vm3, 0, %v400_v39 }
 0x27a   : > { %5081 = vst.msk [vmem:[#allocation4 + $0x30] sm:$0xff] %vm10774_vm10, %v5040_v1  ;;  %vm10777_vm10 = vmmov %vm10773_vm6  ;;  %v4972_v35 = vrot.slane %v4970_v44, 1  ;;  %v5861_v57 = vrot.slane %v5859_v46, 1  ;;  %v458_v20 = vsel %vm8973_vm5, 0, %v457_v50 }
 0x27b   : > { %5369 = vst.msk [vmem:[#allocation4 + $0x30] sm:$0xff] %vm10776_vm13, %v10213_v47  ;;  %v8816_v47 = vld [vmem:[#allocation3 + $0x8c] ss:$0 sps:$4 sm:$0x11]   ;;  %v6759_v52 = vsel %vm10777_vm10, %v6754_v42, %v6758_v33  ;;  %vm10779_vm13 = vmmov %vm10773_vm6  ;;  %v5857_v22 = vor.u32 %v5856_v53, %v5852_v18  ;;  %vm10780_vm6 = vcmask 64544   ;;  %v4977_v1 = vrot.slane %v4975_v10, 1 }
 0x27c   : > { %v6744_v40 = vshll.u32 %v8816_v47, 16  ;;  %6840 = vrot.lane.b32.xlu0 %v6759_v52, %s8907_s6  ;;  %v4973_v16 = vor.u32 %v4972_v35, %v4968_v27  ;;  %402 = vst [vmem:[#allocation3 + $0xb4] sm:$0x1] %v401_v63  ;;  %459 = vst [vmem:[#allocation3 + $0xc8] sm:$0x1] %v458_v20  ;;  %v8824_v21 = vld [vmem:[#allocation3 + $0xa8] sm:$0xff]  }
 0x27d   : > { %v5862_v62 = vsel %vm10777_vm10, %v5857_v22, %v5861_v57  ;;  %v8823_v5 = vld [vmem:[#allocation3 + $0xa4] ss:$0 sps:$4 sm:$0x11]   ;;  %v8821_v58 = vld [vmem:[#allocation3 + $0x9c] sm:$0xff]   ;;  %v10365_v31 = vld [vmem:[#allocation3 + $0xa8] sm:$0xff]  }
 0x27e   : > { %v6746_v14 = vrot.slane %v6744_v40, 1  ;;  %v7094_v25 = vrot.slane %v8823_v5, 1  ;;  %v8826_v26 = vld [vmem:[#allocation3 + $0x9c] sm:$0xff]   ;;  %v8830_v2 = vld [vmem:[#allocation3 + $0xa4] ss:$0 sps:$4 sm:$0x11]  }
 0x27f   : > { %v8831_v32 = vld [vmem:[#allocation3 + $0x9c] sm:$0xff]   ;;  %v5883_v40 = vshll.u32 %v8830_v2, 16  ;;  %v8832_v34 = vld [vmem:[#allocation3 + $0xa4] ss:$0 sps:$4 sm:$0x11]  }
 0x280   : > { %v6747_v37 = vsel %vm10779_vm13, %v6742_v3, %v6746_v14  ;;  %5943 = vrot.lane.b32.xlu0 %v5862_v62, %s8906_s30  ;;  %vm10782_vm13 = vcmask 294144   ;;  %v6761_v48 = vshrl.u32 %v8831_v32, 16  ;;  %v6763_v45 = vshll.u32 %v8831_v32, 16  ;;  %v8836_v3 = vld [vmem:[#allocation3 + $0x9c] sm:$0xff]  }
 0x281   : > { %v6829_v24 = vpop.permute.xlu0 %6828  ;;  %6838 = vrot.lane.b32.xlu1 %v6747_v37, %s8907_s6  ;;  %v6768_v52 = vshll.u32 %v8832_v34, 16  ;;  %v8834_v55 = vld [vmem:[#allocation3 + $0x9c] sm:$0xfe]   ;;  %v8835_v22 = vld [vmem:[#allocation3 + $0xa4] ss:$0 sps:$4 sm:$0x11]  }
 0x282   : > { %v6765_v44 = vrot.slane %v6763_v45, 1  ;;  %v4992_v39 = vshrl.u32 %v8836_v3, 16  ;;  %v8886_v6 = vld [vmem:[#allocation3 + $0x9c] sm:$0xff]  }
 0x283   : > { %v6770_v46 = vrot.slane %v6768_v52, 1 }
 0x284   : > { %v6766_v37 = vor.u32 %v6765_v44, %v6761_v48 }
 0x285   : > { %v6827_v8 = vpop.permute.xlu1 %6826 }
 0x286   : > { %6871 = vst.msk [vmem:[#allocation4 + $0x18] sm:$0xff] %vm3392_vm4, %v6827_v8  ;;  %v5885_v8 = vrot.slane %v5883_v40, 1  ;;  %v4501_v40 = vld [vmem:[#allocation3 + $0xb4] sm:$0xf] }
 0x287   : > { %7159 = vst.msk [vmem:[#allocation4 + $0x18] sm:$0xff] %vm10778_vm11, %v10223_v23  ;;  %v5932_v56 = vpop.permute.xlu0 %5931  ;;  %v404_v23 = vsel %vm8948_vm3, 0, %v403_v38  ;;  %vm10781_vm11 = vcmask 97344   ;;  %v6199_v38 = vrot.slane %v8834_v55, 1 }
 0x288   : > { %5975 = vst.msk [vmem:[#allocation4 + $0x20] sm:$0xff] %vm2492_vm15, %v5932_v56  ;;  %405 = vst [vmem:[#allocation3 + $0xc0] sm:$0x1] %v404_v23 }
 0x289   : > { %6263 = vst.msk [vmem:[#allocation4 + $0x20] sm:$0xff] %vm2781_vm1, %v10236_v17  ;;  %v5038_v60 = vpop.permute.xlu1 %5037  ;;  %v8822_v17 = vld [vmem:[#allocation3 + $0x9c] sm:$0xfe]  }
 0x28a   : > { %6440 = vst.msk [vmem:[#allocation4 + $0x20] sm:$0xff] %vm2959_vm2, %v10163_v12  ;;  %v8829_v12 = vld [vmem:[#allocation3 + $0x9c] sm:$0xff]   ;;  %v7093_v19 = vrot.slane %v8822_v17, 1  ;;  %v8837_v17 = vld [vmem:[#allocation3 + $0xa4] ss:$0 sps:$4 sm:$0x11]  }
 0x28b   : > { %5080 = vst.msk [vmem:[#allocation4 + $0x28] sm:$0xff] %vm10780_vm6, %v5038_v60  ;;  %v10288_v4 = vpop.permute.xlu0 %6400  ;;  %vm10783_vm6 = vmmov %vm10777_vm10  ;;  %v5878_v29 = vshll.u32 %v8829_v12, 16  ;;  %v5876_v28 = vshrl.u32 %v8829_v12, 16  ;;  %v4994_v60 = vshll.u32 %v8836_v3, 16  ;;  %v4512_v3 = vld [vmem:[#allocation3 + $0xc8] sm:$0x1] }
 0x28c   : > { %6872 = vst.msk [vmem:[#allocation4 + $0x20] sm:$0xff] %vm3392_vm4, %v6829_v24  ;;  %v4978_v13 = vsel %vm10783_vm6, %v4973_v16, %v4977_v1  ;;  %v7095_v30 = vsel %vm1785_vm9, %v7093_v19, %v7094_v25  ;;  %vm10784_vm10 = vmmov %vm10783_vm6  ;;  %v6200_v1 = vrot.slane %v8835_v22, 1  ;;  %v4999_v25 = vshll.u32 %v8837_v17, 16 }
 0x28d   : > { %5368 = vst.msk [vmem:[#allocation4 + $0x28] sm:$0xff] %vm10781_vm11, %v10220_v49  ;;  %v10300_v49 = vpop.permute.xlu1 %5505  ;;  %5049 = vrot.lane.b32.xlu1 %v4978_v13, %s8903_s27  ;;  %7130 = vrot.lane.b32.xlu0 %v7095_v30, %s8905_s29  ;;  %v5880_v47 = vrot.slane %v5878_v29, 1  ;;  %vm10785_vm11 = vmmov %vm10783_vm6  ;;  %v4996_v13 = vrot.slane %v4994_v60, 1  ;;  %v8839_v30 = vld [vmem:[#allocation3 + $0xa8] sm:$0xff]  }
 0x28e   : > { %7160 = vst.msk [vmem:[#allocation4 + $0x20] sm:$0xff] %vm10782_vm13, %v10190_v61  ;;  %v454_v61 = vld [vmem:[#allocation3 + $0xbc] sm:$0x1]  ;;  %v6771_v62 = vsel %vm10785_vm11, %v6766_v37, %v6770_v46  ;;  %v5888_v32 = vshrl.u32 %v8839_v30, 16  ;;  %vm10786_vm13 = vmmov %vm10783_vm6  ;;  %v5890_v46 = vshll.u32 %v8839_v30, 16  ;;  %vm10787_vm6 = vcmask 64544  }
 0x28f   : > { %5544 = vst.msk [vmem:[#allocation4 + $0x28] sm:$0xff] %vm2059_vm14, %v10174_v7  ;;  %v455_v7 = vsel %vm8973_vm5, 0, %v454_v61  ;;  %v5504_v11 = vpop.permute.xlu0 %5503  ;;  %v5881_v33 = vor.u32 %v5880_v47, %v5876_v28  ;;  %v7175_v61 = vld [vmem:[#allocation4 + $0x18] sm:$0xff]  ;;  %v4508_v28 = vld [vmem:[#allocation3 + $0xc0] sm:$0xf] }
 0x290   : > { %5976 = vst.msk [vmem:[#allocation4 + $0x28] sm:$0xff] %vm2492_vm15, %v10229_v9  ;;  %456 = vst [vmem:[#allocation3 + $0xbc] sm:$0x1] %v455_v7  ;;  %v8827_v9 = vld [vmem:[#allocation3 + $0x9c] sm:$0xfe]   ;;  %8357 = vmatmul.mubr.msk.bf16.gmra.mrb[4].mxu1 %vm3740_vm12, %v7175_v61  ;;  %v5892_v60 = vrot.slane %v5890_v46, 1 }
 0x291   : > { %6264 = vst.msk [vmem:[#allocation4 + $0x28] sm:$0xff] %vm2781_vm1, %v10199_v51  ;;  %v6399_v59 = vpop.permute.xlu1 %6398  ;;  %6410 = vrot.lane.b32.xlu1 %v8821_v58, %s8902_s26  ;;  %v8828_v51 = vld [vmem:[#allocation3 + $0xa4] ss:$0 sps:$4 sm:$0x11]   ;;  %5515 = vrot.lane.b32.xlu0 %v8826_v26, %s8901_s25  ;;  %v5306_v24 = vrot.slane %v8827_v9, 1  ;;  %v5886_v53 = vsel %vm10784_vm10, %v5881_v33, %v5885_v8  ;;  %v6201_v58 = vsel %vm1785_vm9, %v6199_v38, %v6200_v1  ;;  %v5001_v26 = vrot.slane %v4999_v25, 1 }
 0x292   : > { %5545 = vst.msk [vmem:[#allocation4 + $0x30] sm:$0xff] %vm2059_vm14, %v5504_v11  ;;  %v5307_v54 = vrot.slane %v8828_v51, 1  ;;  %v4997_v11 = vor.u32 %v4996_v13, %v4992_v39  ;;  %v8840_v51 = vld [vmem:[#allocation3 + $0xb0] ss:$0 sps:$4 sm:$0x11]   ;;  %v8841_v8 = vld [vmem:[#allocation3 + $0xa8] sm:$0xff]   ;;  %v5893_v13 = vor.u32 %v5892_v60, %v5888_v32 }
 0x293   : > { %6441 = vst.msk [vmem:[#allocation4 + $0x28] sm:$0xff] %vm2959_vm2, %v6399_v59  ;;  %v10312_v15 = vpop.permute.xlu0 %7120  ;;  %v5895_v22 = vshll.u32 %v8840_v51, 16  ;;  %vm10788_vm10 = vcmask 97344   ;;  %v6773_v61 = vshrl.u32 %v8841_v8, 16 }
 0x294   : > { %v5308_v18 = vsel %vm1785_vm9, %v5306_v24, %v5307_v54  ;;  %v8838_v54 = vld [vmem:[#allocation3 + $0xa8] sm:$0xff]   ;;  %v5002_v45 = vsel %vm10786_vm13, %v4997_v11, %v5001_v26  ;;  %vm10793_vm13 = vmmov %vm10787_vm6 }
 0x295   : > { %v10315_v42 = vpop.permute.xlu1 %6225  ;;  %5517 = vrot.lane.b32.xlu1 %v8824_v21, %s8901_s25  ;;  %5947 = vrot.lane.b32.xlu0 %v5886_v53, %s8906_s30  ;;  %v7176_v52 = vld [vmem:[#allocation4 + $0x20] sm:$0xff]  ;;  %v5897_v1 = vrot.slane %v5895_v22, 1 }
 0x296   : > { %8360 = vmatprep.mubr.msk.bf16.mxu1 %vm3740_vm12, %v7176_v52 }
 0x297   : > { %v10318_v41 = vpop.permute.xlu0 %5331  ;;  %v4505_v37 = vld [vmem:[#allocation3 + $0xbc] sm:$0x1] }
 0x299   : > { %5341 = vrot.lane.b32.xlu1 %v5308_v18, %s8900_s24  ;;  %v10323_v56 = vpop.permute.xlu1 %5329  ;;  %6235 = vrot.lane.b32.xlu0 %v6201_v58, %s8904_s28 }
 0x29b   : > { %v10330_v5 = vpop.permute.xlu0 %7118 }
 0x29c   : > { %v8344_v14 = vpop.f32.mrb[28].mxu0 }
 0x29d   : > { %v3948_v27 = vadd.f32 %v10196_v43, %v8344_v14  ;;  %v3939_v35 = vpop.f32.mrb[29].mxu0  ;;  %6842 = vrot.lane.b32.xlu1 %v6771_v62, %s8907_s6  ;;  %v10337_v9 = vpop.permute.xlu1 %5937  ;;  %6412 = vrot.lane.b32.xlu0 %v8838_v54, %s8902_s26  ;;  %v10370_v54 = vld [vmem:[#allocation3 + $0xa8] sm:$0xfe]  }
 0x29e   : > { %v3940_v57 = vadd.f32 %v10196_v43, %v3939_v35  ;;  %v8345_v10 = vpop.f32.mrb[30].mxu0  ;;  %v5309_v52 = vrot.slane %v10370_v54, 1 }
 0x29f   : > { %v3984_v16 = vmax.f32 %v3948_v27, 0.0  ;;  %v3951_v23 = vadd.f32 %v10196_v43, %v8345_v10  ;;  %v3942_v63 = vpop.f32.mrb[31].mxu0  ;;  %v10340_v18 = vpop.permute.xlu0 %6223 }
 0x2a0   : > { %v3982_v50 = vmax.f32 %v3940_v57, 0.0  ;;  %v3943_v12 = vadd.f32 %v10196_v43, %v3942_v63  ;;  %v8842_v57 = vld [vmem:[#allocation3 + $0xb0] ss:$0 sps:$4 sm:$0x11]  }
 0x2a1   : > { %v8268_v19 = vpack.c.bf16 %v3984_v16, %v3984_v16  ;;  %v3985_v20 = vmax.f32 %v3951_v23, 0.0  ;;  %5053 = vrot.lane.b32.xlu1 %v5002_v45, %s8903_s27  ;;  %v6780_v30 = vshll.u32 %v8842_v57, 16 }
 0x2a2   : > { %v8266_v7 = vpack.c.bf16 %v3982_v50, %v3982_v50  ;;  %v3983_v29 = vmax.f32 %v3943_v12, 0.0 }
 0x2a3   : > { %v4338_v43 = vshrl.u32 %v8268_v19, 16  ;;  %v4341_v59 = vshll.u32 %v8268_v19, 16  ;;  %v8269_v21 = vpack.c.bf16 %v3985_v20, %v3985_v20  ;;  %v8843_v19 = vld [vmem:[#allocation3 + $0xa8] sm:$0xfe]  }
 0x2a4   : > { %v4321_v2 = vshrl.u32 %v8266_v7, 16  ;;  %v4324_v47 = vshll.u32 %v8266_v7, 16  ;;  %v8267_v24 = vpack.c.bf16 %v3983_v29, %v3983_v29  ;;  %v8844_v20 = vld [vmem:[#allocation3 + $0xb0] ss:$0 sps:$4 sm:$0x11]   ;;  %v6775_v7 = vshll.u32 %v8841_v8, 16 }
 0x2a5   : > { %v4340_v33 = vrot.slane %v4338_v43, 7  ;;  %v4346_v34 = vshrl.u32 %v8269_v21, 16  ;;  %v4349_v48 = vshll.u32 %v8269_v21, 16  ;;  %v5044_v16 = vpop.permute.xlu1 %5043  ;;  %v8845_v43 = vld [vmem:[#allocation3 + $0xa8] sm:$0xfe]   ;;  %v8862_v21 = vld [vmem:[#allocation3 + $0x54] sm:$0xff]  }
 0x2a6   : > { %v4323_v44 = vrot.slane %v4321_v2, 7  ;;  %v4329_v14 = vshrl.u32 %v8267_v24, 16  ;;  %v4332_v53 = vshll.u32 %v8267_v24, 16  ;;  %5083 = vst.msk [vmem:[#allocation4 + $0x40] sm:$0xff] %vm10787_vm6, %v5044_v16  ;;  %v6777_v26 = vrot.slane %v6775_v7, 1  ;;  %v8880_v8 = vld [vmem:[#allocation3 + $0x78] sm:$0xff]   ;;  %vm10794_vm6 = vmmov %vm10788_vm10 }
 0x2a7   : > { %v4343_v55 = vor.u32 %v4341_v59, %v4340_v33  ;;  %v4344_v27 = vrot.slane %v4340_v33, 4  ;;  %v4348_v35 = vrot.slane %v4346_v34, 7  ;;  %5371 = vst.msk [vmem:[#allocation4 + $0x40] sm:$0xff] %vm10788_vm10, %v10318_v41  ;;  %v6833_v29 = vpop.permute.xlu0 %6832  ;;  %v6202_v51 = vrot.slane %v8843_v19, 1 }
 0x2a8   : > { %v4326_v10 = vor.u32 %v4324_v47, %v4323_v44  ;;  %v4327_v38 = vrot.slane %v4323_v44, 4  ;;  %v4331_v39 = vrot.slane %v4329_v14, 7  ;;  %v8846_v2 = vld [vmem:[#allocation3 + $0xb0] ss:$0 sps:$4 sm:$0x11]   ;;  %v6778_v47 = vor.u32 %v6777_v26, %v6773_v61 }
 0x2a9   : > { %v4509_v23 = vsel %vm9007_vm8, %v4343_v55, %v4508_v28  ;;  %v4351_v63 = vor.u32 %v4349_v48, %v4348_v35  ;;  %v4353_v62 = vrot.slane %v4348_v35, 4  ;;  %v6831_v59 = vpop.permute.xlu1 %6830  ;;  %v6203_v28 = vrot.slane %v8844_v20, 1  ;;  %v8851_v34 = vld [vmem:[#allocation3 + $0xb0] ss:$0 sps:$4 sm:$0x11]  }
 0x2aa   : > { %4510 = vst [vmem:[#allocation3 + $0xc0] sm:$0xf] %v4509_v23  ;;  %v4502_v17 = vsel %vm9007_vm8, %v4326_v10, %v4501_v40  ;;  %v4334_v50 = vor.u32 %v4332_v53, %v4331_v39  ;;  %v4336_v12 = vrot.slane %v4331_v39, 4  ;;  %vm10789_vm8 = vmmov %vm10785_vm11  ;;  %vm10791_vm11 = vcmask 31744  }
 0x2ab   : > { %4503 = vst [vmem:[#allocation3 + $0xb4] sm:$0xf] %v4502_v17  ;;  %v4352_v58 = vsel %vm8999_vm7, %v4344_v27, %v4351_v63  ;;  %v4513_v25 = vsel %vm8948_vm3, %v4353_v62, %v4512_v3  ;;  %v5898_v41 = vsel %vm10789_vm8, %v5893_v13, %v5897_v1  ;;  %6873 = vst.msk [vmem:[#allocation4 + $0x28] sm:$0xff] %vm3392_vm4, %v6831_v59  ;;  %v6782_v24 = vrot.slane %v6780_v30, 1  ;;  %v5936_v32 = vpop.permute.xlu0 %5935 }
 0x2ac   : > { %4511 = vst.msk [vmem:[#allocation3 + $0xc4] sm:$0xf] %vm226_vm0, %v4352_v58  ;;  %4514 = vst [vmem:[#allocation3 + $0xc8] sm:$0x1] %v4513_v25  ;;  %v4335_v36 = vsel %vm8999_vm7, %v4327_v38, %v4334_v50  ;;  %v4506_v11 = vsel %vm8948_vm3, %v4336_v12, %v4505_v37  ;;  %5949 = vrot.lane.b32.xlu1 %v5898_v41, %s8906_s30  ;;  %vm10790_vm7 = vcmask 294144   ;;  %v6204_v33 = vsel %vm1785_vm9, %v6202_v51, %v6203_v28 }
 0x2ad   : > { %4504 = vst.msk [vmem:[#allocation3 + $0xb8] sm:$0xf] %vm226_vm0, %v4335_v36  ;;  %4507 = vst [vmem:[#allocation3 + $0xbc] sm:$0x1] %v4506_v11  ;;  %v7096_v40 = vrot.slane %v8845_v43, 1  ;;  %v7097_v45 = vrot.slane %v8846_v2, 1 }
 0x2ae   : > { %7161 = vst.msk [vmem:[#allocation4 + $0x28] sm:$0xff] %vm10790_vm7, %v10330_v5  ;;  %vm10792_vm0 = vmmov %vm10789_vm8  ;;  %v5042_v5 = vpop.permute.xlu1 %5041  ;;  %v5006_v44 = vshll.u32 %v10365_v31, 16  ;;  %v5310_v14 = vrot.slane %v8851_v34, 1  ;;  %v8857_v10 = vld [vmem:[#allocation3 + $0xb0] ss:$0 sps:$4 sm:$0x11]  }
 0x2af   : > { %4650 = vst.msk [vmem:[#allocation4 + $0x38] sm:$0xff] %vm10791_vm11, %v8862_v21  ;;  %v6783_v48 = vsel %vm10792_vm0, %v6778_v47, %v6782_v24  ;;  %v10387_v3 = vpop.permute.xlu0 %6404  ;;  %vm10795_vm10 = vmmov %vm10791_vm11  ;;  %v5011_v23 = vshll.u32 %v8857_v10, 16  ;;  %v8883_v10 = vld [vmem:[#allocation3 + $0x6c] sm:$0xff]  }
 0x2b0   : > { %5977 = vst.msk [vmem:[#allocation4 + $0x30] sm:$0xff] %vm2492_vm15, %v5936_v32  ;;  %6237 = vrot.lane.b32.xlu1 %v6204_v33, %s8904_s28  ;;  %6844 = vrot.lane.b32.xlu0 %v6783_v48, %s8907_s6  ;;  %vm10796_vm8 = vmmov %vm10790_vm7  ;;  %v5008_v57 = vrot.slane %v5006_v44, 1  ;;  %v5311_v25 = vsel %vm1785_vm9, %v5309_v52, %v5310_v14 }
 0x2b1   : > { %6265 = vst.msk [vmem:[#allocation4 + $0x30] sm:$0xff] %vm2781_vm1, %v10340_v18  ;;  %v5013_v13 = vrot.slane %v5011_v23, 1  ;;  %vm10797_vm7 = vmmov %vm10792_vm0 }
 0x2b2   : > { %6442 = vst.msk [vmem:[#allocation4 + $0x30] sm:$0xff] %vm2959_vm2, %v10288_v4  ;;  %v7098_v4 = vsel %vm1785_vm9, %v7096_v40, %v7097_v45  ;;  %v10397_v46 = vpop.permute.xlu1 %5509  ;;  %vm10798_vm11 = vmmov %vm10792_vm0 }
 0x2b3   : > { %5082 = vst.msk [vmem:[#allocation4 + $0x38] sm:$0xff] %vm10793_vm13, %v5042_v5  ;;  %v8869_v34 = vld [vmem:[#allocation3 + $0xc0] sm:$0xff]   ;;  %vm10799_vm13 = vmmov %vm10792_vm0 }
 0x2b4   : > { %6874 = vst.msk [vmem:[#allocation4 + $0x30] sm:$0xff] %vm3392_vm4, %v6833_v29  ;;  %v8847_v18 = vld [vmem:[#allocation3 + $0xb4] sm:$0xff]   ;;  %7132 = vrot.lane.b32.xlu0 %v7098_v4, %s8905_s29  ;;  %v8853_v27 = vld [vmem:[#allocation3 + $0xbc] ss:$0 sps:$4 sm:$0x11]   ;;  %v8871_v5 = vld [vmem:[#allocation3 + $0xc0] sm:$0xff]  }
 0x2b5   : > { %5370 = vst.msk [vmem:[#allocation4 + $0x38] sm:$0xff] %vm10794_vm6, %v10323_v56  ;;  %v8848_v53 = vld [vmem:[#allocation3 + $0xb4] sm:$0xfe]   ;;  %6414 = vrot.lane.b32.xlu1 %v8847_v18, %s8902_s26  ;;  %v8849_v56 = vld [vmem:[#allocation3 + $0xbc] ss:$0 sps:$4 sm:$0x11]   ;;  %vm10800_vm6 = vmmov %vm10795_vm10 }
 0x2b6   : > { %4653 = vst.msk [vmem:[#allocation4 + $0x50] sm:$0xff] %vm10795_vm10, %v8880_v8  ;;  %v8852_v55 = vld [vmem:[#allocation3 + $0xb4] sm:$0xff]   ;;  %v7100_v35 = vrot.slane %v8849_v56, 1  ;;  %v6403_v38 = vpop.permute.xlu1 %6402  ;;  %v8859_v63 = vld [vmem:[#allocation3 + $0xbc] ss:$0 sps:$4 sm:$0x11]   ;;  %vm10801_vm10 = vmmov %vm10800_vm6 }
 0x2b7   : > { %7162 = vst.msk [vmem:[#allocation4 + $0x30] sm:$0xff] %vm10796_vm8, %v10312_v15  ;;  %v7099_v15 = vrot.slane %v8848_v53, 1  ;;  %v6785_v37 = vshrl.u32 %v8852_v55, 16  ;;  %v6787_v22 = vshll.u32 %v8852_v55, 16  ;;  %v8858_v16 = vld [vmem:[#allocation3 + $0xb4] sm:$0xff]   ;;  %v5907_v20 = vshll.u32 %v8859_v63, 16 }
 0x2b8   : > { %5546 = vst.msk [vmem:[#allocation4 + $0x38] sm:$0xff] %vm2059_vm14, %v10300_v49  ;;  %v5508_v49 = vpop.permute.xlu0 %5507  ;;  %v8860_v62 = vld [vmem:[#allocation3 + $0xb4] sm:$0xff]   ;;  %v5902_v12 = vshll.u32 %v8858_v16, 16  ;;  %v5900_v19 = vshrl.u32 %v8858_v16, 16  ;;  %v7177_v59 = vld [vmem:[#allocation4 + $0x28] sm:$0xff]  ;;  %v6797_v4 = vshrl.u32 %v8869_v34, 16 }
 0x2b9   : > { %5978 = vst.msk [vmem:[#allocation4 + $0x38] sm:$0xff] %vm2492_vm15, %v10337_v9  ;;  %v6792_v9 = vshll.u32 %v8853_v27, 16  ;;  %v7101_v39 = vsel %vm1785_vm9, %v7099_v15, %v7100_v35  ;;  %v6789_v60 = vrot.slane %v6787_v22, 1  ;;  %v5018_v58 = vshll.u32 %v8860_v62, 16  ;;  %v8855_v26 = vld [vmem:[#allocation3 + $0xb4] sm:$0xff]   ;;  %8361 = vmatmul.mubr.msk.bf16.gmra.mrb[8].mxu1 %vm3740_vm12, %v7177_v59 }
 0x2ba   : > { %6266 = vst.msk [vmem:[#allocation4 + $0x38] sm:$0xff] %vm2781_vm1, %v10315_v42  ;;  %7134 = vrot.lane.b32.xlu0 %v7101_v39, %s8905_s29  ;;  %v5004_v42 = vshrl.u32 %v10365_v31, 16  ;;  %v5904_v29 = vrot.slane %v5902_v12, 1  ;;  %v8861_v36 = vld [vmem:[#allocation3 + $0xbc] ss:$0 sps:$4 sm:$0x11]   ;;  %v10412_v11 = vpop.permute.xlu1 %6229 }
 0x2bb   : > { %5547 = vst.msk [vmem:[#allocation4 + $0x40] sm:$0xff] %vm2059_vm14, %v5508_v49  ;;  %v6790_v17 = vor.u32 %v6789_v60, %v6785_v37  ;;  %v6794_v50 = vrot.slane %v6792_v9, 1  ;;  %v5016_v41 = vshrl.u32 %v8860_v62, 16  ;;  %v5020_v30 = vrot.slane %v5018_v58, 1  ;;  %v8863_v51 = vld [vmem:[#allocation3 + $0xb4] sm:$0xfe]  }
 0x2bc   : > { %6443 = vst.msk [vmem:[#allocation4 + $0x38] sm:$0xff] %vm2959_vm2, %v6403_v38  ;;  %v10408_v1 = vpop.permute.xlu0 %7124  ;;  %v5009_v7 = vor.u32 %v5008_v57, %v5004_v42  ;;  %v5023_v43 = vshll.u32 %v8861_v36, 16  ;;  %v8864_v28 = vld [vmem:[#allocation3 + $0xbc] ss:$0 sps:$4 sm:$0x11]   ;;  %v5905_v31 = vor.u32 %v5904_v29, %v5900_v19  ;;  %v5909_v47 = vrot.slane %v5907_v20, 1 }
 0x2bd   : > { %v6795_v61 = vsel %vm10797_vm7, %v6790_v17, %v6794_v50  ;;  %v5021_v24 = vor.u32 %v5020_v30, %v5016_v41  ;;  %v6205_v32 = vrot.slane %v8863_v51, 1  ;;  %v8865_v33 = vld [vmem:[#allocation3 + $0xb4] sm:$0xfe]   ;;  %v8866_v40 = vld [vmem:[#allocation3 + $0xbc] ss:$0 sps:$4 sm:$0x11]  }
 0x2be   : > { %5343 = vrot.lane.b32.xlu0 %v5311_v25, %s8900_s24  ;;  %6846 = vrot.lane.b32.xlu1 %v6795_v61, %s8907_s6  ;;  %v5014_v2 = vsel %vm10798_vm11, %v5009_v7, %v5013_v13  ;;  %v5025_v54 = vrot.slane %v5023_v43, 1  ;;  %v10422_v48 = vpop.permute.xlu1 %5333  ;;  %v6206_v45 = vrot.slane %v8864_v28, 1  ;;  %v5910_v8 = vsel %vm10792_vm0, %v5905_v31, %v5909_v47  ;;  %v8870_v56 = vld [vmem:[#allocation3 + $0xc8] ss:$0 sps:$4 sm:$0x11]   ;;  %v8867_v38 = vld [vmem:[#allocation3 + $0xc0] sm:$0xff]   ;;  %vm10804_vm11 = vmmov %vm10792_vm0 }
 0x2bf   : > { %v5312_v44 = vrot.slane %v8865_v33, 1  ;;  %v5313_v18 = vrot.slane %v8866_v40, 1  ;;  %v6799_v53 = vshll.u32 %v8869_v34, 16  ;;  %v5914_v55 = vshll.u32 %v8871_v5, 16  ;;  %v7178_v27 = vld [vmem:[#allocation4 + $0x30] sm:$0xff]  ;;  %v8868_v39 = vld [vmem:[#allocation3 + $0xc0] sm:$0xff]  }
 0x2c0   : > { %v10416_v21 = vpop.permute.xlu0 %5335  ;;  %v5026_v52 = vsel %vm10799_vm13, %v5021_v24, %v5025_v54  ;;  %v6207_v49 = vsel %vm1785_vm9, %v6205_v32, %v6206_v45  ;;  %v6804_v37 = vshll.u32 %v8870_v56, 16  ;;  %v8872_v22 = vld [vmem:[#allocation3 + $0xc8] ss:$0 sps:$4 sm:$0x11]   ;;  %8364 = vmatprep.mubr.msk.bf16.mxu1 %vm3740_vm12, %v7178_v27  ;;  %v5912_v60 = vshrl.u32 %v8871_v5, 16  ;;  %4652 = vst.msk [vmem:[#allocation4 + $0x48] sm:$0xff] %vm10800_vm6, %v8883_v10 }
 0x2c1   : > { %v6801_v15 = vrot.slane %v6799_v53, 1  ;;  %v5314_v35 = vsel %vm1785_vm9, %v5312_v44, %v5313_v18  ;;  %v5916_v57 = vrot.slane %v5914_v55, 1  ;;  %v5919_v16 = vshll.u32 %v8872_v22, 16  ;;  %v8873_v42 = vld [vmem:[#allocation3 + $0xc0] sm:$0xfe]   ;;  %v8884_v62 = vld [vmem:[#allocation3 + $0x90] sm:$0xff]  }
 0x2c2   : > { %5519 = vrot.lane.b32.xlu0 %v8855_v26, %s8901_s25  ;;  %5055 = vrot.lane.b32.xlu1 %v5014_v2, %s8903_s27  ;;  %v10433_v9 = vpop.permute.xlu1 %5941  ;;  %v8874_v63 = vld [vmem:[#allocation3 + $0xc8] ss:$0 sps:$4 sm:$0x11]   ;;  %v6806_v50 = vrot.slane %v6804_v37, 1  ;;  %v8875_v13 = vld [vmem:[#allocation3 + $0xc0] sm:$0xfe]  }
 0x2c3   : > { %v6802_v17 = vor.u32 %v6801_v15, %v6797_v4  ;;  %v5917_v12 = vor.u32 %v5916_v57, %v5912_v60  ;;  %v5921_v19 = vrot.slane %v5919_v16, 1  ;;  %v8876_v20 = vld [vmem:[#allocation3 + $0xc8] ss:$0 sps:$4 sm:$0x11]   ;;  %v406_v58 = vld [vmem:[#allocation3 + $0xcc] sm:$0x1] }
 0x2c4   : > { %v10426_v14 = vpop.permute.xlu0 %7122  ;;  %4655 = vst.msk [vmem:[#allocation4 + $0x60] sm:$0xff] %vm10801_vm10, %v8884_v62  ;;  %v7102_v61 = vrot.slane %v8873_v42, 1  ;;  %v407_v7 = vsel %vm8948_vm3, 0, %v406_v58  ;;  %v460_v29 = vld [vmem:[#allocation3 + $0xd4] sm:$0x1]  ;;  %vm10802_vm8 = vcmask 64544   ;;  %vm10805_vm3 = vmmov %vm10800_vm6 }
 0x2c5   : > { %v7103_v36 = vrot.slane %v8874_v63, 1  ;;  %v6208_v41 = vrot.slane %v8875_v13, 1  ;;  %v6209_v30 = vrot.slane %v8876_v20, 1  ;;  %408 = vst [vmem:[#allocation3 + $0xcc] sm:$0x1] %v407_v7  ;;  %v461_v43 = vsel %vm8973_vm5, 0, %v460_v29  ;;  %vm10807_vm13 = vmmov %vm10805_vm3 }
 0x2c6   : > { %5951 = vrot.lane.b32.xlu0 %v5910_v8, %s8906_s30  ;;  %5057 = vrot.lane.b32.xlu1 %v5026_v52, %s8903_s27  ;;  %v5048_v25 = vpop.permute.xlu1 %5047  ;;  %vm10803_vm7 = vcmask 97344   ;;  %v6807_v59 = vsel %vm10804_vm11, %v6802_v17, %v6806_v50  ;;  %v5922_v26 = vsel %vm10792_vm0, %v5917_v12, %v5921_v19  ;;  %462 = vst [vmem:[#allocation3 + $0xd4] sm:$0x1] %v461_v43  ;;  %v8885_v51 = vld [vmem:[#allocation3 + $0x84] sm:$0xff]   ;;  %vm10806_vm5 = vcmask 294144   ;;  %4656 = vst.msk [vmem:[#allocation4 + $0x68] sm:$0xff] %vm10807_vm13, %v8886_v6 }
 0x2c7   : > { %5085 = vst.msk [vmem:[#allocation4 + $0x50] sm:$0xff] %vm10802_vm8, %v5048_v25  ;;  %v7104_v2 = vsel %vm1785_vm9, %v7102_v61, %v7103_v36  ;;  %v8887_v47 = vld [vmem:[#allocation3 + $0xa8] sm:$0xff]   ;;  %v8888_v24 = vld [vmem:[#allocation3 + $0xb4] sm:$0xff]   ;;  %vm10808_vm6 = vmmov %vm10805_vm3  ;;  %vm10812_vm11 = vcmask 97344  }
 0x2c8   : > { %v6228_v23 = vpop.permute.xlu0 %6227  ;;  %5373 = vst.msk [vmem:[#allocation4 + $0x50] sm:$0xff] %vm10803_vm7, %v10416_v21  ;;  %v6210_v21 = vsel %vm1785_vm9, %v6208_v41, %v6209_v30  ;;  %vm10809_vm10 = vmmov %vm10805_vm3  ;;  %v8881_v40 = vld [vmem:[#allocation3 + $0xcc] sm:$0xfe]   ;;  %vm10811_vm7 = vcmask 64544  }
 0x2c9   : > { %4654 = vst.msk [vmem:[#allocation4 + $0x58] sm:$0xff] %vm10805_vm3, %v8885_v51  ;;  %vm10810_vm8 = vmmov %vm10806_vm5  ;;  %v7105_v56 = vrot.slane %v8881_v40, 1 }
 0x2ca   : > { %6239 = vrot.lane.b32.xlu0 %v6207_v49, %s8904_s28  ;;  %5345 = vrot.lane.b32.xlu1 %v5314_v35, %s8900_s24  ;;  %4657 = vst.msk [vmem:[#allocation4 + $0x70] sm:$0xff] %vm10808_vm6, %v8887_v47  ;;  %vm10813_vm3 = vmmov %vm10811_vm7 }
 0x2cb   : > { %4658 = vst.msk [vmem:[#allocation4 + $0x78] sm:$0xff] %vm10809_vm10, %v8888_v24  ;;  %vm10816_vm13 = vmmov %vm10813_vm3 }
 0x2cc   : > { %v6837_v0 = vpop.permute.xlu0 %6836  ;;  %v6835_v28 = vpop.permute.xlu1 %6834  ;;  %v8877_v54 = vld [vmem:[#allocation3 + $0xcc] sm:$0xff]   ;;  %vm10818_vm10 = vmmov %vm10810_vm8 }
 0x2cd   : > { %6875 = vst.msk [vmem:[#allocation4 + $0x38] sm:$0xff] %vm3392_vm4, %v6835_v28  ;;  %v8878_v32 = vld [vmem:[#allocation3 + $0xcc] sm:$0xff]   ;;  %v8879_v33 = vld [vmem:[#allocation3 + $0xd4] ss:$0 sps:$4 sm:$0x11]  }
 0x2ce   : > { %6416 = vrot.lane.b32.xlu0 %v8867_v38, %s8902_s26  ;;  %5521 = vrot.lane.b32.xlu1 %v8868_v39, %s8901_s25  ;;  %7163 = vst.msk [vmem:[#allocation4 + $0x38] sm:$0xff] %vm10806_vm5, %v10426_v14  ;;  %v6809_v45 = vshrl.u32 %v8878_v32, 16  ;;  %v6811_v5 = vshll.u32 %v8878_v32, 16  ;;  %v6816_v8 = vshll.u32 %v8879_v33, 16  ;;  %vm10814_vm5 = vmmov %vm10812_vm11 }
 0x2cf   : > { %v8882_v52 = vld [vmem:[#allocation3 + $0xd4] ss:$0 sps:$4 sm:$0x11]   ;;  %vm10817_vm6 = vmmov %vm10814_vm5 }
 0x2d0   : > { %v5940_v31 = vpop.permute.xlu0 %5939  ;;  %v5046_v44 = vpop.permute.xlu1 %5045  ;;  %v6813_v18 = vrot.slane %v6811_v5, 1  ;;  %v7106_v55 = vrot.slane %v8882_v52, 1 }
 0x2d1   : > { %5979 = vst.msk [vmem:[#allocation4 + $0x40] sm:$0xff] %vm2492_vm15, %v5940_v31 }
 0x2d2   : > { %6848 = vrot.lane.b32.xlu0 %v6807_v59, %s8907_s6  ;;  %5953 = vrot.lane.b32.xlu1 %v5922_v26, %s8906_s30  ;;  %6267 = vst.msk [vmem:[#allocation4 + $0x40] sm:$0xff] %vm2781_vm1, %v6228_v23  ;;  %v6814_v53 = vor.u32 %v6813_v18, %v6809_v45  ;;  %v7107_v15 = vsel %vm1785_vm9, %v7105_v56, %v7106_v55  ;;  %vm10815_vm9 = vmmov %vm10810_vm8  ;;  %v10540_v45 = vld [vmem:[%s10689_s4] ss:$0 sm:$0xff] }
 0x2d3   : > { %6444 = vst.msk [vmem:[#allocation4 + $0x40] sm:$0xff] %vm2959_vm2, %v10387_v3  ;;  %v6818_v3 = vrot.slane %v6816_v8, 1  ;;  %v7195_v8 = vld [vmem:[%s8982_s23 + $0x10] sm:$0xff]  ;;  %v7193_v18 = vld [vmem:[%s8982_s23] sm:$0xff] }
 0x2d4   : > { %6876 = vst.msk [vmem:[#allocation4 + $0x40] sm:$0xff] %vm3392_vm4, %v6837_v0  ;;  %v6409_v34 = vpop.permute.xlu0 %6408 }
 0x2d5   : > { %7164 = vst.msk [vmem:[#allocation4 + $0x40] sm:$0xff] %vm10810_vm8, %v10408_v1  ;;  %v7179_v14 = vld [vmem:[#allocation4 + $0x38] sm:$0xff]  ;;  %v5514_v1 = vpop.permute.xlu1 %5513 }
 0x2d6   : > { %7136 = vrot.lane.b32.xlu0 %v7104_v2, %s8905_s29  ;;  %6241 = vrot.lane.b32.xlu1 %v6210_v21, %s8904_s28  ;;  %5084 = vst.msk [vmem:[#allocation4 + $0x48] sm:$0xff] %vm10811_vm7, %v5046_v44  ;;  %vm10819_vm7 = vmmov %vm10813_vm3  ;;  %s10555_s28 = scalar_lea.vmem %s10690_s5, %s8204_s20 }
 0x2d7   : > { %5372 = vst.msk [vmem:[#allocation4 + $0x48] sm:$0xff] %vm10812_vm11, %v10422_v48  ;;  %8365 = vmatmul.mubr.msk.bf16.gmra.mrb[12].mxu1 %vm3740_vm12, %v7179_v14  ;;  %v6819_v48 = vsel %vm10792_vm0, %v6814_v53, %v6818_v3  ;;  %vm10820_vm11 = vmmov %vm10814_vm5 }
 0x2d8   : > { %5548 = vst.msk [vmem:[#allocation4 + $0x48] sm:$0xff] %vm2059_vm14, %v10397_v46  ;;  %v5512_v4 = vpop.permute.xlu0 %5511  ;;  %vm10821_vm0 = vmmov %vm10810_vm8 }
 0x2d9   : > { %5980 = vst.msk [vmem:[#allocation4 + $0x48] sm:$0xff] %vm2492_vm15, %v10433_v9  ;;  %v6407_v27 = vpop.permute.xlu1 %6406 }
 0x2da   : > { %6418 = vrot.lane.b32.xlu1 %v8877_v54, %s8902_s26  ;;  %5549 = vst.msk [vmem:[#allocation4 + $0x50] sm:$0xff] %vm2059_vm14, %v5512_v4  ;;  %v7196_v4 = vld [vmem:[%s8982_s23 + $0x18] sm:$0xff] }
 0x2db   : > { %6268 = vst.msk [vmem:[#allocation4 + $0x48] sm:$0xff] %vm2781_vm1, %v10412_v11 }
 0x2dc   : > { %v7180_v46 = vld [vmem:[#allocation4 + $0x40] sm:$0xff]  ;;  %v7129_v49 = vpop.permute.xlu0 %7128  ;;  %6445 = vst.msk [vmem:[#allocation4 + $0x48] sm:$0xff] %vm2959_vm2, %v6407_v27 }
 0x2dd   : > { %8368 = vmatprep.mubr.msk.bf16.mxu1 %vm3740_vm12, %v7180_v46  ;;  %v6234_v35 = vpop.permute.xlu1 %6233 }
 0x2de   : > { %6850 = vrot.lane.b32.xlu1 %v6819_v48, %s8907_s6 }
 0x2e0   : > { %v5340_v37 = vpop.permute.xlu0 %5339 }
 0x2e1   : > { %v5338_v22 = vpop.permute.xlu1 %5337 }
 0x2e2   : > { %7138 = vrot.lane.b32.xlu1 %v7107_v15, %s8905_s29 }
 0x2e4   : > { %v7127_v57 = vpop.permute.xlu0 %7126 }
 0x2e5   : > { %v5946_v11 = vpop.permute.xlu1 %5945 }
 0x2e8   : > { %v6232_v9 = vpop.permute.xlu0 %6231 }
 0x2e9   : > { %v5052_v10 = vpop.permute.xlu1 %5051 }
 0x2ea   : > { %5087 = vst.msk [vmem:[#allocation4 + $0x60] sm:$0xff] %vm10813_vm3, %v5052_v10  ;;  %vm10822_vm3 = vmmov %vm10821_vm0 }
 0x2eb   : > { %5375 = vst.msk [vmem:[#allocation4 + $0x60] sm:$0xff] %vm10814_vm5, %v5340_v37  ;;  %vm10823_vm5 = vmmov %vm10819_vm7 }
 0x2ee   : > { %v6841_v38 = vpop.permute.xlu0 %6840 }
 0x2f2   : > { %v5944_v60 = vpop.permute.xlu0 %5943 }
 0x2f3   : > { %v6839_v39 = vpop.permute.xlu1 %6838  ;;  %5981 = vst.msk [vmem:[#allocation4 + $0x50] sm:$0xff] %vm2492_vm15, %v5944_v60 }
 0x2f4   : > { %6877 = vst.msk [vmem:[#allocation4 + $0x48] sm:$0xff] %vm3392_vm4, %v6839_v39  ;;  %v7199_v39 = vld [vmem:[%s8982_s23 + $0x30] sm:$0xff] }
 0x2f5   : > { %7165 = vst.msk [vmem:[#allocation4 + $0x48] sm:$0xff] %vm10815_vm9, %v7127_v57  ;;  %vm10824_vm9 = vmmov %vm10817_vm6 }
 0x2f6   : > { %6269 = vst.msk [vmem:[#allocation4 + $0x50] sm:$0xff] %vm2781_vm1, %v6232_v9 }
 0x2f7   : > { %6446 = vst.msk [vmem:[#allocation4 + $0x50] sm:$0xff] %vm2959_vm2, %v6409_v34 }
 0x2f8   : > { %6878 = vst.msk [vmem:[#allocation4 + $0x50] sm:$0xff] %vm3392_vm4, %v6841_v38 }
 0x2f9   : > { %7166 = vst.msk [vmem:[#allocation4 + $0x50] sm:$0xff] %vm10818_vm10, %v7129_v49  ;;  %vm10826_vm10 = vmmov %vm10821_vm0 }
 0x2fc   : > { %v7181_v63 = vld [vmem:[#allocation4 + $0x48] sm:$0xff] }
 0x2fd   : > { %8369 = vmatmul.mubr.msk.bf16.gmra.mrb[16].mxu1 %vm3740_vm12, %v7181_v63 }
 0x2ff   : > { %v5050_v16 = vpop.permute.xlu1 %5049  ;;  %v7131_v42 = vpop.permute.xlu0 %7130 }
 0x300   : > { %5086 = vst.msk [vmem:[#allocation4 + $0x58] sm:$0xff] %vm10816_vm13, %v5050_v16  ;;  %v7182_v50 = vld [vmem:[#allocation4 + $0x50] sm:$0xff]  ;;  %vm10825_vm13 = vmmov %vm10823_vm5 }
 0x301   : > { %5374 = vst.msk [vmem:[#allocation4 + $0x58] sm:$0xff] %vm10817_vm6, %v5338_v22  ;;  %8372 = vmatprep.mubr.msk.bf16.mxu1 %vm3740_vm12, %v7182_v50 }
 0x302   : > { %5550 = vst.msk [vmem:[#allocation4 + $0x58] sm:$0xff] %vm2059_vm14, %v5514_v1  ;;  %v7194_v1 = vld [vmem:[%s8982_s23 + $0x8] sm:$0xff] }
 0x303   : > { %5982 = vst.msk [vmem:[#allocation4 + $0x58] sm:$0xff] %vm2492_vm15, %v5946_v11  ;;  %v6411_v23 = vpop.permute.xlu1 %6410  ;;  %v5516_v62 = vpop.permute.xlu0 %5515 }
 0x304   : > { %6270 = vst.msk [vmem:[#allocation4 + $0x58] sm:$0xff] %vm2781_vm1, %v6234_v35 }
 0x305   : > { %6447 = vst.msk [vmem:[#allocation4 + $0x58] sm:$0xff] %vm2959_vm2, %v6411_v23 }
 0x306   : > { %5551 = vst.msk [vmem:[#allocation4 + $0x60] sm:$0xff] %vm2059_vm14, %v5516_v62  ;;  %v7200_v62 = vld [vmem:[%s8982_s23 + $0x38] sm:$0xff] }
 0x307   : > { %v5518_v17 = vpop.permute.xlu1 %5517  ;;  %v5948_v13 = vpop.permute.xlu0 %5947 }
 0x308   : > { %5983 = vst.msk [vmem:[#allocation4 + $0x60] sm:$0xff] %vm2492_vm15, %v5948_v13  ;;  %v7198_v13 = vld [vmem:[%s8982_s23 + $0x28] sm:$0xff] }
 0x30b   : > { %v5342_v12 = vpop.permute.xlu1 %5341  ;;  %v6236_v20 = vpop.permute.xlu0 %6235 }
 0x30c   : > { %6271 = vst.msk [vmem:[#allocation4 + $0x60] sm:$0xff] %vm2781_vm1, %v6236_v20 }
 0x30f   : > { %v6843_v19 = vpop.permute.xlu1 %6842  ;;  %v6413_v25 = vpop.permute.xlu0 %6412 }
 0x310   : > { %6879 = vst.msk [vmem:[#allocation4 + $0x58] sm:$0xff] %vm3392_vm4, %v6843_v19 }
 0x311   : > { %7167 = vst.msk [vmem:[#allocation4 + $0x58] sm:$0xff] %vm10810_vm8, %v7131_v42  ;;  %vm10831_vm8 = vmmov %vm10821_vm0  ;;  %v7197_v42 = vld [vmem:[%s8982_s23 + $0x20] sm:$0xff] }
 0x312   : > { %6448 = vst.msk [vmem:[#allocation4 + $0x60] sm:$0xff] %vm2959_vm2, %v6413_v25 }
 0x313   : > { %v5054_v58 = vpop.permute.xlu1 %5053 }
 0x314   : > { %5088 = vst.msk [vmem:[#allocation4 + $0x68] sm:$0xff] %vm10819_vm7, %v5054_v58 }
 0x315   : > { %5376 = vst.msk [vmem:[#allocation4 + $0x68] sm:$0xff] %vm10820_vm11, %v5342_v12 }
 0x316   : > { %5552 = vst.msk [vmem:[#allocation4 + $0x68] sm:$0xff] %vm2059_vm14, %v5518_v17 }
 0x318   : > { %v7183_v61 = vld [vmem:[#allocation4 + $0x58] sm:$0xff] }
 0x319   : > { %8373 = vmatmul.mubr.msk.bf16.gmra.mrb[20].mxu1 %vm3740_vm12, %v7183_v61 }
 0x31e   : > { %v5950_v7 = vpop.permute.xlu1 %5949 }
 0x31f   : > { %5984 = vst.msk [vmem:[#allocation4 + $0x68] sm:$0xff] %vm2492_vm15, %v5950_v7 }
 0x322   : > { %v6238_v29 = vpop.permute.xlu1 %6237  ;;  %v6845_v36 = vpop.permute.xlu0 %6844 }
 0x323   : > { %6272 = vst.msk [vmem:[#allocation4 + $0x68] sm:$0xff] %vm2781_vm1, %v6238_v29 }
 0x324   : > { %6880 = vst.msk [vmem:[#allocation4 + $0x60] sm:$0xff] %vm3392_vm4, %v6845_v36 }
 0x326   : > { %v7133_v41 = vpop.permute.xlu0 %7132 }
 0x327   : > { %v6415_v30 = vpop.permute.xlu1 %6414  ;;  %7168 = vst.msk [vmem:[#allocation4 + $0x60] sm:$0xff] %vm10821_vm0, %v7133_v41 }
 0x328   : > { %6449 = vst.msk [vmem:[#allocation4 + $0x68] sm:$0xff] %vm2959_vm2, %v6415_v30  ;;  %v7203_v30 = vld [vmem:[%s8982_s23 + $0x50] sm:$0xff] }
 0x32c   : > { %v7135_v43 = vpop.permute.xlu0 %7134 }
 0x32e   : > { %v7184_v59 = vld [vmem:[#allocation4 + $0x60] sm:$0xff] }
 0x32f   : > { %8376 = vmatprep.mubr.msk.bf16.mxu1 %vm3740_vm12, %v7184_v59 }
 0x330   : > { %v5344_v26 = vpop.permute.xlu0 %5343  ;;  %v6847_v0 = vpop.permute.xlu1 %6846 }
 0x331   : > { %6881 = vst.msk [vmem:[#allocation4 + $0x68] sm:$0xff] %vm3392_vm4, %v6847_v0 }
 0x332   : > { %7169 = vst.msk [vmem:[#allocation4 + $0x68] sm:$0xff] %vm10822_vm3, %v7135_v43 }
 0x334   : > { %v5520_v51 = vpop.permute.xlu0 %5519  ;;  %v5056_v28 = vpop.permute.xlu1 %5055 }
 0x335   : > { %5089 = vst.msk [vmem:[#allocation4 + $0x70] sm:$0xff] %vm10823_vm5, %v5056_v28  ;;  %v7204_v28 = vld [vmem:[%s8982_s23 + $0x58] sm:$0xff] }
 0x336   : > { %5377 = vst.msk [vmem:[#allocation4 + $0x70] sm:$0xff] %vm10824_vm9, %v5344_v26  ;;  %v7201_v26 = vld [vmem:[%s8982_s23 + $0x40] sm:$0xff] }
 0x337   : > { %5553 = vst.msk [vmem:[#allocation4 + $0x70] sm:$0xff] %vm2059_vm14, %v5520_v51 }
 0x338   : > { %v5952_v6 = vpop.permute.xlu0 %5951  ;;  %v5058_v2 = vpop.permute.xlu1 %5057 }
 0x339   : > { %5985 = vst.msk [vmem:[#allocation4 + $0x70] sm:$0xff] %vm2492_vm15, %v5952_v6  ;;  %v7185_v21 = vld [vmem:[#allocation4 + $0x68] sm:$0xff] }
 0x33a   : > { %5090 = vst.msk [vmem:[#allocation4 + $0x78] sm:$0xff] %vm10825_vm13, %v5058_v2  ;;  %8377 = vmatmul.mubr.msk.bf16.gmra.mrb[24].mxu1 %vm3740_vm12, %v7185_v21 }
 0x33c   : > { %v6240_v31 = vpop.permute.xlu0 %6239  ;;  %v5346_v47 = vpop.permute.xlu1 %5345 }
 0x33d   : > { %6273 = vst.msk [vmem:[#allocation4 + $0x70] sm:$0xff] %vm2781_vm1, %v6240_v31  ;;  %v8354_v52 = vpop.f32.mrb[0].mxu1  ;;  %v7202_v31 = vld [vmem:[%s8982_s23 + $0x48] sm:$0xff] }
 0x33e   : > { %5378 = vst.msk [vmem:[#allocation4 + $0x78] sm:$0xff] %vm10817_vm6, %v5346_v47  ;;  %v7340_v44 = vadd.f32 %v8354_v52, %v10540_v45  ;;  %v7331_v3 = vpop.f32.mrb[1].mxu1  ;;  %v7207_v52 = vld [vmem:[%s8982_s23 + $0x70] sm:$0xff] }
 0x33f   : > { %v7332_v14 = vadd.f32 %v10540_v45, %v7331_v3  ;;  %v8355_v53 = vpop.f32.mrb[2].mxu1  ;;  %v7205_v3 = vld [vmem:[%s8982_s23 + $0x60] sm:$0xff] }
 0x340   : > { %v6417_v24 = vpop.permute.xlu0 %6416  ;;  %v5522_v54 = vpop.permute.xlu1 %5521  ;;  %v7460_v56 = vadd.f32 %v7340_v44, %v7195_v8  ;;  %v7343_v55 = vadd.f32 %v8355_v53, %v10540_v45  ;;  %v7208_v53 = vld [vmem:[%s8982_s23 + $0x78] sm:$0xff] }
 0x341   : > { %6450 = vst.msk [vmem:[#allocation4 + $0x70] sm:$0xff] %vm2959_vm2, %v6417_v24  ;;  %v7334_v48 = vpop.f32.mrb[3].mxu1  ;;  %v7458_v15 = vadd.f32 %v7332_v14, %v7193_v18 }
 0x342   : > { %5554 = vst.msk [vmem:[#allocation4 + $0x78] sm:$0xff] %vm2059_vm14, %v5522_v54  ;;  %v7335_v27 = vadd.f32 %v10540_v45, %v7334_v48  ;;  %v7492_v49 = vmax.f32 %v7460_v56, 0.0  ;;  %v7461_v35 = vadd.f32 %v7343_v55, %v7196_v4  ;;  %vm10827_vm14 = vcmask 31744   ;;  %v7206_v48 = vld [vmem:[%s8982_s23 + $0x68] sm:$0xff] }
 0x343   : > { %v7490_v37 = vmax.f32 %v7458_v15, 0.0 }
 0x344   : > { %v6849_v32 = vpop.permute.xlu0 %6848  ;;  %v5954_v33 = vpop.permute.xlu1 %5953  ;;  %v7459_v22 = vadd.f32 %v7335_v27, %v7194_v1  ;;  %7524 = vst.msk [vmem:[%s10555_s28 + $0x10] sm:$0xff] %vm10827_vm14, %v7492_v49  ;;  %v7493_v11 = vmax.f32 %v7461_v35, 0.0 }
 0x345   : > { %6882 = vst.msk [vmem:[#allocation4 + $0x70] sm:$0xff] %vm3392_vm4, %v6849_v32 }
 0x346   : > { %5986 = vst.msk [vmem:[#allocation4 + $0x78] sm:$0xff] %vm2492_vm15, %v5954_v33  ;;  %vm10828_vm15 = vmmov %vm10827_vm14  ;;  %v7491_v9 = vmax.f32 %v7459_v22, 0.0 }
 0x347   : > { %7522 = vst.msk [vmem:[%s10555_s28] sm:$0xff] %vm10828_vm15, %v7490_v37 }
 0x348   : > { %v7137_v40 = vpop.permute.xlu0 %7136  ;;  %v6242_v34 = vpop.permute.xlu1 %6241 }
 0x349   : > { %7170 = vst.msk [vmem:[#allocation4 + $0x70] sm:$0xff] %vm10826_vm10, %v7137_v40 }
 0x34a   : > { %6274 = vst.msk [vmem:[#allocation4 + $0x78] sm:$0xff] %vm2781_vm1, %v6242_v34  ;;  %vm10829_vm1 = vmmov %vm10827_vm14 }
 0x34b   : > { %7525 = vst.msk [vmem:[%s10555_s28 + $0x18] sm:$0xff] %vm10829_vm1, %v7493_v11  ;;  %vm10834_vm7 = vmmov %vm10829_vm1 }
 0x34c   : > { %v6419_v5 = vpop.permute.xlu1 %6418  ;;  %vm10835_vm11 = vmmov %vm10829_vm1 }
 0x34d   : > { %6451 = vst.msk [vmem:[#allocation4 + $0x78] sm:$0xff] %vm2959_vm2, %v6419_v5  ;;  %vm10830_vm2 = vmmov %vm10829_vm1 }
 0x34e   : > { %7523 = vst.msk [vmem:[%s10555_s28 + $0x8] sm:$0xff] %vm10830_vm2, %v7491_v9  ;;  %vm10836_vm0 = vmmov %vm10829_vm1  ;;  %v7211_v9 = vld [vmem:[%s8982_s23 + $0x90] sm:$0xff] }
 0x34f   : > { %vm10837_vm3 = vmmov %vm10836_vm0 }
 0x350   : > { %v7186_v46 = vld [vmem:[#allocation4 + $0x70] sm:$0xff]  ;;  %v6851_v57 = vpop.permute.xlu1 %6850  ;;  %vm10838_vm5 = vmmov %vm10836_vm0 }
 0x351   : > { %8380 = vmatprep.mubr.msk.bf16.mxu1 %vm3740_vm12, %v7186_v46  ;;  %6883 = vst.msk [vmem:[#allocation4 + $0x78] sm:$0xff] %vm3392_vm4, %v6851_v57  ;;  %vm10833_vm4 = vmmov %vm10829_vm1 }
 0x352   : > { %vm10839_vm9 = vmmov %vm10836_vm0 }
 0x353   : > { %vm10840_vm13 = vmmov %vm10836_vm0 }
 0x354   : > { %v7139_v10 = vpop.permute.xlu1 %7138  ;;  %vm10841_vm6 = vmmov %vm10836_vm0 }
 0x355   : > { %7171 = vst.msk [vmem:[#allocation4 + $0x78] sm:$0xff] %vm10831_vm8, %v7139_v10  ;;  %vm10842_vm10 = vmmov %vm10836_vm0 }
 0x356   : > { %vm10843_vm14 = vmmov %vm10836_vm0 }
 0x357   : > { %vm10844_vm15 = vmmov %vm10836_vm0 }
 0x358   : > { %vm10846_vm2 = vmmov %vm10836_vm0 }
 0x359   : > { %vm10847_vm8 = vmmov %vm10836_vm0 }
 0x35c   : > { %v7187_v38 = vld [vmem:[#allocation4 + $0x78] sm:$0xff] }
 0x35d   : > { %8381 = vmatmul.mubr.msk.bf16.gmra.mrb[28].mxu1 %vm3740_vm12, %v7187_v38  ;;  %vm10832_vm12 = vmmov %vm10829_vm1 }
 0x35e   : > { %vm10845_vm1 = vmmov %vm10836_vm0 }
 0x363   : > { %v8358_v60 = vpop.f32.mrb[4].mxu1 }
 0x364   : > { %v7356_v16 = vadd.f32 %v8358_v60, %v10540_v45  ;;  %v7347_v23 = vpop.f32.mrb[5].mxu1 }
 0x365   : > { %v7348_v63 = vadd.f32 %v10540_v45, %v7347_v23  ;;  %v8359_v17 = vpop.f32.mrb[6].mxu1 }
 0x366   : > { %v7464_v50 = vadd.f32 %v7356_v16, %v7199_v39  ;;  %v7359_v12 = vadd.f32 %v8359_v17, %v10540_v45  ;;  %v7350_v19 = vpop.f32.mrb[7].mxu1  ;;  %v7209_v39 = vld [vmem:[%s8982_s23 + $0x80] sm:$0xff]  ;;  %v7210_v17 = vld [vmem:[%s8982_s23 + $0x88] sm:$0xff] }
 0x367   : > { %v7462_v20 = vadd.f32 %v7348_v63, %v7197_v42  ;;  %v7351_v58 = vadd.f32 %v10540_v45, %v7350_v19  ;;  %v7212_v42 = vld [vmem:[%s8982_s23 + $0x98] sm:$0xff] }
 0x368   : > { %v7496_v25 = vmax.f32 %v7464_v50, 0.0  ;;  %v7465_v61 = vadd.f32 %v7359_v12, %v7200_v62 }
 0x369   : > { %v7494_v7 = vmax.f32 %v7462_v20, 0.0  ;;  %v7463_v29 = vadd.f32 %v7351_v58, %v7198_v13 }
 0x36a   : > { %7528 = vst.msk [vmem:[%s10555_s28 + $0x30] sm:$0xff] %vm10832_vm12, %v7496_v25  ;;  %v7497_v36 = vmax.f32 %v7465_v61, 0.0  ;;  %vm10848_vm12 = vmmov %vm10836_vm0 }
 0x36b   : > { %7526 = vst.msk [vmem:[%s10555_s28 + $0x20] sm:$0xff] %vm10833_vm4, %v7494_v7  ;;  %v7495_v41 = vmax.f32 %v7463_v29, 0.0  ;;  %v7215_v29 = vld [vmem:[%s8982_s23 + $0xb0] sm:$0xff]  ;;  %vm10849_vm4 = vmmov %vm10836_vm0 }
 0x36c   : > { %7529 = vst.msk [vmem:[%s10555_s28 + $0x38] sm:$0xff] %vm10834_vm7, %v7497_v36  ;;  %vm10850_vm7 = vmmov %vm10836_vm0 }
 0x36d   : > { %7527 = vst.msk [vmem:[%s10555_s28 + $0x28] sm:$0xff] %vm10835_vm11, %v7495_v41  ;;  %vm10851_vm11 = vmmov %vm10836_vm0 }
 0x38c   : > { %v8362_v43 = vpop.f32.mrb[8].mxu1 }
 0x38d   : > { %v7372_v59 = vadd.f32 %v8362_v43, %v10540_v45  ;;  %v7363_v0 = vpop.f32.mrb[9].mxu1 }
 0x38e   : > { %v7364_v51 = vadd.f32 %v10540_v45, %v7363_v0  ;;  %v8363_v6 = vpop.f32.mrb[10].mxu1 }
 0x38f   : > { %v7468_v2 = vadd.f32 %v7372_v59, %v7203_v30  ;;  %v7375_v21 = vadd.f32 %v8363_v6, %v10540_v45  ;;  %v7366_v47 = vpop.f32.mrb[11].mxu1  ;;  %v7213_v30 = vld [vmem:[%s8982_s23 + $0xa0] sm:$0xff]  ;;  %v7214_v6 = vld [vmem:[%s8982_s23 + $0xa8] sm:$0xff] }
 0x390   : > { %v7466_v24 = vadd.f32 %v7364_v51, %v7201_v26  ;;  %v7367_v54 = vadd.f32 %v10540_v45, %v7366_v47  ;;  %v7216_v26 = vld [vmem:[%s8982_s23 + $0xb8] sm:$0xff] }
 0x391   : > { %v7500_v32 = vmax.f32 %v7468_v2, 0.0  ;;  %v7469_v33 = vadd.f32 %v7375_v21, %v7204_v28 }
 0x392   : > { %v7498_v40 = vmax.f32 %v7466_v24, 0.0  ;;  %v7467_v34 = vadd.f32 %v7367_v54, %v7202_v31 }
 0x393   : > { %7532 = vst.msk [vmem:[%s10555_s28 + $0x50] sm:$0xff] %vm10836_vm0, %v7500_v32  ;;  %v7501_v5 = vmax.f32 %v7469_v33, 0.0 }
 0x394   : > { %7530 = vst.msk [vmem:[%s10555_s28 + $0x40] sm:$0xff] %vm10837_vm3, %v7498_v40  ;;  %v7499_v8 = vmax.f32 %v7467_v34, 0.0  ;;  %v7219_v34 = vld [vmem:[%s8982_s23 + $0xd0] sm:$0xff]  ;;  %vm10852_vm3 = vmmov %vm10836_vm0 }
 0x395   : > { %7533 = vst.msk [vmem:[%s10555_s28 + $0x58] sm:$0xff] %vm10838_vm5, %v7501_v5  ;;  %vm10853_vm5 = vmmov %vm10836_vm0 }
 0x396   : > { %7531 = vst.msk [vmem:[%s10555_s28 + $0x48] sm:$0xff] %vm10839_vm9, %v7499_v8  ;;  %vm10854_vm9 = vmmov %vm10836_vm0 }
 0x3aa   : > { %v8366_v44 = vpop.f32.mrb[12].mxu1 }
 0x3ab   : > { %v7388_v18 = vadd.f32 %v8366_v44, %v10540_v45  ;;  %v7379_v14 = vpop.f32.mrb[13].mxu1 }
 0x3ac   : > { %v7380_v4 = vadd.f32 %v10540_v45, %v7379_v14  ;;  %v8367_v56 = vpop.f32.mrb[14].mxu1 }
 0x3ad   : > { %v7472_v55 = vadd.f32 %v7388_v18, %v7207_v52  ;;  %v7391_v1 = vadd.f32 %v8367_v56, %v10540_v45  ;;  %v7382_v46 = vpop.f32.mrb[15].mxu1  ;;  %v7217_v52 = vld [vmem:[%s8982_s23 + $0xc0] sm:$0xff]  ;;  %v7218_v56 = vld [vmem:[%s8982_s23 + $0xc8] sm:$0xff] }
 0x3ae   : > { %v7470_v15 = vadd.f32 %v7380_v4, %v7205_v3  ;;  %v7383_v27 = vadd.f32 %v10540_v45, %v7382_v46  ;;  %v7220_v3 = vld [vmem:[%s8982_s23 + $0xd8] sm:$0xff] }
 0x3af   : > { %v7504_v49 = vmax.f32 %v7472_v55, 0.0  ;;  %v7473_v35 = vadd.f32 %v7391_v1, %v7208_v53 }
 0x3b0   : > { %v7502_v37 = vmax.f32 %v7470_v15, 0.0  ;;  %v7471_v22 = vadd.f32 %v7383_v27, %v7206_v48 }
 0x3b1   : > { %7536 = vst.msk [vmem:[%s10555_s28 + $0x70] sm:$0xff] %vm10840_vm13, %v7504_v49  ;;  %v7505_v57 = vmax.f32 %v7473_v35, 0.0  ;;  %vm10855_vm13 = vmmov %vm10836_vm0 }
 0x3b2   : > { %7534 = vst.msk [vmem:[%s10555_s28 + $0x60] sm:$0xff] %vm10841_vm6, %v7502_v37  ;;  %v7503_v11 = vmax.f32 %v7471_v22, 0.0  ;;  %v7223_v22 = vld [vmem:[%s8982_s23 + $0xf0] sm:$0xff]  ;;  %vm10856_vm6 = vmmov %vm10836_vm0 }
 0x3b3   : > { %7537 = vst.msk [vmem:[%s10555_s28 + $0x78] sm:$0xff] %vm10842_vm10, %v7505_v57  ;;  %vm10857_vm10 = vmmov %vm10836_vm0 }
 0x3b4   : > { %7535 = vst.msk [vmem:[%s10555_s28 + $0x68] sm:$0xff] %vm10843_vm14, %v7503_v11  ;;  %vm10858_vm14 = vmmov %vm10836_vm0 }
 0x3d0   : > { %v8370_v10 = vpop.f32.mrb[16].mxu1 }
 0x3d1   : > { %v7404_v38 = vadd.f32 %v8370_v10, %v10540_v45  ;;  %v7395_v60 = vpop.f32.mrb[17].mxu1 }
 0x3d2   : > { %v7396_v16 = vadd.f32 %v10540_v45, %v7395_v60  ;;  %v8371_v23 = vpop.f32.mrb[18].mxu1 }
 0x3d3   : > { %v7476_v63 = vadd.f32 %v7404_v38, %v7211_v9  ;;  %v7407_v62 = vadd.f32 %v8371_v23, %v10540_v45  ;;  %v7398_v50 = vpop.f32.mrb[19].mxu1  ;;  %v7221_v9 = vld [vmem:[%s8982_s23 + $0xe0] sm:$0xff]  ;;  %v7222_v23 = vld [vmem:[%s8982_s23 + $0xe8] sm:$0xff] }
 0x3d4   : > { %v7474_v12 = vadd.f32 %v7396_v16, %v7209_v39  ;;  %v7399_v13 = vadd.f32 %v10540_v45, %v7398_v50  ;;  %v7224_v39 = vld [vmem:[%s8982_s23 + $0xf8] sm:$0xff] }
 0x3d5   : > { %v7508_v19 = vmax.f32 %v7476_v63, 0.0  ;;  %v7477_v20 = vadd.f32 %v7407_v62, %v7212_v42 }
 0x3d6   : > { %v7506_v58 = vmax.f32 %v7474_v12, 0.0  ;;  %v7475_v25 = vadd.f32 %v7399_v13, %v7210_v17 }
 0x3d7   : > { %7540 = vst.msk [vmem:[%s10555_s28 + $0x90] sm:$0xff] %vm10844_vm15, %v7508_v19  ;;  %v7509_v61 = vmax.f32 %v7477_v20, 0.0 }
 0x3d8   : > { %7538 = vst.msk [vmem:[%s10555_s28 + $0x80] sm:$0xff] %vm10845_vm1, %v7506_v58  ;;  %v7507_v7 = vmax.f32 %v7475_v25, 0.0 }
 0x3d9   : > { %7541 = vst.msk [vmem:[%s10555_s28 + $0x98] sm:$0xff] %vm10846_vm2, %v7509_v61 }
 0x3da   : > { %7539 = vst.msk [vmem:[%s10555_s28 + $0x88] sm:$0xff] %vm10847_vm8, %v7507_v7 }
 0x3ec   : > { %v8374_v36 = vpop.f32.mrb[20].mxu1 }
 0x3ed   : > { %v7420_v41 = vadd.f32 %v8374_v36, %v10540_v45  ;;  %v7411_v43 = vpop.f32.mrb[21].mxu1 }
 0x3ee   : > { %v7412_v59 = vadd.f32 %v10540_v45, %v7411_v43  ;;  %v8375_v0 = vpop.f32.mrb[22].mxu1 }
 0x3ef   : > { %v7480_v51 = vadd.f32 %v7420_v41, %v7215_v29  ;;  %v7423_v28 = vadd.f32 %v8375_v0, %v10540_v45  ;;  %v7414_v2 = vpop.f32.mrb[23].mxu1 }
 0x3f0   : > { %v7478_v21 = vadd.f32 %v7412_v59, %v7213_v30  ;;  %v7415_v31 = vadd.f32 %v10540_v45, %v7414_v2 }
 0x3f1   : > { %v7512_v47 = vmax.f32 %v7480_v51, 0.0  ;;  %v7481_v24 = vadd.f32 %v7423_v28, %v7216_v26 }
 0x3f2   : > { %v7510_v54 = vmax.f32 %v7478_v21, 0.0  ;;  %v7479_v32 = vadd.f32 %v7415_v31, %v7214_v6 }
 0x3f3   : > { %7544 = vst.msk [vmem:[%s10555_s28 + $0xb0] sm:$0xff] %vm10848_vm12, %v7512_v47  ;;  %v7513_v33 = vmax.f32 %v7481_v24, 0.0 }
 0x3f4   : > { %7542 = vst.msk [vmem:[%s10555_s28 + $0xa0] sm:$0xff] %vm10849_vm4, %v7510_v54  ;;  %v7511_v40 = vmax.f32 %v7479_v32, 0.0 }
 0x3f5   : > { %7545 = vst.msk [vmem:[%s10555_s28 + $0xb8] sm:$0xff] %vm10850_vm7, %v7513_v33 }
 0x3f6   : > { %7543 = vst.msk [vmem:[%s10555_s28 + $0xa8] sm:$0xff] %vm10851_vm11, %v7511_v40 }
 0x40d   : > { %v8378_v5 = vpop.f32.mrb[24].mxu1 }
 0x40e   : > { %v7436_v8 = vadd.f32 %v8378_v5, %v10540_v45  ;;  %v7427_v44 = vpop.f32.mrb[25].mxu1 }
 0x40f   : > { %v7428_v18 = vadd.f32 %v10540_v45, %v7427_v44  ;;  %v8379_v14 = vpop.f32.mrb[26].mxu1 }
 0x410   : > { %v7484_v4 = vadd.f32 %v7436_v8, %v7219_v34  ;;  %v7439_v53 = vadd.f32 %v8379_v14, %v10540_v45  ;;  %v7430_v55 = vpop.f32.mrb[27].mxu1 }
 0x411   : > { %v7482_v1 = vadd.f32 %v7428_v18, %v7217_v52  ;;  %v7431_v48 = vadd.f32 %v10540_v45, %v7430_v55 }
 0x412   : > { %v7516_v46 = vmax.f32 %v7484_v4, 0.0  ;;  %v7485_v15 = vadd.f32 %v7439_v53, %v7220_v3 }
 0x413   : > { %v7514_v27 = vmax.f32 %v7482_v1, 0.0  ;;  %v7483_v49 = vadd.f32 %v7431_v48, %v7218_v56 }
 0x414   : > { %7548 = vst.msk [vmem:[%s10555_s28 + $0xd0] sm:$0xff] %vm10836_vm0, %v7516_v46  ;;  %v7517_v35 = vmax.f32 %v7485_v15, 0.0 }
 0x415   : > { %7546 = vst.msk [vmem:[%s10555_s28 + $0xc0] sm:$0xff] %vm10852_vm3, %v7514_v27  ;;  %v7515_v37 = vmax.f32 %v7483_v49, 0.0 }
 0x416   : > { %7549 = vst.msk [vmem:[%s10555_s28 + $0xd8] sm:$0xff] %vm10853_vm5, %v7517_v35 }
 0x417   : > { %7547 = vst.msk [vmem:[%s10555_s28 + $0xc8] sm:$0xff] %vm10854_vm9, %v7515_v37 }
 0x430   : > { %v8382_v57 = vpop.f32.mrb[28].mxu1 }
 0x431   : > { %v7452_v11 = vadd.f32 %v8382_v57, %v10540_v45  ;;  %v7443_v10 = vpop.f32.mrb[29].mxu1 }
 0x432   : > { %v7444_v38 = vadd.f32 %v10540_v45, %v7443_v10  ;;  %v8383_v60 = vpop.f32.mrb[30].mxu1 }
 0x433   : > { %v7488_v16 = vadd.f32 %v7452_v11, %v7223_v22  ;;  %v7455_v42 = vadd.f32 %v8383_v60, %v10540_v45  ;;  %v7446_v63 = vpop.f32.mrb[31].mxu1 }
 0x434   : > { %v7486_v62 = vadd.f32 %v7444_v38, %v7221_v9  ;;  %v7447_v17 = vadd.f32 %v10540_v45, %v7446_v63 }
 0x435   : > { %v7520_v50 = vmax.f32 %v7488_v16, 0.0  ;;  %v7489_v12 = vadd.f32 %v7455_v42, %v7224_v39 }
 0x436   : > { %v7518_v13 = vmax.f32 %v7486_v62, 0.0  ;;  %v7487_v19 = vadd.f32 %v7447_v17, %v7222_v23 }
 0x437   : > { %7552 = vst.msk [vmem:[%s10555_s28 + $0xf0] sm:$0xff] %vm10855_vm13, %v7520_v50  ;;  %v7521_v20 = vmax.f32 %v7489_v12, 0.0 }
 0x438   : > { %7550 = vst.msk [vmem:[%s10555_s28 + $0xe0] sm:$0xff] %vm10856_vm6, %v7518_v13  ;;  %v7519_v58 = vmax.f32 %v7487_v19, 0.0 }
 0x439   : > { %7553 = vst.msk [vmem:[%s10555_s28 + $0xf8] sm:$0xff] %vm10857_vm10, %v7521_v20 }
 0x43a   : > { %7551 = vst.msk [vmem:[%s10555_s28 + $0xe8] sm:$0xff] %vm10858_vm14, %v7519_v58 }
 0x43b PF: > { %s15_s18 = sadd.s32 1, %s8897_s18  }
 0x43c   : > { %p12_p4 = scmp.ge.s32.totalorder %s15_s18, 4  }
 0x43e   :  { %14 = sbr.rel (!%p12_p4) target bundleno = 1 (0x1), region = 76 }

</bundles_post_ra>
